<compile_context>
chip_gen: v6e
topology: v6e:2x2x1
jax: 0.10.0
libtpu: 0.0.40
codegen_flags: <defaults>
</compile_context>

<pallas_src>
import math

import jax
import jax.numpy as jnp
from jax import lax
from jax.experimental import pallas as pl
from jax.experimental.pallas import tpu as pltpu


_GX_CHUNK_STEPS = 64   # time-chunk for the hoisted input projection (bounds gx scratch)
_INNER_UNROLL = 8      # fori_loop unroll factor for the serial recurrence


def _round_up(x, m):
    return ((x + m - 1) // m) * m


# ------------------------- Pallas kernel -------------------------

def _lstm_cell(gates, c_prev, H, lane_dense):
    """PyTorch gate order i, f, g, o.  gates: (Bp, 4H) f32."""
    if lane_dense:
        # H is a multiple of 128: per-gate slices are already lane-aligned.
        i_g = jax.nn.sigmoid(gates[:, 0 * H:1 * H])
        f_g = jax.nn.sigmoid(gates[:, 1 * H:2 * H])
        g_g = jnp.tanh(gates[:, 2 * H:3 * H])
        o_g = jax.nn.sigmoid(gates[:, 3 * H:4 * H])
    else:
        # Small H: run the EUP nonlinearities lane-dense over the full (Bp, 4H) block
        # and slice the results, instead of four quarter-filled per-gate EUP passes.
        sig_all = jax.nn.sigmoid(gates)
        tnh_all = jnp.tanh(gates)
        i_g = sig_all[:, 0 * H:1 * H]
        f_g = sig_all[:, 1 * H:2 * H]
        g_g = tnh_all[:, 2 * H:3 * H]
        o_g = sig_all[:, 3 * H:4 * H]
    c_new = f_g * c_prev + i_g * g_g
    h_new = o_g * jnp.tanh(c_new)
    return h_new, c_new


def _make_seq2seq_kernel(num_layers, T_src, T_trg, Bp, H, gx_steps):
    """Build the fused encoder->decoder->linear kernel (closure over static sizes)."""
    lane_dense = (H % 128 == 0)

    def run_layer(T, x_ref, wih_ref, whh_ref, b_ref, h0, c0, gx_ref, y_ref):
        """One LSTM layer over T steps.

        x_ref : ref holding the layer input, time-major rows (>= T*Bp, D_in)
        gx_ref: (gx_steps*Bp, 4H) VMEM scratch for the time-chunked input projection
        y_ref : (>= T*Bp, H)      VMEM scratch for per-step hidden states
        Returns the final (h, c) as values (loop carries only; no per-step state stores).
        """
        wih = wih_ref[...]
        whh = whh_ref[...]          # loaded once per layer, reused every step
        b = b_ref[...]
        h, c = h0, c0

        for t0 in range(0, T, gx_steps):            # static chunk loop
            steps = min(gx_steps, T - t0)
            rows = steps * Bp
            base = t0 * Bp
            # Hoisted, time-chunked input projection: one MXU GEMM per chunk instead of
            # `steps` tiny ones; input is consumed directly from the (scratch/input) ref.
            gx_ref[pl.ds(0, rows), :] = (
                jnp.dot(x_ref[pl.ds(base, rows), :], wih,
                        preferred_element_type=jnp.float32) + b)

            def body(s, carry, _base=base):
                h, c = carry
                grow = pl.multiple_of(s * Bp, Bp)            # aligned gx slice
                yrow = pl.multiple_of(_base + s * Bp, Bp)    # aligned h store
                # TODO(synk): hold whh resident via pltpu.matmul_push_rhs/acc_lhs/pop to
                # take the weight push off the serial critical path (kept jnp.dot here).
                gates = gx_ref[pl.ds(grow, Bp), :] + jnp.dot(
                    h, whh, preferred_element_type=jnp.float32)
                h, c = _lstm_cell(gates, c, H, lane_dense)
                y_ref[pl.ds(yrow, Bp), :] = h
                return h, c

            h, c = lax.fori_loop(0, steps, body, (h, c),
                                 unroll=min(steps, _INNER_UNROLL))
        return h, c

    def kernel(*refs):
        nw = 3 * num_layers
        src_ref, trg_ref = refs[0], refs[1]
        w_refs = refs[2:2 + 2 * nw]
        enc_w = w_refs[:nw]
        dec_w = w_refs[nw:]
        out_w_ref = refs[2 + 2 * nw]
        out_b_ref = refs[3 + 2 * nw]
        out_ref = refs[4 + 2 * nw]
        act_a, act_b, gx = refs[5 + 2 * nw:]

        zeros = jnp.zeros((Bp, H), jnp.float32)
        bufs = (act_a, act_b)                        # ping-pong inter-layer buffers

        # ---------------- encoder stack ----------------
        enc_h, enc_c = [], []
        x_ref = src_ref
        for li in range(num_layers):
            wih, whh, b = enc_w[3 * li], enc_w[3 * li + 1], enc_w[3 * li + 2]
            y_ref = bufs[li % 2]
            hN, cN = run_layer(T_src, x_ref, wih, whh, b, zeros, zeros, gx, y_ref)
            enc_h.append(hN)
            enc_c.append(cN)
            # nn.LSTM inter-layer dropout (p=0.3) is training-only; omitted (eval mode).
            x_ref = y_ref

        # ------- decoder stack (init from encoder final states; scratch is REUSED) -------
        x_ref = trg_ref
        for li in range(num_layers):
            wih, whh, b = dec_w[3 * li], dec_w[3 * li + 1], dec_w[3 * li + 2]
            y_ref = bufs[li % 2]
            run_layer(T_trg, x_ref, wih, whh, b, enc_h[li], enc_c[li], gx, y_ref)
            x_ref = y_ref

        # ---------------- fused output Linear (lane-dense, 128-padded) ----------------
        y = x_ref[pl.ds(0, T_trg * Bp), :]
        out_ref[...] = (jnp.dot(y, out_w_ref[...],
                                preferred_element_type=jnp.float32)
                        + out_b_ref[...]).astype(out_ref.dtype)

    return kernel


# ------------------------- Wrapper -------------------------

@jax.jit
def seq2seq_forward(params, src, trg):
    """src: (B, T_src, input_dim), trg: (B, T_trg, output_dim) -> (B, T_trg, output_dim)."""
    B, T_src, Din = src.shape
    _, T_trg, Dout = trg.shape
    L = len(params["encoder"])
    H = params["encoder"][0][1].shape[0]            # whh_t has shape (H, 4H)

    Bp = _round_up(max(B, 8), 8)                    # sublane-tile padded batch
    Op = _round_up(max(Dout, 128), 128)             # lane-dense padded linear output
    Tmax = max(T_src, T_trg)
    gx_steps = min(Tmax, _GX_CHUNK_STEPS)

    def prep(x, T, D):
        x_tm = jnp.transpose(x, (1, 0, 2)).astype(jnp.float32)     # (T, B, D) time-major
        x_tm = jnp.pad(x_tm, ((0, 0), (0, Bp - B), (0, 0)))
        return x_tm.reshape(T * Bp, D)

    src2 = prep(src, T_src, Din)
    trg2 = prep(trg, T_trg, Dout)

    flat_w = []
    for (wih_t, whh_t, b) in list(params["encoder"]) + list(params["decoder"]):
        flat_w += [wih_t, whh_t, b.reshape(1, 4 * H)]

    out_w_p = jnp.pad(params["out_w_t"], ((0, 0), (0, Op - Dout)))
    out_b_p = jnp.pad(params["out_b"], ((0, Op - Dout),)).reshape(1, Op)

    kernel = _make_seq2seq_kernel(L, T_src, T_trg, Bp, H, gx_steps)

    # Encoder and decoder phases reuse these buffers (peak = max, not sum).
    scratch_shapes = [
        pltpu.VMEM((Tmax * Bp, H), jnp.float32),          # inter-layer activations (ping)
        pltpu.VMEM((Tmax * Bp, H), jnp.float32),          # inter-layer activations (pong)
        pltpu.VMEM((gx_steps * Bp, 4 * H), jnp.float32),  # time-chunked input projection
    ]

    # Scoped-VMEM limit sized from the actual footprint, clamped inside v7x's 64 MiB.
    nbytes = 4
    weight_elems = sum(int(w.size) for w in flat_w) + int(out_w_p.size) + int(out_b_p.size)
    io_elems = int(src2.size) + int(trg2.size) + T_trg * Bp * Op
    scratch_elems = 2 * Tmax * Bp * H + gx_steps * Bp * 4 * H
    est = (2 * io_elems + weight_elems + scratch_elems) * nbytes
    vmem_limit = int(min(max(est + (8 << 20), 32 << 20), 56 << 20))

    # TODO(synk): at production sizes, stream per-layer weights from HBM (pl.ANY + manual
    # double-buffered DMA) and split the padded batch across the two v7x TensorCores.
    out2 = pl.pallas_call(
        kernel,
        out_shape=jax.ShapeDtypeStruct((T_trg * Bp, Op), jnp.float32),
        scratch_shapes=scratch_shapes,
        compiler_params=pltpu.CompilerParams(vmem_limit_bytes=vmem_limit),
    )(src2, trg2, *flat_w, out_w_p, out_b_p)

    out_tm = out2.reshape(T_trg, Bp, Op)[:, :B, :Dout]
    return jnp.transpose(out_tm, (1, 0, 2))


# ------------------------- Parameter init (deterministic, PyTorch-shaped) -------------------------

def init_params(key, input_dim, hidden_dim, output_dim, num_layers):
    scale = 1.0 / math.sqrt(hidden_dim)

    def uni(k, shape):
        return jax.random.uniform(k, shape, jnp.float32, -scale, scale)

    def lstm_params(key, first_in):
        layers = []
        for li in range(num_layers):
            d_in = first_in if li == 0 else hidden_dim
            key, k1, k2, k3, k4 = jax.random.split(key, 5)
            w_ih = uni(k1, (4 * hidden_dim, d_in))       # PyTorch weight_ih_l{k}
            w_hh = uni(k2, (4 * hidden_dim, hidden_dim))
            b_ih = uni(k3, (4 * hidden_dim,))
            b_hh = uni(k4, (4 * hidden_dim,))
            layers.append((w_ih.T, w_hh.T, b_ih + b_hh))
        return key, layers

    key, enc = lstm_params(key, input_dim)
    key, dec = lstm_params(key, output_dim)
    key, k1, k2 = jax.random.split(key, 3)
    out_w = uni(k1, (output_dim, hidden_dim))            # PyTorch Linear weight
    out_b = uni(k2, (output_dim,))
    return {"encoder": enc, "decoder": dec, "out_w_t": out_w.T, "out_b": out_b}


# ------------------------- Pure-JAX reference -------------------------

def _ref_lstm_layer(x_tm, wih_t, whh_t, b, h0, c0):
    H = h0.shape[-1]

    def step(carry, x_t):
        h, c = carry
        gates = x_t @ wih_t + h @ whh_t + b
        i = jax.nn.sigmoid(gates[:, :H])
        f = jax.nn.sigmoid(gates[:, H:2 * H])
        g = jnp.tanh(gates[:, 2 * H:3 * H])
        o = jax.nn.sigmoid(gates[:, 3 * H:])
        c = f * c + i * g
        h = o * jnp.tanh(c)
        return (h, c), h

    (hN, cN), ys = jax.lax.scan(step, (h0, c0), x_tm)
    return ys, hN, cN


def ref_forward(params, src, trg):
    B = src.shape[0]
    L = len(params["encoder"])
    H = params["encoder"][0][1].shape[0]

    def run(x_btd, layers, h0s, c0s):
        x_tm = jnp.transpose(x_btd, (1, 0, 2))
        hs, cs = [], []
        for li, (wih_t, whh_t, b) in enumerate(layers):
            x_tm, hN, cN = _ref_lstm_layer(x_tm, wih_t, whh_t, b, h0s[li], c0s[li])
            hs.append(hN)
            cs.append(cN)
        return jnp.transpose(x_tm, (1, 0, 2)), jnp.stack(hs), jnp.stack(cs)

    h0 = jnp.zeros((L, B, H), jnp.float32)
    c0 = jnp.zeros((L, B, H), jnp.float32)
    _, eh, ec = run(src, params["encoder"], h0, c0)
    dy, _, _ = run(trg, params["decoder"], eh, ec)
    return dy @ params["out_w_t"] + params["out_b"]


# ------------------------- Main -------------------------

if __name__ == "__main__":
    input_dim, hidden_dim, output_dim, num_layers = 8, 32, 4, 3
    B, T_src, T_trg = 2, 6, 5

    key = jax.random.PRNGKey(0)
    key, k_src, k_trg, k_par = jax.random.split(key, 4)
    src = jax.random.normal(k_src, (B, T_src, input_dim), jnp.float32)
    trg = jax.random.normal(k_trg, (B, T_trg, output_dim), jnp.float32)
    params = init_params(k_par, input_dim, hidden_dim, output_dim, num_layers)

    out = seq2seq_forward(params, src, trg)
    out = jax.block_until_ready(out)

    ref = jax.block_until_ready(ref_forward(params, src, trg))
    assert out.shape == (B, T_trg, output_dim), out.shape
    assert jnp.allclose(out, ref, atol=1e-4, rtol=1e-4), float(jnp.max(jnp.abs(out - ref)))

    print("KERNEL_OK")
</pallas_src>

<mosaic_0001>
module attributes {stable_mosaic.version = 11 : i64} {
  func.func @kernel(%arg0: memref<48x8xf32, #tpu.memory_space<vmem>>, %arg1: memref<40x4xf32, #tpu.memory_space<vmem>>, %arg2: memref<8x128xf32, #tpu.memory_space<vmem>>, %arg3: memref<32x128xf32, #tpu.memory_space<vmem>>, %arg4: memref<1x128xf32, #tpu.memory_space<vmem>>, %arg5: memref<32x128xf32, #tpu.memory_space<vmem>>, %arg6: memref<32x128xf32, #tpu.memory_space<vmem>>, %arg7: memref<1x128xf32, #tpu.memory_space<vmem>>, %arg8: memref<32x128xf32, #tpu.memory_space<vmem>>, %arg9: memref<32x128xf32, #tpu.memory_space<vmem>>, %arg10: memref<1x128xf32, #tpu.memory_space<vmem>>, %arg11: memref<4x128xf32, #tpu.memory_space<vmem>>, %arg12: memref<32x128xf32, #tpu.memory_space<vmem>>, %arg13: memref<1x128xf32, #tpu.memory_space<vmem>>, %arg14: memref<32x128xf32, #tpu.memory_space<vmem>>, %arg15: memref<32x128xf32, #tpu.memory_space<vmem>>, %arg16: memref<1x128xf32, #tpu.memory_space<vmem>>, %arg17: memref<32x128xf32, #tpu.memory_space<vmem>>, %arg18: memref<32x128xf32, #tpu.memory_space<vmem>>, %arg19: memref<1x128xf32, #tpu.memory_space<vmem>>, %arg20: memref<32x128xf32, #tpu.memory_space<vmem>>, %arg21: memref<1x128xf32, #tpu.memory_space<vmem>>, %arg22: memref<40x128xf32, #tpu.memory_space<vmem>>, %arg23: memref<48x32xf32, #tpu.memory_space<vmem>>, %arg24: memref<48x32xf32, #tpu.memory_space<vmem>>, %arg25: memref<48x128xf32, #tpu.memory_space<vmem>>) attributes {dimension_semantics = [], scalar_prefetch = 0 : i64, scratch_operands = 3 : i64, tpu.core_type = #tpu.core_type<tc>} {
    %cst = arith.constant 0.000000e+00 : f32
    %0 = vector.broadcast %cst : f32 to vector<8x32xf32>
    %c0 = arith.constant 0 : index
    %c0_0 = arith.constant 0 : index
    %1 = vector.load %arg2[%c0, %c0_0] : memref<8x128xf32, #tpu.memory_space<vmem>>, vector<8x128xf32>
    %c0_1 = arith.constant 0 : index
    %c0_2 = arith.constant 0 : index
    %2 = vector.load %arg3[%c0_1, %c0_2] : memref<32x128xf32, #tpu.memory_space<vmem>>, vector<32x128xf32>
    %c0_3 = arith.constant 0 : index
    %c0_4 = arith.constant 0 : index
    %3 = vector.load %arg4[%c0_3, %c0_4] : memref<1x128xf32, #tpu.memory_space<vmem>>, vector<1x128xf32>
    %c0_5 = arith.constant 0 : index
    %c0_6 = arith.constant 0 : index
    %4 = vector.load %arg0[%c0_5, %c0_6] : memref<48x8xf32, #tpu.memory_space<vmem>>, vector<48x8xf32>
    %cst_7 = arith.constant dense<0.000000e+00> : vector<48x128xf32>
    %5 = tpu.matmul %4, %1, %cst_7 {dimension_numbers = #tpu.dot_dimension_numbers<[1], [0], [0], [1], [0, 0, 1, 1], [], []>} : vector<48x8xf32>, vector<8x128xf32>, vector<48x128xf32> -> vector<48x128xf32>
    %6 = vector.broadcast %3 : vector<1x128xf32> to vector<48x128xf32>
    %7 = arith.addf %5, %6 : vector<48x128xf32>
    %c0_8 = arith.constant 0 : index
    %c0_9 = arith.constant 0 : index
    %8 = vector.load %arg25[%c0_8, %c0_9] : memref<48x128xf32, #tpu.memory_space<vmem>>, vector<48x128xf32>
    tpu.vector_store %arg25[%c0_8, %c0_9], %7 {strides = array<i32>} : memref<48x128xf32, #tpu.memory_space<vmem>>, vector<48x128xf32>,
    %c0_i32 = arith.constant 0 : i32
    %c8_i32 = arith.constant 8 : i32
    %9 = arith.muli %c0_i32, %c8_i32 : i32
    %10 = tpu.assume_multiple %9, 8 : i32
    %c8_i32_10 = arith.constant 8 : i32
    %11 = arith.muli %c0_i32, %c8_i32_10 : i32
    %c0_i32_11 = arith.constant 0 : i32
    %12 = arith.addi %c0_i32_11, %11 : i32
    %13 = tpu.assume_multiple %12, 8 : i32
    %14 = arith.index_cast %10 : i32 to index
    %c0_12 = arith.constant 0 : index
    %15 = vector.load %arg25[%14, %c0_12] : memref<48x128xf32, #tpu.memory_space<vmem>>, vector<8x128xf32>
    %cst_13 = arith.constant dense<0.000000e+00> : vector<8x128xf32>
    %16 = tpu.matmul %0, %2, %cst_13 {dimension_numbers = #tpu.dot_dimension_numbers<[1], [0], [0], [1], [0, 0, 1, 1], [], []>} : vector<8x32xf32>, vector<32x128xf32>, vector<8x128xf32> -> vector<8x128xf32>
    %17 = arith.addf %15, %16 : vector<8x128xf32>
    %18 = arith.negf %17 : vector<8x128xf32>
    %19 = math.exp %18 : vector<8x128xf32>
    %cst_14 = arith.constant 1.000000e+00 : f32
    %20 = vector.broadcast %cst_14 : f32 to vector<8x128xf32>
    %21 = arith.addf %20, %19 : vector<8x128xf32>
    %22 = arith.divf %20, %21 : vector<8x128xf32>
    %23 = math.tanh %17 : vector<8x128xf32>
    %24 = vector.extract_strided_slice %22 {offsets = [0, 0], sizes = [8, 32], strides = [1, 1]} : vector<8x128xf32> to vector<8x32xf32>
    %25 = vector.extract_strided_slice %22 {offsets = [0, 32], sizes = [8, 32], strides = [1, 1]} : vector<8x128xf32> to vector<8x32xf32>
    %26 = vector.extract_strided_slice %23 {offsets = [0, 64], sizes = [8, 32], strides = [1, 1]} : vector<8x128xf32> to vector<8x32xf32>
    %27 = vector.extract_strided_slice %22 {offsets = [0, 96], sizes = [8, 32], strides = [1, 1]} : vector<8x128xf32> to vector<8x32xf32>
    %28 = arith.mulf %25, %0 : vector<8x32xf32>
    %29 = arith.mulf %24, %26 : vector<8x32xf32>
    %30 = arith.addf %28, %29 : vector<8x32xf32>
    %31 = math.tanh %30 : vector<8x32xf32>
    %32 = arith.mulf %27, %31 : vector<8x32xf32>
    %33 = arith.index_cast %13 : i32 to index
    %c0_15 = arith.constant 0 : index
    %34 = vector.load %arg23[%33, %c0_15] : memref<48x32xf32, #tpu.memory_space<vmem>>, vector<8x32xf32>
    tpu.vector_store %arg23[%33, %c0_15], %32 {strides = array<i32>} : memref<48x32xf32, #tpu.memory_space<vmem>>, vector<8x32xf32>,
    %c1_i32 = arith.constant 1 : i32
    %c8_i32_16 = arith.constant 8 : i32
    %35 = arith.muli %c1_i32, %c8_i32_16 : i32
    %36 = tpu.assume_multiple %35, 8 : i32
    %c8_i32_17 = arith.constant 8 : i32
    %37 = arith.muli %c1_i32, %c8_i32_17 : i32
    %c0_i32_18 = arith.constant 0 : i32
    %38 = arith.addi %c0_i32_18, %37 : i32
    %39 = tpu.assume_multiple %38, 8 : i32
    %40 = arith.index_cast %36 : i32 to index
    %c0_19 = arith.constant 0 : index
    %41 = vector.load %arg25[%40, %c0_19] : memref<48x128xf32, #tpu.memory_space<vmem>>, vector<8x128xf32>
    %cst_20 = arith.constant dense<0.000000e+00> : vector<8x128xf32>
    %42 = tpu.matmul %32, %2, %cst_20 {dimension_numbers = #tpu.dot_dimension_numbers<[1], [0], [0], [1], [0, 0, 1, 1], [], []>} : vector<8x32xf32>, vector<32x128xf32>, vector<8x128xf32> -> vector<8x128xf32>
    %43 = arith.addf %41, %42 : vector<8x128xf32>
    %44 = arith.negf %43 : vector<8x128xf32>
    %45 = math.exp %44 : vector<8x128xf32>
    %cst_21 = arith.constant 1.000000e+00 : f32
    %46 = vector.broadcast %cst_21 : f32 to vector<8x128xf32>
    %47 = arith.addf %46, %45 : vector<8x128xf32>
    %48 = arith.divf %46, %47 : vector<8x128xf32>
    %49 = math.tanh %43 : vector<8x128xf32>
    %50 = vector.extract_strided_slice %48 {offsets = [0, 0], sizes = [8, 32], strides = [1, 1]} : vector<8x128xf32> to vector<8x32xf32>
    %51 = vector.extract_strided_slice %48 {offsets = [0, 32], sizes = [8, 32], strides = [1, 1]} : vector<8x128xf32> to vector<8x32xf32>
    %52 = vector.extract_strided_slice %49 {offsets = [0, 64], sizes = [8, 32], strides = [1, 1]} : vector<8x128xf32> to vector<8x32xf32>
    %53 = vector.extract_strided_slice %48 {offsets = [0, 96], sizes = [8, 32], strides = [1, 1]} : vector<8x128xf32> to vector<8x32xf32>
    %54 = arith.mulf %51, %30 : vector<8x32xf32>
    %55 = arith.mulf %50, %52 : vector<8x32xf32>
    %56 = arith.addf %54, %55 : vector<8x32xf32>
    %57 = math.tanh %56 : vector<8x32xf32>
    %58 = arith.mulf %53, %57 : vector<8x32xf32>
    %59 = arith.index_cast %39 : i32 to index
    %c0_22 = arith.constant 0 : index
    %60 = vector.load %arg23[%59, %c0_22] : memref<48x32xf32, #tpu.memory_space<vmem>>, vector<8x32xf32>
    tpu.vector_store %arg23[%59, %c0_22], %58 {strides = array<i32>} : memref<48x32xf32, #tpu.memory_space<vmem>>, vector<8x32xf32>,
    %c2_i32 = arith.constant 2 : i32
    %c8_i32_23 = arith.constant 8 : i32
    %61 = arith.muli %c2_i32, %c8_i32_23 : i32
    %62 = tpu.assume_multiple %61, 8 : i32
    %c8_i32_24 = arith.constant 8 : i32
    %63 = arith.muli %c2_i32, %c8_i32_24 : i32
    %c0_i32_25 = arith.constant 0 : i32
    %64 = arith.addi %c0_i32_25, %63 : i32
    %65 = tpu.assume_multiple %64, 8 : i32
    %66 = arith.index_cast %62 : i32 to index
    %c0_26 = arith.constant 0 : index
    %67 = vector.load %arg25[%66, %c0_26] : memref<48x128xf32, #tpu.memory_space<vmem>>, vector<8x128xf32>
    %cst_27 = arith.constant dense<0.000000e+00> : vector<8x128xf32>
    %68 = tpu.matmul %58, %2, %cst_27 {dimension_numbers = #tpu.dot_dimension_numbers<[1], [0], [0], [1], [0, 0, 1, 1], [], []>} : vector<8x32xf32>, vector<32x128xf32>, vector<8x128xf32> -> vector<8x128xf32>
    %69 = arith.addf %67, %68 : vector<8x128xf32>
    %70 = arith.negf %69 : vector<8x128xf32>
    %71 = math.exp %70 : vector<8x128xf32>
    %cst_28 = arith.constant 1.000000e+00 : f32
    %72 = vector.broadcast %cst_28 : f32 to vector<8x128xf32>
    %73 = arith.addf %72, %71 : vector<8x128xf32>
    %74 = arith.divf %72, %73 : vector<8x128xf32>
    %75 = math.tanh %69 : vector<8x128xf32>
    %76 = vector.extract_strided_slice %74 {offsets = [0, 0], sizes = [8, 32], strides = [1, 1]} : vector<8x128xf32> to vector<8x32xf32>
    %77 = vector.extract_strided_slice %74 {offsets = [0, 32], sizes = [8, 32], strides = [1, 1]} : vector<8x128xf32> to vector<8x32xf32>
    %78 = vector.extract_strided_slice %75 {offsets = [0, 64], sizes = [8, 32], strides = [1, 1]} : vector<8x128xf32> to vector<8x32xf32>
    %79 = vector.extract_strided_slice %74 {offsets = [0, 96], sizes = [8, 32], strides = [1, 1]} : vector<8x128xf32> to vector<8x32xf32>
    %80 = arith.mulf %77, %56 : vector<8x32xf32>
    %81 = arith.mulf %76, %78 : vector<8x32xf32>
    %82 = arith.addf %80, %81 : vector<8x32xf32>
    %83 = math.tanh %82 : vector<8x32xf32>
    %84 = arith.mulf %79, %83 : vector<8x32xf32>
    %85 = arith.index_cast %65 : i32 to index
    %c0_29 = arith.constant 0 : index
    %86 = vector.load %arg23[%85, %c0_29] : memref<48x32xf32, #tpu.memory_space<vmem>>, vector<8x32xf32>
    tpu.vector_store %arg23[%85, %c0_29], %84 {strides = array<i32>} : memref<48x32xf32, #tpu.memory_space<vmem>>, vector<8x32xf32>,
    %c3_i32 = arith.constant 3 : i32
    %c8_i32_30 = arith.constant 8 : i32
    %87 = arith.muli %c3_i32, %c8_i32_30 : i32
    %88 = tpu.assume_multiple %87, 8 : i32
    %c8_i32_31 = arith.constant 8 : i32
    %89 = arith.muli %c3_i32, %c8_i32_31 : i32
    %c0_i32_32 = arith.constant 0 : i32
    %90 = arith.addi %c0_i32_32, %89 : i32
    %91 = tpu.assume_multiple %90, 8 : i32
    %92 = arith.index_cast %88 : i32 to index
    %c0_33 = arith.constant 0 : index
    %93 = vector.load %arg25[%92, %c0_33] : memref<48x128xf32, #tpu.memory_space<vmem>>, vector<8x128xf32>
    %cst_34 = arith.constant dense<0.000000e+00> : vector<8x128xf32>
    %94 = tpu.matmul %84, %2, %cst_34 {dimension_numbers = #tpu.dot_dimension_numbers<[1], [0], [0], [1], [0, 0, 1, 1], [], []>} : vector<8x32xf32>, vector<32x128xf32>, vector<8x128xf32> -> vector<8x128xf32>
    %95 = arith.addf %93, %94 : vector<8x128xf32>
    %96 = arith.negf %95 : vector<8x128xf32>
    %97 = math.exp %96 : vector<8x128xf32>
    %cst_35 = arith.constant 1.000000e+00 : f32
    %98 = vector.broadcast %cst_35 : f32 to vector<8x128xf32>
    %99 = arith.addf %98, %97 : vector<8x128xf32>
    %100 = arith.divf %98, %99 : vector<8x128xf32>
    %101 = math.tanh %95 : vector<8x128xf32>
    %102 = vector.extract_strided_slice %100 {offsets = [0, 0], sizes = [8, 32], strides = [1, 1]} : vector<8x128xf32> to vector<8x32xf32>
    %103 = vector.extract_strided_slice %100 {offsets = [0, 32], sizes = [8, 32], strides = [1, 1]} : vector<8x128xf32> to vector<8x32xf32>
    %104 = vector.extract_strided_slice %101 {offsets = [0, 64], sizes = [8, 32], strides = [1, 1]} : vector<8x128xf32> to vector<8x32xf32>
    %105 = vector.extract_strided_slice %100 {offsets = [0, 96], sizes = [8, 32], strides = [1, 1]} : vector<8x128xf32> to vector<8x32xf32>
    %106 = arith.mulf %103, %82 : vector<8x32xf32>
    %107 = arith.mulf %102, %104 : vector<8x32xf32>
    %108 = arith.addf %106, %107 : vector<8x32xf32>
    %109 = math.tanh %108 : vector<8x32xf32>
    %110 = arith.mulf %105, %109 : vector<8x32xf32>
    %111 = arith.index_cast %91 : i32 to index
    %c0_36 = arith.constant 0 : index
    %112 = vector.load %arg23[%111, %c0_36] : memref<48x32xf32, #tpu.memory_space<vmem>>, vector<8x32xf32>
    tpu.vector_store %arg23[%111, %c0_36], %110 {strides = array<i32>} : memref<48x32xf32, #tpu.memory_space<vmem>>, vector<8x32xf32>,
    %c4_i32 = arith.constant 4 : i32
    %c8_i32_37 = arith.constant 8 : i32
    %113 = arith.muli %c4_i32, %c8_i32_37 : i32
    %114 = tpu.assume_multiple %113, 8 : i32
    %c8_i32_38 = arith.constant 8 : i32
    %115 = arith.muli %c4_i32, %c8_i32_38 : i32
    %c0_i32_39 = arith.constant 0 : i32
    %116 = arith.addi %c0_i32_39, %115 : i32
    %117 = tpu.assume_multiple %116, 8 : i32
    %118 = arith.index_cast %114 : i32 to index
    %c0_40 = arith.constant 0 : index
    %119 = vector.load %arg25[%118, %c0_40] : memref<48x128xf32, #tpu.memory_space<vmem>>, vector<8x128xf32>
    %cst_41 = arith.constant dense<0.000000e+00> : vector<8x128xf32>
    %120 = tpu.matmul %110, %2, %cst_41 {dimension_numbers = #tpu.dot_dimension_numbers<[1], [0], [0], [1], [0, 0, 1, 1], [], []>} : vector<8x32xf32>, vector<32x128xf32>, vector<8x128xf32> -> vector<8x128xf32>
    %121 = arith.addf %119, %120 : vector<8x128xf32>
    %122 = arith.negf %121 : vector<8x128xf32>
    %123 = math.exp %122 : vector<8x128xf32>
    %cst_42 = arith.constant 1.000000e+00 : f32
    %124 = vector.broadcast %cst_42 : f32 to vector<8x128xf32>
    %125 = arith.addf %124, %123 : vector<8x128xf32>
    %126 = arith.divf %124, %125 : vector<8x128xf32>
    %127 = math.tanh %121 : vector<8x128xf32>
    %128 = vector.extract_strided_slice %126 {offsets = [0, 0], sizes = [8, 32], strides = [1, 1]} : vector<8x128xf32> to vector<8x32xf32>
    %129 = vector.extract_strided_slice %126 {offsets = [0, 32], sizes = [8, 32], strides = [1, 1]} : vector<8x128xf32> to vector<8x32xf32>
    %130 = vector.extract_strided_slice %127 {offsets = [0, 64], sizes = [8, 32], strides = [1, 1]} : vector<8x128xf32> to vector<8x32xf32>
    %131 = vector.extract_strided_slice %126 {offsets = [0, 96], sizes = [8, 32], strides = [1, 1]} : vector<8x128xf32> to vector<8x32xf32>
    %132 = arith.mulf %129, %108 : vector<8x32xf32>
    %133 = arith.mulf %128, %130 : vector<8x32xf32>
    %134 = arith.addf %132, %133 : vector<8x32xf32>
    %135 = math.tanh %134 : vector<8x32xf32>
    %136 = arith.mulf %131, %135 : vector<8x32xf32>
    %137 = arith.index_cast %117 : i32 to index
    %c0_43 = arith.constant 0 : index
    %138 = vector.load %arg23[%137, %c0_43] : memref<48x32xf32, #tpu.memory_space<vmem>>, vector<8x32xf32>
    tpu.vector_store %arg23[%137, %c0_43], %136 {strides = array<i32>} : memref<48x32xf32, #tpu.memory_space<vmem>>, vector<8x32xf32>,
    %c5_i32 = arith.constant 5 : i32
    %c8_i32_44 = arith.constant 8 : i32
    %139 = arith.muli %c5_i32, %c8_i32_44 : i32
    %140 = tpu.assume_multiple %139, 8 : i32
    %c8_i32_45 = arith.constant 8 : i32
    %141 = arith.muli %c5_i32, %c8_i32_45 : i32
    %c0_i32_46 = arith.constant 0 : i32
    %142 = arith.addi %c0_i32_46, %141 : i32
    %143 = tpu.assume_multiple %142, 8 : i32
    %144 = arith.index_cast %140 : i32 to index
    %c0_47 = arith.constant 0 : index
    %145 = vector.load %arg25[%144, %c0_47] : memref<48x128xf32, #tpu.memory_space<vmem>>, vector<8x128xf32>
    %cst_48 = arith.constant dense<0.000000e+00> : vector<8x128xf32>
    %146 = tpu.matmul %136, %2, %cst_48 {dimension_numbers = #tpu.dot_dimension_numbers<[1], [0], [0], [1], [0, 0, 1, 1], [], []>} : vector<8x32xf32>, vector<32x128xf32>, vector<8x128xf32> -> vector<8x128xf32>
    %147 = arith.addf %145, %146 : vector<8x128xf32>
    %148 = arith.negf %147 : vector<8x128xf32>
    %149 = math.exp %148 : vector<8x128xf32>
    %cst_49 = arith.constant 1.000000e+00 : f32
    %150 = vector.broadcast %cst_49 : f32 to vector<8x128xf32>
    %151 = arith.addf %150, %149 : vector<8x128xf32>
    %152 = arith.divf %150, %151 : vector<8x128xf32>
    %153 = math.tanh %147 : vector<8x128xf32>
    %154 = vector.extract_strided_slice %152 {offsets = [0, 0], sizes = [8, 32], strides = [1, 1]} : vector<8x128xf32> to vector<8x32xf32>
    %155 = vector.extract_strided_slice %152 {offsets = [0, 32], sizes = [8, 32], strides = [1, 1]} : vector<8x128xf32> to vector<8x32xf32>
    %156 = vector.extract_strided_slice %153 {offsets = [0, 64], sizes = [8, 32], strides = [1, 1]} : vector<8x128xf32> to vector<8x32xf32>
    %157 = vector.extract_strided_slice %152 {offsets = [0, 96], sizes = [8, 32], strides = [1, 1]} : vector<8x128xf32> to vector<8x32xf32>
    %158 = arith.mulf %155, %134 : vector<8x32xf32>
    %159 = arith.mulf %154, %156 : vector<8x32xf32>
    %160 = arith.addf %158, %159 : vector<8x32xf32>
    %161 = math.tanh %160 : vector<8x32xf32>
    %162 = arith.mulf %157, %161 : vector<8x32xf32>
    %163 = arith.index_cast %143 : i32 to index
    %c0_50 = arith.constant 0 : index
    %164 = vector.load %arg23[%163, %c0_50] : memref<48x32xf32, #tpu.memory_space<vmem>>, vector<8x32xf32>
    tpu.vector_store %arg23[%163, %c0_50], %162 {strides = array<i32>} : memref<48x32xf32, #tpu.memory_space<vmem>>, vector<8x32xf32>,
    %c6_i32 = arith.constant 6 : i32
    %c0_51 = arith.constant 0 : index
    %c0_52 = arith.constant 0 : index
    %165 = vector.load %arg5[%c0_51, %c0_52] : memref<32x128xf32, #tpu.memory_space<vmem>>, vector<32x128xf32>
    %c0_53 = arith.constant 0 : index
    %c0_54 = arith.constant 0 : index
    %166 = vector.load %arg6[%c0_53, %c0_54] : memref<32x128xf32, #tpu.memory_space<vmem>>, vector<32x128xf32>
    %c0_55 = arith.constant 0 : index
    %c0_56 = arith.constant 0 : index
    %167 = vector.load %arg7[%c0_55, %c0_56] : memref<1x128xf32, #tpu.memory_space<vmem>>, vector<1x128xf32>
    %c0_57 = arith.constant 0 : index
    %c0_58 = arith.constant 0 : index
    %168 = vector.load %arg23[%c0_57, %c0_58] : memref<48x32xf32, #tpu.memory_space<vmem>>, vector<48x32xf32>
    %cst_59 = arith.constant dense<0.000000e+00> : vector<48x128xf32>
    %169 = tpu.matmul %168, %165, %cst_59 {dimension_numbers = #tpu.dot_dimension_numbers<[1], [0], [0], [1], [0, 0, 1, 1], [], []>} : vector<48x32xf32>, vector<32x128xf32>, vector<48x128xf32> -> vector<48x128xf32>
    %170 = vector.broadcast %167 : vector<1x128xf32> to vector<48x128xf32>
    %171 = arith.addf %169, %170 : vector<48x128xf32>
    %c0_60 = arith.constant 0 : index
    %c0_61 = arith.constant 0 : index
    %172 = vector.load %arg25[%c0_60, %c0_61] : memref<48x128xf32, #tpu.memory_space<vmem>>, vector<48x128xf32>
    tpu.vector_store %arg25[%c0_60, %c0_61], %171 {strides = array<i32>} : memref<48x128xf32, #tpu.memory_space<vmem>>, vector<48x128xf32>,
    %c0_i32_62 = arith.constant 0 : i32
    %c8_i32_63 = arith.constant 8 : i32
    %173 = arith.muli %c0_i32_62, %c8_i32_63 : i32
    %174 = tpu.assume_multiple %173, 8 : i32
    %c8_i32_64 = arith.constant 8 : i32
    %175 = arith.muli %c0_i32_62, %c8_i32_64 : i32
    %c0_i32_65 = arith.constant 0 : i32
    %176 = arith.addi %c0_i32_65, %175 : i32
    %177 = tpu.assume_multiple %176, 8 : i32
    %178 = arith.index_cast %174 : i32 to index
    %c0_66 = arith.constant 0 : index
    %179 = vector.load %arg25[%178, %c0_66] : memref<48x128xf32, #tpu.memory_space<vmem>>, vector<8x128xf32>
    %cst_67 = arith.constant dense<0.000000e+00> : vector<8x128xf32>
    %180 = tpu.matmul %0, %166, %cst_67 {dimension_numbers = #tpu.dot_dimension_numbers<[1], [0], [0], [1], [0, 0, 1, 1], [], []>} : vector<8x32xf32>, vector<32x128xf32>, vector<8x128xf32> -> vector<8x128xf32>
    %181 = arith.addf %179, %180 : vector<8x128xf32>
    %182 = arith.negf %181 : vector<8x128xf32>
    %183 = math.exp %182 : vector<8x128xf32>
    %cst_68 = arith.constant 1.000000e+00 : f32
    %184 = vector.broadcast %cst_68 : f32 to vector<8x128xf32>
    %185 = arith.addf %184, %183 : vector<8x128xf32>
    %186 = arith.divf %184, %185 : vector<8x128xf32>
    %187 = math.tanh %181 : vector<8x128xf32>
    %188 = vector.extract_strided_slice %186 {offsets = [0, 0], sizes = [8, 32], strides = [1, 1]} : vector<8x128xf32> to vector<8x32xf32>
    %189 = vector.extract_strided_slice %186 {offsets = [0, 32], sizes = [8, 32], strides = [1, 1]} : vector<8x128xf32> to vector<8x32xf32>
    %190 = vector.extract_strided_slice %187 {offsets = [0, 64], sizes = [8, 32], strides = [1, 1]} : vector<8x128xf32> to vector<8x32xf32>
    %191 = vector.extract_strided_slice %186 {offsets = [0, 96], sizes = [8, 32], strides = [1, 1]} : vector<8x128xf32> to vector<8x32xf32>
    %192 = arith.mulf %189, %0 : vector<8x32xf32>
    %193 = arith.mulf %188, %190 : vector<8x32xf32>
    %194 = arith.addf %192, %193 : vector<8x32xf32>
    %195 = math.tanh %194 : vector<8x32xf32>
    %196 = arith.mulf %191, %195 : vector<8x32xf32>
    %197 = arith.index_cast %177 : i32 to index
    %c0_69 = arith.constant 0 : index
    %198 = vector.load %arg24[%197, %c0_69] : memref<48x32xf32, #tpu.memory_space<vmem>>, vector<8x32xf32>
    tpu.vector_store %arg24[%197, %c0_69], %196 {strides = array<i32>} : memref<48x32xf32, #tpu.memory_space<vmem>>, vector<8x32xf32>,
    %c1_i32_70 = arith.constant 1 : i32
    %c8_i32_71 = arith.constant 8 : i32
    %199 = arith.muli %c1_i32_70, %c8_i32_71 : i32
    %200 = tpu.assume_multiple %199, 8 : i32
    %c8_i32_72 = arith.constant 8 : i32
    %201 = arith.muli %c1_i32_70, %c8_i32_72 : i32
    %c0_i32_73 = arith.constant 0 : i32
    %202 = arith.addi %c0_i32_73, %201 : i32
    %203 = tpu.assume_multiple %202, 8 : i32
    %204 = arith.index_cast %200 : i32 to index
    %c0_74 = arith.constant 0 : index
    %205 = vector.load %arg25[%204, %c0_74] : memref<48x128xf32, #tpu.memory_space<vmem>>, vector<8x128xf32>
    %cst_75 = arith.constant dense<0.000000e+00> : vector<8x128xf32>
    %206 = tpu.matmul %196, %166, %cst_75 {dimension_numbers = #tpu.dot_dimension_numbers<[1], [0], [0], [1], [0, 0, 1, 1], [], []>} : vector<8x32xf32>, vector<32x128xf32>, vector<8x128xf32> -> vector<8x128xf32>
    %207 = arith.addf %205, %206 : vector<8x128xf32>
    %208 = arith.negf %207 : vector<8x128xf32>
    %209 = math.exp %208 : vector<8x128xf32>
    %cst_76 = arith.constant 1.000000e+00 : f32
    %210 = vector.broadcast %cst_76 : f32 to vector<8x128xf32>
    %211 = arith.addf %210, %209 : vector<8x128xf32>
    %212 = arith.divf %210, %211 : vector<8x128xf32>
    %213 = math.tanh %207 : vector<8x128xf32>
    %214 = vector.extract_strided_slice %212 {offsets = [0, 0], sizes = [8, 32], strides = [1, 1]} : vector<8x128xf32> to vector<8x32xf32>
    %215 = vector.extract_strided_slice %212 {offsets = [0, 32], sizes = [8, 32], strides = [1, 1]} : vector<8x128xf32> to vector<8x32xf32>
    %216 = vector.extract_strided_slice %213 {offsets = [0, 64], sizes = [8, 32], strides = [1, 1]} : vector<8x128xf32> to vector<8x32xf32>
    %217 = vector.extract_strided_slice %212 {offsets = [0, 96], sizes = [8, 32], strides = [1, 1]} : vector<8x128xf32> to vector<8x32xf32>
    %218 = arith.mulf %215, %194 : vector<8x32xf32>
    %219 = arith.mulf %214, %216 : vector<8x32xf32>
    %220 = arith.addf %218, %219 : vector<8x32xf32>
    %221 = math.tanh %220 : vector<8x32xf32>
    %222 = arith.mulf %217, %221 : vector<8x32xf32>
    %223 = arith.index_cast %203 : i32 to index
    %c0_77 = arith.constant 0 : index
    %224 = vector.load %arg24[%223, %c0_77] : memref<48x32xf32, #tpu.memory_space<vmem>>, vector<8x32xf32>
    tpu.vector_store %arg24[%223, %c0_77], %222 {strides = array<i32>} : memref<48x32xf32, #tpu.memory_space<vmem>>, vector<8x32xf32>,
    %c2_i32_78 = arith.constant 2 : i32
    %c8_i32_79 = arith.constant 8 : i32
    %225 = arith.muli %c2_i32_78, %c8_i32_79 : i32
    %226 = tpu.assume_multiple %225, 8 : i32
    %c8_i32_80 = arith.constant 8 : i32
    %227 = arith.muli %c2_i32_78, %c8_i32_80 : i32
    %c0_i32_81 = arith.constant 0 : i32
    %228 = arith.addi %c0_i32_81, %227 : i32
    %229 = tpu.assume_multiple %228, 8 : i32
    %230 = arith.index_cast %226 : i32 to index
    %c0_82 = arith.constant 0 : index
    %231 = vector.load %arg25[%230, %c0_82] : memref<48x128xf32, #tpu.memory_space<vmem>>, vector<8x128xf32>
    %cst_83 = arith.constant dense<0.000000e+00> : vector<8x128xf32>
    %232 = tpu.matmul %222, %166, %cst_83 {dimension_numbers = #tpu.dot_dimension_numbers<[1], [0], [0], [1], [0, 0, 1, 1], [], []>} : vector<8x32xf32>, vector<32x128xf32>, vector<8x128xf32> -> vector<8x128xf32>
    %233 = arith.addf %231, %232 : vector<8x128xf32>
    %234 = arith.negf %233 : vector<8x128xf32>
    %235 = math.exp %234 : vector<8x128xf32>
    %cst_84 = arith.constant 1.000000e+00 : f32
    %236 = vector.broadcast %cst_84 : f32 to vector<8x128xf32>
    %237 = arith.addf %236, %235 : vector<8x128xf32>
    %238 = arith.divf %236, %237 : vector<8x128xf32>
    %239 = math.tanh %233 : vector<8x128xf32>
    %240 = vector.extract_strided_slice %238 {offsets = [0, 0], sizes = [8, 32], strides = [1, 1]} : vector<8x128xf32> to vector<8x32xf32>
    %241 = vector.extract_strided_slice %238 {offsets = [0, 32], sizes = [8, 32], strides = [1, 1]} : vector<8x128xf32> to vector<8x32xf32>
    %242 = vector.extract_strided_slice %239 {offsets = [0, 64], sizes = [8, 32], strides = [1, 1]} : vector<8x128xf32> to vector<8x32xf32>
    %243 = vector.extract_strided_slice %238 {offsets = [0, 96], sizes = [8, 32], strides = [1, 1]} : vector<8x128xf32> to vector<8x32xf32>
    %244 = arith.mulf %241, %220 : vector<8x32xf32>
    %245 = arith.mulf %240, %242 : vector<8x32xf32>
    %246 = arith.addf %244, %245 : vector<8x32xf32>
    %247 = math.tanh %246 : vector<8x32xf32>
    %248 = arith.mulf %243, %247 : vector<8x32xf32>
    %249 = arith.index_cast %229 : i32 to index
    %c0_85 = arith.constant 0 : index
    %250 = vector.load %arg24[%249, %c0_85] : memref<48x32xf32, #tpu.memory_space<vmem>>, vector<8x32xf32>
    tpu.vector_store %arg24[%249, %c0_85], %248 {strides = array<i32>} : memref<48x32xf32, #tpu.memory_space<vmem>>, vector<8x32xf32>,
    %c3_i32_86 = arith.constant 3 : i32
    %c8_i32_87 = arith.constant 8 : i32
    %251 = arith.muli %c3_i32_86, %c8_i32_87 : i32
    %252 = tpu.assume_multiple %251, 8 : i32
    %c8_i32_88 = arith.constant 8 : i32
    %253 = arith.muli %c3_i32_86, %c8_i32_88 : i32
    %c0_i32_89 = arith.constant 0 : i32
    %254 = arith.addi %c0_i32_89, %253 : i32
    %255 = tpu.assume_multiple %254, 8 : i32
    %256 = arith.index_cast %252 : i32 to index
    %c0_90 = arith.constant 0 : index
    %257 = vector.load %arg25[%256, %c0_90] : memref<48x128xf32, #tpu.memory_space<vmem>>, vector<8x128xf32>
    %cst_91 = arith.constant dense<0.000000e+00> : vector<8x128xf32>
    %258 = tpu.matmul %248, %166, %cst_91 {dimension_numbers = #tpu.dot_dimension_numbers<[1], [0], [0], [1], [0, 0, 1, 1], [], []>} : vector<8x32xf32>, vector<32x128xf32>, vector<8x128xf32> -> vector<8x128xf32>
    %259 = arith.addf %257, %258 : vector<8x128xf32>
    %260 = arith.negf %259 : vector<8x128xf32>
    %261 = math.exp %260 : vector<8x128xf32>
    %cst_92 = arith.constant 1.000000e+00 : f32
    %262 = vector.broadcast %cst_92 : f32 to vector<8x128xf32>
    %263 = arith.addf %262, %261 : vector<8x128xf32>
    %264 = arith.divf %262, %263 : vector<8x128xf32>
    %265 = math.tanh %259 : vector<8x128xf32>
    %266 = vector.extract_strided_slice %264 {offsets = [0, 0], sizes = [8, 32], strides = [1, 1]} : vector<8x128xf32> to vector<8x32xf32>
    %267 = vector.extract_strided_slice %264 {offsets = [0, 32], sizes = [8, 32], strides = [1, 1]} : vector<8x128xf32> to vector<8x32xf32>
    %268 = vector.extract_strided_slice %265 {offsets = [0, 64], sizes = [8, 32], strides = [1, 1]} : vector<8x128xf32> to vector<8x32xf32>
    %269 = vector.extract_strided_slice %264 {offsets = [0, 96], sizes = [8, 32], strides = [1, 1]} : vector<8x128xf32> to vector<8x32xf32>
    %270 = arith.mulf %267, %246 : vector<8x32xf32>
    %271 = arith.mulf %266, %268 : vector<8x32xf32>
    %272 = arith.addf %270, %271 : vector<8x32xf32>
    %273 = math.tanh %272 : vector<8x32xf32>
    %274 = arith.mulf %269, %273 : vector<8x32xf32>
    %275 = arith.index_cast %255 : i32 to index
    %c0_93 = arith.constant 0 : index
    %276 = vector.load %arg24[%275, %c0_93] : memref<48x32xf32, #tpu.memory_space<vmem>>, vector<8x32xf32>
    tpu.vector_store %arg24[%275, %c0_93], %274 {strides = array<i32>} : memref<48x32xf32, #tpu.memory_space<vmem>>, vector<8x32xf32>,
    %c4_i32_94 = arith.constant 4 : i32
    %c8_i32_95 = arith.constant 8 : i32
    %277 = arith.muli %c4_i32_94, %c8_i32_95 : i32
    %278 = tpu.assume_multiple %277, 8 : i32
    %c8_i32_96 = arith.constant 8 : i32
    %279 = arith.muli %c4_i32_94, %c8_i32_96 : i32
    %c0_i32_97 = arith.constant 0 : i32
    %280 = arith.addi %c0_i32_97, %279 : i32
    %281 = tpu.assume_multiple %280, 8 : i32
    %282 = arith.index_cast %278 : i32 to index
    %c0_98 = arith.constant 0 : index
    %283 = vector.load %arg25[%282, %c0_98] : memref<48x128xf32, #tpu.memory_space<vmem>>, vector<8x128xf32>
    %cst_99 = arith.constant dense<0.000000e+00> : vector<8x128xf32>
    %284 = tpu.matmul %274, %166, %cst_99 {dimension_numbers = #tpu.dot_dimension_numbers<[1], [0], [0], [1], [0, 0, 1, 1], [], []>} : vector<8x32xf32>, vector<32x128xf32>, vector<8x128xf32> -> vector<8x128xf32>
    %285 = arith.addf %283, %284 : vector<8x128xf32>
    %286 = arith.negf %285 : vector<8x128xf32>
    %287 = math.exp %286 : vector<8x128xf32>
    %cst_100 = arith.constant 1.000000e+00 : f32
    %288 = vector.broadcast %cst_100 : f32 to vector<8x128xf32>
    %289 = arith.addf %288, %287 : vector<8x128xf32>
    %290 = arith.divf %288, %289 : vector<8x128xf32>
    %291 = math.tanh %285 : vector<8x128xf32>
    %292 = vector.extract_strided_slice %290 {offsets = [0, 0], sizes = [8, 32], strides = [1, 1]} : vector<8x128xf32> to vector<8x32xf32>
    %293 = vector.extract_strided_slice %290 {offsets = [0, 32], sizes = [8, 32], strides = [1, 1]} : vector<8x128xf32> to vector<8x32xf32>
    %294 = vector.extract_strided_slice %291 {offsets = [0, 64], sizes = [8, 32], strides = [1, 1]} : vector<8x128xf32> to vector<8x32xf32>
    %295 = vector.extract_strided_slice %290 {offsets = [0, 96], sizes = [8, 32], strides = [1, 1]} : vector<8x128xf32> to vector<8x32xf32>
    %296 = arith.mulf %293, %272 : vector<8x32xf32>
    %297 = arith.mulf %292, %294 : vector<8x32xf32>
    %298 = arith.addf %296, %297 : vector<8x32xf32>
    %299 = math.tanh %298 : vector<8x32xf32>
    %300 = arith.mulf %295, %299 : vector<8x32xf32>
    %301 = arith.index_cast %281 : i32 to index
    %c0_101 = arith.constant 0 : index
    %302 = vector.load %arg24[%301, %c0_101] : memref<48x32xf32, #tpu.memory_space<vmem>>, vector<8x32xf32>
    tpu.vector_store %arg24[%301, %c0_101], %300 {strides = array<i32>} : memref<48x32xf32, #tpu.memory_space<vmem>>, vector<8x32xf32>,
    %c5_i32_102 = arith.constant 5 : i32
    %c8_i32_103 = arith.constant 8 : i32
    %303 = arith.muli %c5_i32_102, %c8_i32_103 : i32
    %304 = tpu.assume_multiple %303, 8 : i32
    %c8_i32_104 = arith.constant 8 : i32
    %305 = arith.muli %c5_i32_102, %c8_i32_104 : i32
    %c0_i32_105 = arith.constant 0 : i32
    %306 = arith.addi %c0_i32_105, %305 : i32
    %307 = tpu.assume_multiple %306, 8 : i32
    %308 = arith.index_cast %304 : i32 to index
    %c0_106 = arith.constant 0 : index
    %309 = vector.load %arg25[%308, %c0_106] : memref<48x128xf32, #tpu.memory_space<vmem>>, vector<8x128xf32>
    %cst_107 = arith.constant dense<0.000000e+00> : vector<8x128xf32>
    %310 = tpu.matmul %300, %166, %cst_107 {dimension_numbers = #tpu.dot_dimension_numbers<[1], [0], [0], [1], [0, 0, 1, 1], [], []>} : vector<8x32xf32>, vector<32x128xf32>, vector<8x128xf32> -> vector<8x128xf32>
    %311 = arith.addf %309, %310 : vector<8x128xf32>
    %312 = arith.negf %311 : vector<8x128xf32>
    %313 = math.exp %312 : vector<8x128xf32>
    %cst_108 = arith.constant 1.000000e+00 : f32
    %314 = vector.broadcast %cst_108 : f32 to vector<8x128xf32>
    %315 = arith.addf %314, %313 : vector<8x128xf32>
    %316 = arith.divf %314, %315 : vector<8x128xf32>
    %317 = math.tanh %311 : vector<8x128xf32>
    %318 = vector.extract_strided_slice %316 {offsets = [0, 0], sizes = [8, 32], strides = [1, 1]} : vector<8x128xf32> to vector<8x32xf32>
    %319 = vector.extract_strided_slice %316 {offsets = [0, 32], sizes = [8, 32], strides = [1, 1]} : vector<8x128xf32> to vector<8x32xf32>
    %320 = vector.extract_strided_slice %317 {offsets = [0, 64], sizes = [8, 32], strides = [1, 1]} : vector<8x128xf32> to vector<8x32xf32>
    %321 = vector.extract_strided_slice %316 {offsets = [0, 96], sizes = [8, 32], strides = [1, 1]} : vector<8x128xf32> to vector<8x32xf32>
    %322 = arith.mulf %319, %298 : vector<8x32xf32>
    %323 = arith.mulf %318, %320 : vector<8x32xf32>
    %324 = arith.addf %322, %323 : vector<8x32xf32>
    %325 = math.tanh %324 : vector<8x32xf32>
    %326 = arith.mulf %321, %325 : vector<8x32xf32>
    %327 = arith.index_cast %307 : i32 to index
    %c0_109 = arith.constant 0 : index
    %328 = vector.load %arg24[%327, %c0_109] : memref<48x32xf32, #tpu.memory_space<vmem>>, vector<8x32xf32>
    tpu.vector_store %arg24[%327, %c0_109], %326 {strides = array<i32>} : memref<48x32xf32, #tpu.memory_space<vmem>>, vector<8x32xf32>,
    %c6_i32_110 = arith.constant 6 : i32
    %c0_111 = arith.constant 0 : index
    %c0_112 = arith.constant 0 : index
    %329 = vector.load %arg8[%c0_111, %c0_112] : memref<32x128xf32, #tpu.memory_space<vmem>>, vector<32x128xf32>
    %c0_113 = arith.constant 0 : index
    %c0_114 = arith.constant 0 : index
    %330 = vector.load %arg9[%c0_113, %c0_114] : memref<32x128xf32, #tpu.memory_space<vmem>>, vector<32x128xf32>
    %c0_115 = arith.constant 0 : index
    %c0_116 = arith.constant 0 : index
    %331 = vector.load %arg10[%c0_115, %c0_116] : memref<1x128xf32, #tpu.memory_space<vmem>>, vector<1x128xf32>
    %c0_117 = arith.constant 0 : index
    %c0_118 = arith.constant 0 : index
    %332 = vector.load %arg24[%c0_117, %c0_118] : memref<48x32xf32, #tpu.memory_space<vmem>>, vector<48x32xf32>
    %cst_119 = arith.constant dense<0.000000e+00> : vector<48x128xf32>
    %333 = tpu.matmul %332, %329, %cst_119 {dimension_numbers = #tpu.dot_dimension_numbers<[1], [0], [0], [1], [0, 0, 1, 1], [], []>} : vector<48x32xf32>, vector<32x128xf32>, vector<48x128xf32> -> vector<48x128xf32>
    %334 = vector.broadcast %331 : vector<1x128xf32> to vector<48x128xf32>
    %335 = arith.addf %333, %334 : vector<48x128xf32>
    %c0_120 = arith.constant 0 : index
    %c0_121 = arith.constant 0 : index
    %336 = vector.load %arg25[%c0_120, %c0_121] : memref<48x128xf32, #tpu.memory_space<vmem>>, vector<48x128xf32>
    tpu.vector_store %arg25[%c0_120, %c0_121], %335 {strides = array<i32>} : memref<48x128xf32, #tpu.memory_space<vmem>>, vector<48x128xf32>,
    %c0_i32_122 = arith.constant 0 : i32
    %c8_i32_123 = arith.constant 8 : i32
    %337 = arith.muli %c0_i32_122, %c8_i32_123 : i32
    %338 = tpu.assume_multiple %337, 8 : i32
    %c8_i32_124 = arith.constant 8 : i32
    %339 = arith.muli %c0_i32_122, %c8_i32_124 : i32
    %c0_i32_125 = arith.constant 0 : i32
    %340 = arith.addi %c0_i32_125, %339 : i32
    %341 = tpu.assume_multiple %340, 8 : i32
    %342 = arith.index_cast %338 : i32 to index
    %c0_126 = arith.constant 0 : index
    %343 = vector.load %arg25[%342, %c0_126] : memref<48x128xf32, #tpu.memory_space<vmem>>, vector<8x128xf32>
    %cst_127 = arith.constant dense<0.000000e+00> : vector<8x128xf32>
    %344 = tpu.matmul %0, %330, %cst_127 {dimension_numbers = #tpu.dot_dimension_numbers<[1], [0], [0], [1], [0, 0, 1, 1], [], []>} : vector<8x32xf32>, vector<32x128xf32>, vector<8x128xf32> -> vector<8x128xf32>
    %345 = arith.addf %343, %344 : vector<8x128xf32>
    %346 = arith.negf %345 : vector<8x128xf32>
    %347 = math.exp %346 : vector<8x128xf32>
    %cst_128 = arith.constant 1.000000e+00 : f32
    %348 = vector.broadcast %cst_128 : f32 to vector<8x128xf32>
    %349 = arith.addf %348, %347 : vector<8x128xf32>
    %350 = arith.divf %348, %349 : vector<8x128xf32>
    %351 = math.tanh %345 : vector<8x128xf32>
    %352 = vector.extract_strided_slice %350 {offsets = [0, 0], sizes = [8, 32], strides = [1, 1]} : vector<8x128xf32> to vector<8x32xf32>
    %353 = vector.extract_strided_slice %350 {offsets = [0, 32], sizes = [8, 32], strides = [1, 1]} : vector<8x128xf32> to vector<8x32xf32>
    %354 = vector.extract_strided_slice %351 {offsets = [0, 64], sizes = [8, 32], strides = [1, 1]} : vector<8x128xf32> to vector<8x32xf32>
    %355 = vector.extract_strided_slice %350 {offsets = [0, 96], sizes = [8, 32], strides = [1, 1]} : vector<8x128xf32> to vector<8x32xf32>
    %356 = arith.mulf %353, %0 : vector<8x32xf32>
    %357 = arith.mulf %352, %354 : vector<8x32xf32>
    %358 = arith.addf %356, %357 : vector<8x32xf32>
    %359 = math.tanh %358 : vector<8x32xf32>
    %360 = arith.mulf %355, %359 : vector<8x32xf32>
    %361 = arith.index_cast %341 : i32 to index
    %c0_129 = arith.constant 0 : index
    %362 = vector.load %arg23[%361, %c0_129] : memref<48x32xf32, #tpu.memory_space<vmem>>, vector<8x32xf32>
    tpu.vector_store %arg23[%361, %c0_129], %360 {strides = array<i32>} : memref<48x32xf32, #tpu.memory_space<vmem>>, vector<8x32xf32>,
    %c1_i32_130 = arith.constant 1 : i32
    %c8_i32_131 = arith.constant 8 : i32
    %363 = arith.muli %c1_i32_130, %c8_i32_131 : i32
    %364 = tpu.assume_multiple %363, 8 : i32
    %c8_i32_132 = arith.constant 8 : i32
    %365 = arith.muli %c1_i32_130, %c8_i32_132 : i32
    %c0_i32_133 = arith.constant 0 : i32
    %366 = arith.addi %c0_i32_133, %365 : i32
    %367 = tpu.assume_multiple %366, 8 : i32
    %368 = arith.index_cast %364 : i32 to index
    %c0_134 = arith.constant 0 : index
    %369 = vector.load %arg25[%368, %c0_134] : memref<48x128xf32, #tpu.memory_space<vmem>>, vector<8x128xf32>
    %cst_135 = arith.constant dense<0.000000e+00> : vector<8x128xf32>
    %370 = tpu.matmul %360, %330, %cst_135 {dimension_numbers = #tpu.dot_dimension_numbers<[1], [0], [0], [1], [0, 0, 1, 1], [], []>} : vector<8x32xf32>, vector<32x128xf32>, vector<8x128xf32> -> vector<8x128xf32>
    %371 = arith.addf %369, %370 : vector<8x128xf32>
    %372 = arith.negf %371 : vector<8x128xf32>
    %373 = math.exp %372 : vector<8x128xf32>
    %cst_136 = arith.constant 1.000000e+00 : f32
    %374 = vector.broadcast %cst_136 : f32 to vector<8x128xf32>
    %375 = arith.addf %374, %373 : vector<8x128xf32>
    %376 = arith.divf %374, %375 : vector<8x128xf32>
    %377 = math.tanh %371 : vector<8x128xf32>
    %378 = vector.extract_strided_slice %376 {offsets = [0, 0], sizes = [8, 32], strides = [1, 1]} : vector<8x128xf32> to vector<8x32xf32>
    %379 = vector.extract_strided_slice %376 {offsets = [0, 32], sizes = [8, 32], strides = [1, 1]} : vector<8x128xf32> to vector<8x32xf32>
    %380 = vector.extract_strided_slice %377 {offsets = [0, 64], sizes = [8, 32], strides = [1, 1]} : vector<8x128xf32> to vector<8x32xf32>
    %381 = vector.extract_strided_slice %376 {offsets = [0, 96], sizes = [8, 32], strides = [1, 1]} : vector<8x128xf32> to vector<8x32xf32>
    %382 = arith.mulf %379, %358 : vector<8x32xf32>
    %383 = arith.mulf %378, %380 : vector<8x32xf32>
    %384 = arith.addf %382, %383 : vector<8x32xf32>
    %385 = math.tanh %384 : vector<8x32xf32>
    %386 = arith.mulf %381, %385 : vector<8x32xf32>
    %387 = arith.index_cast %367 : i32 to index
    %c0_137 = arith.constant 0 : index
    %388 = vector.load %arg23[%387, %c0_137] : memref<48x32xf32, #tpu.memory_space<vmem>>, vector<8x32xf32>
    tpu.vector_store %arg23[%387, %c0_137], %386 {strides = array<i32>} : memref<48x32xf32, #tpu.memory_space<vmem>>, vector<8x32xf32>,
    %c2_i32_138 = arith.constant 2 : i32
    %c8_i32_139 = arith.constant 8 : i32
    %389 = arith.muli %c2_i32_138, %c8_i32_139 : i32
    %390 = tpu.assume_multiple %389, 8 : i32
    %c8_i32_140 = arith.constant 8 : i32
    %391 = arith.muli %c2_i32_138, %c8_i32_140 : i32
    %c0_i32_141 = arith.constant 0 : i32
    %392 = arith.addi %c0_i32_141, %391 : i32
    %393 = tpu.assume_multiple %392, 8 : i32
    %394 = arith.index_cast %390 : i32 to index
    %c0_142 = arith.constant 0 : index
    %395 = vector.load %arg25[%394, %c0_142] : memref<48x128xf32, #tpu.memory_space<vmem>>, vector<8x128xf32>
    %cst_143 = arith.constant dense<0.000000e+00> : vector<8x128xf32>
    %396 = tpu.matmul %386, %330, %cst_143 {dimension_numbers = #tpu.dot_dimension_numbers<[1], [0], [0], [1], [0, 0, 1, 1], [], []>} : vector<8x32xf32>, vector<32x128xf32>, vector<8x128xf32> -> vector<8x128xf32>
    %397 = arith.addf %395, %396 : vector<8x128xf32>
    %398 = arith.negf %397 : vector<8x128xf32>
    %399 = math.exp %398 : vector<8x128xf32>
    %cst_144 = arith.constant 1.000000e+00 : f32
    %400 = vector.broadcast %cst_144 : f32 to vector<8x128xf32>
    %401 = arith.addf %400, %399 : vector<8x128xf32>
    %402 = arith.divf %400, %401 : vector<8x128xf32>
    %403 = math.tanh %397 : vector<8x128xf32>
    %404 = vector.extract_strided_slice %402 {offsets = [0, 0], sizes = [8, 32], strides = [1, 1]} : vector<8x128xf32> to vector<8x32xf32>
    %405 = vector.extract_strided_slice %402 {offsets = [0, 32], sizes = [8, 32], strides = [1, 1]} : vector<8x128xf32> to vector<8x32xf32>
    %406 = vector.extract_strided_slice %403 {offsets = [0, 64], sizes = [8, 32], strides = [1, 1]} : vector<8x128xf32> to vector<8x32xf32>
    %407 = vector.extract_strided_slice %402 {offsets = [0, 96], sizes = [8, 32], strides = [1, 1]} : vector<8x128xf32> to vector<8x32xf32>
    %408 = arith.mulf %405, %384 : vector<8x32xf32>
    %409 = arith.mulf %404, %406 : vector<8x32xf32>
    %410 = arith.addf %408, %409 : vector<8x32xf32>
    %411 = math.tanh %410 : vector<8x32xf32>
    %412 = arith.mulf %407, %411 : vector<8x32xf32>
    %413 = arith.index_cast %393 : i32 to index
    %c0_145 = arith.constant 0 : index
    %414 = vector.load %arg23[%413, %c0_145] : memref<48x32xf32, #tpu.memory_space<vmem>>, vector<8x32xf32>
    tpu.vector_store %arg23[%413, %c0_145], %412 {strides = array<i32>} : memref<48x32xf32, #tpu.memory_space<vmem>>, vector<8x32xf32>,
    %c3_i32_146 = arith.constant 3 : i32
    %c8_i32_147 = arith.constant 8 : i32
    %415 = arith.muli %c3_i32_146, %c8_i32_147 : i32
    %416 = tpu.assume_multiple %415, 8 : i32
    %c8_i32_148 = arith.constant 8 : i32
    %417 = arith.muli %c3_i32_146, %c8_i32_148 : i32
    %c0_i32_149 = arith.constant 0 : i32
    %418 = arith.addi %c0_i32_149, %417 : i32
    %419 = tpu.assume_multiple %418, 8 : i32
    %420 = arith.index_cast %416 : i32 to index
    %c0_150 = arith.constant 0 : index
    %421 = vector.load %arg25[%420, %c0_150] : memref<48x128xf32, #tpu.memory_space<vmem>>, vector<8x128xf32>
    %cst_151 = arith.constant dense<0.000000e+00> : vector<8x128xf32>
    %422 = tpu.matmul %412, %330, %cst_151 {dimension_numbers = #tpu.dot_dimension_numbers<[1], [0], [0], [1], [0, 0, 1, 1], [], []>} : vector<8x32xf32>, vector<32x128xf32>, vector<8x128xf32> -> vector<8x128xf32>
    %423 = arith.addf %421, %422 : vector<8x128xf32>
    %424 = arith.negf %423 : vector<8x128xf32>
    %425 = math.exp %424 : vector<8x128xf32>
    %cst_152 = arith.constant 1.000000e+00 : f32
    %426 = vector.broadcast %cst_152 : f32 to vector<8x128xf32>
    %427 = arith.addf %426, %425 : vector<8x128xf32>
    %428 = arith.divf %426, %427 : vector<8x128xf32>
    %429 = math.tanh %423 : vector<8x128xf32>
    %430 = vector.extract_strided_slice %428 {offsets = [0, 0], sizes = [8, 32], strides = [1, 1]} : vector<8x128xf32> to vector<8x32xf32>
    %431 = vector.extract_strided_slice %428 {offsets = [0, 32], sizes = [8, 32], strides = [1, 1]} : vector<8x128xf32> to vector<8x32xf32>
    %432 = vector.extract_strided_slice %429 {offsets = [0, 64], sizes = [8, 32], strides = [1, 1]} : vector<8x128xf32> to vector<8x32xf32>
    %433 = vector.extract_strided_slice %428 {offsets = [0, 96], sizes = [8, 32], strides = [1, 1]} : vector<8x128xf32> to vector<8x32xf32>
    %434 = arith.mulf %431, %410 : vector<8x32xf32>
    %435 = arith.mulf %430, %432 : vector<8x32xf32>
    %436 = arith.addf %434, %435 : vector<8x32xf32>
    %437 = math.tanh %436 : vector<8x32xf32>
    %438 = arith.mulf %433, %437 : vector<8x32xf32>
    %439 = arith.index_cast %419 : i32 to index
    %c0_153 = arith.constant 0 : index
    %440 = vector.load %arg23[%439, %c0_153] : memref<48x32xf32, #tpu.memory_space<vmem>>, vector<8x32xf32>
    tpu.vector_store %arg23[%439, %c0_153], %438 {strides = array<i32>} : memref<48x32xf32, #tpu.memory_space<vmem>>, vector<8x32xf32>,
    %c4_i32_154 = arith.constant 4 : i32
    %c8_i32_155 = arith.constant 8 : i32
    %441 = arith.muli %c4_i32_154, %c8_i32_155 : i32
    %442 = tpu.assume_multiple %441, 8 : i32
    %c8_i32_156 = arith.constant 8 : i32
    %443 = arith.muli %c4_i32_154, %c8_i32_156 : i32
    %c0_i32_157 = arith.constant 0 : i32
    %444 = arith.addi %c0_i32_157, %443 : i32
    %445 = tpu.assume_multiple %444, 8 : i32
    %446 = arith.index_cast %442 : i32 to index
    %c0_158 = arith.constant 0 : index
    %447 = vector.load %arg25[%446, %c0_158] : memref<48x128xf32, #tpu.memory_space<vmem>>, vector<8x128xf32>
    %cst_159 = arith.constant dense<0.000000e+00> : vector<8x128xf32>
    %448 = tpu.matmul %438, %330, %cst_159 {dimension_numbers = #tpu.dot_dimension_numbers<[1], [0], [0], [1], [0, 0, 1, 1], [], []>} : vector<8x32xf32>, vector<32x128xf32>, vector<8x128xf32> -> vector<8x128xf32>
    %449 = arith.addf %447, %448 : vector<8x128xf32>
    %450 = arith.negf %449 : vector<8x128xf32>
    %451 = math.exp %450 : vector<8x128xf32>
    %cst_160 = arith.constant 1.000000e+00 : f32
    %452 = vector.broadcast %cst_160 : f32 to vector<8x128xf32>
    %453 = arith.addf %452, %451 : vector<8x128xf32>
    %454 = arith.divf %452, %453 : vector<8x128xf32>
    %455 = math.tanh %449 : vector<8x128xf32>
    %456 = vector.extract_strided_slice %454 {offsets = [0, 0], sizes = [8, 32], strides = [1, 1]} : vector<8x128xf32> to vector<8x32xf32>
    %457 = vector.extract_strided_slice %454 {offsets = [0, 32], sizes = [8, 32], strides = [1, 1]} : vector<8x128xf32> to vector<8x32xf32>
    %458 = vector.extract_strided_slice %455 {offsets = [0, 64], sizes = [8, 32], strides = [1, 1]} : vector<8x128xf32> to vector<8x32xf32>
    %459 = vector.extract_strided_slice %454 {offsets = [0, 96], sizes = [8, 32], strides = [1, 1]} : vector<8x128xf32> to vector<8x32xf32>
    %460 = arith.mulf %457, %436 : vector<8x32xf32>
    %461 = arith.mulf %456, %458 : vector<8x32xf32>
    %462 = arith.addf %460, %461 : vector<8x32xf32>
    %463 = math.tanh %462 : vector<8x32xf32>
    %464 = arith.mulf %459, %463 : vector<8x32xf32>
    %465 = arith.index_cast %445 : i32 to index
    %c0_161 = arith.constant 0 : index
    %466 = vector.load %arg23[%465, %c0_161] : memref<48x32xf32, #tpu.memory_space<vmem>>, vector<8x32xf32>
    tpu.vector_store %arg23[%465, %c0_161], %464 {strides = array<i32>} : memref<48x32xf32, #tpu.memory_space<vmem>>, vector<8x32xf32>,
    %c5_i32_162 = arith.constant 5 : i32
    %c8_i32_163 = arith.constant 8 : i32
    %467 = arith.muli %c5_i32_162, %c8_i32_163 : i32
    %468 = tpu.assume_multiple %467, 8 : i32
    %c8_i32_164 = arith.constant 8 : i32
    %469 = arith.muli %c5_i32_162, %c8_i32_164 : i32
    %c0_i32_165 = arith.constant 0 : i32
    %470 = arith.addi %c0_i32_165, %469 : i32
    %471 = tpu.assume_multiple %470, 8 : i32
    %472 = arith.index_cast %468 : i32 to index
    %c0_166 = arith.constant 0 : index
    %473 = vector.load %arg25[%472, %c0_166] : memref<48x128xf32, #tpu.memory_space<vmem>>, vector<8x128xf32>
    %cst_167 = arith.constant dense<0.000000e+00> : vector<8x128xf32>
    %474 = tpu.matmul %464, %330, %cst_167 {dimension_numbers = #tpu.dot_dimension_numbers<[1], [0], [0], [1], [0, 0, 1, 1], [], []>} : vector<8x32xf32>, vector<32x128xf32>, vector<8x128xf32> -> vector<8x128xf32>
    %475 = arith.addf %473, %474 : vector<8x128xf32>
    %476 = arith.negf %475 : vector<8x128xf32>
    %477 = math.exp %476 : vector<8x128xf32>
    %cst_168 = arith.constant 1.000000e+00 : f32
    %478 = vector.broadcast %cst_168 : f32 to vector<8x128xf32>
    %479 = arith.addf %478, %477 : vector<8x128xf32>
    %480 = arith.divf %478, %479 : vector<8x128xf32>
    %481 = math.tanh %475 : vector<8x128xf32>
    %482 = vector.extract_strided_slice %480 {offsets = [0, 0], sizes = [8, 32], strides = [1, 1]} : vector<8x128xf32> to vector<8x32xf32>
    %483 = vector.extract_strided_slice %480 {offsets = [0, 32], sizes = [8, 32], strides = [1, 1]} : vector<8x128xf32> to vector<8x32xf32>
    %484 = vector.extract_strided_slice %481 {offsets = [0, 64], sizes = [8, 32], strides = [1, 1]} : vector<8x128xf32> to vector<8x32xf32>
    %485 = vector.extract_strided_slice %480 {offsets = [0, 96], sizes = [8, 32], strides = [1, 1]} : vector<8x128xf32> to vector<8x32xf32>
    %486 = arith.mulf %483, %462 : vector<8x32xf32>
    %487 = arith.mulf %482, %484 : vector<8x32xf32>
    %488 = arith.addf %486, %487 : vector<8x32xf32>
    %489 = math.tanh %488 : vector<8x32xf32>
    %490 = arith.mulf %485, %489 : vector<8x32xf32>
    %491 = arith.index_cast %471 : i32 to index
    %c0_169 = arith.constant 0 : index
    %492 = vector.load %arg23[%491, %c0_169] : memref<48x32xf32, #tpu.memory_space<vmem>>, vector<8x32xf32>
    tpu.vector_store %arg23[%491, %c0_169], %490 {strides = array<i32>} : memref<48x32xf32, #tpu.memory_space<vmem>>, vector<8x32xf32>,
    %c6_i32_170 = arith.constant 6 : i32
    %c0_171 = arith.constant 0 : index
    %c0_172 = arith.constant 0 : index
    %493 = vector.load %arg11[%c0_171, %c0_172] : memref<4x128xf32, #tpu.memory_space<vmem>>, vector<4x128xf32>
    %c0_173 = arith.constant 0 : index
    %c0_174 = arith.constant 0 : index
    %494 = vector.load %arg12[%c0_173, %c0_174] : memref<32x128xf32, #tpu.memory_space<vmem>>, vector<32x128xf32>
    %c0_175 = arith.constant 0 : index
    %c0_176 = arith.constant 0 : index
    %495 = vector.load %arg13[%c0_175, %c0_176] : memref<1x128xf32, #tpu.memory_space<vmem>>, vector<1x128xf32>
    %c0_177 = arith.constant 0 : index
    %c0_178 = arith.constant 0 : index
    %496 = vector.load %arg1[%c0_177, %c0_178] : memref<40x4xf32, #tpu.memory_space<vmem>>, vector<40x4xf32>
    %cst_179 = arith.constant dense<0.000000e+00> : vector<40x128xf32>
    %497 = tpu.matmul %496, %493, %cst_179 {dimension_numbers = #tpu.dot_dimension_numbers<[1], [0], [0], [1], [0, 0, 1, 1], [], []>} : vector<40x4xf32>, vector<4x128xf32>, vector<40x128xf32> -> vector<40x128xf32>
    %498 = vector.broadcast %495 : vector<1x128xf32> to vector<40x128xf32>
    %499 = arith.addf %497, %498 : vector<40x128xf32>
    %c0_180 = arith.constant 0 : index
    %c0_181 = arith.constant 0 : index
    %500 = vector.load %arg25[%c0_180, %c0_181] : memref<48x128xf32, #tpu.memory_space<vmem>>, vector<40x128xf32>
    tpu.vector_store %arg25[%c0_180, %c0_181], %499 {strides = array<i32>} : memref<48x128xf32, #tpu.memory_space<vmem>>, vector<40x128xf32>,
    %c0_i32_182 = arith.constant 0 : i32
    %c8_i32_183 = arith.constant 8 : i32
    %501 = arith.muli %c0_i32_182, %c8_i32_183 : i32
    %502 = tpu.assume_multiple %501, 8 : i32
    %c8_i32_184 = arith.constant 8 : i32
    %503 = arith.muli %c0_i32_182, %c8_i32_184 : i32
    %c0_i32_185 = arith.constant 0 : i32
    %504 = arith.addi %c0_i32_185, %503 : i32
    %505 = tpu.assume_multiple %504, 8 : i32
    %506 = arith.index_cast %502 : i32 to index
    %c0_186 = arith.constant 0 : index
    %507 = vector.load %arg25[%506, %c0_186] : memref<48x128xf32, #tpu.memory_space<vmem>>, vector<8x128xf32>
    %cst_187 = arith.constant dense<0.000000e+00> : vector<8x128xf32>
    %508 = tpu.matmul %162, %494, %cst_187 {dimension_numbers = #tpu.dot_dimension_numbers<[1], [0], [0], [1], [0, 0, 1, 1], [], []>} : vector<8x32xf32>, vector<32x128xf32>, vector<8x128xf32> -> vector<8x128xf32>
    %509 = arith.addf %507, %508 : vector<8x128xf32>
    %510 = arith.negf %509 : vector<8x128xf32>
    %511 = math.exp %510 : vector<8x128xf32>
    %cst_188 = arith.constant 1.000000e+00 : f32
    %512 = vector.broadcast %cst_188 : f32 to vector<8x128xf32>
    %513 = arith.addf %512, %511 : vector<8x128xf32>
    %514 = arith.divf %512, %513 : vector<8x128xf32>
    %515 = math.tanh %509 : vector<8x128xf32>
    %516 = vector.extract_strided_slice %514 {offsets = [0, 0], sizes = [8, 32], strides = [1, 1]} : vector<8x128xf32> to vector<8x32xf32>
    %517 = vector.extract_strided_slice %514 {offsets = [0, 32], sizes = [8, 32], strides = [1, 1]} : vector<8x128xf32> to vector<8x32xf32>
    %518 = vector.extract_strided_slice %515 {offsets = [0, 64], sizes = [8, 32], strides = [1, 1]} : vector<8x128xf32> to vector<8x32xf32>
    %519 = vector.extract_strided_slice %514 {offsets = [0, 96], sizes = [8, 32], strides = [1, 1]} : vector<8x128xf32> to vector<8x32xf32>
    %520 = arith.mulf %517, %160 : vector<8x32xf32>
    %521 = arith.mulf %516, %518 : vector<8x32xf32>
    %522 = arith.addf %520, %521 : vector<8x32xf32>
    %523 = math.tanh %522 : vector<8x32xf32>
    %524 = arith.mulf %519, %523 : vector<8x32xf32>
    %525 = arith.index_cast %505 : i32 to index
    %c0_189 = arith.constant 0 : index
    %526 = vector.load %arg23[%525, %c0_189] : memref<48x32xf32, #tpu.memory_space<vmem>>, vector<8x32xf32>
    tpu.vector_store %arg23[%525, %c0_189], %524 {strides = array<i32>} : memref<48x32xf32, #tpu.memory_space<vmem>>, vector<8x32xf32>,
    %c1_i32_190 = arith.constant 1 : i32
    %c8_i32_191 = arith.constant 8 : i32
    %527 = arith.muli %c1_i32_190, %c8_i32_191 : i32
    %528 = tpu.assume_multiple %527, 8 : i32
    %c8_i32_192 = arith.constant 8 : i32
    %529 = arith.muli %c1_i32_190, %c8_i32_192 : i32
    %c0_i32_193 = arith.constant 0 : i32
    %530 = arith.addi %c0_i32_193, %529 : i32
    %531 = tpu.assume_multiple %530, 8 : i32
    %532 = arith.index_cast %528 : i32 to index
    %c0_194 = arith.constant 0 : index
    %533 = vector.load %arg25[%532, %c0_194] : memref<48x128xf32, #tpu.memory_space<vmem>>, vector<8x128xf32>
    %cst_195 = arith.constant dense<0.000000e+00> : vector<8x128xf32>
    %534 = tpu.matmul %524, %494, %cst_195 {dimension_numbers = #tpu.dot_dimension_numbers<[1], [0], [0], [1], [0, 0, 1, 1], [], []>} : vector<8x32xf32>, vector<32x128xf32>, vector<8x128xf32> -> vector<8x128xf32>
    %535 = arith.addf %533, %534 : vector<8x128xf32>
    %536 = arith.negf %535 : vector<8x128xf32>
    %537 = math.exp %536 : vector<8x128xf32>
    %cst_196 = arith.constant 1.000000e+00 : f32
    %538 = vector.broadcast %cst_196 : f32 to vector<8x128xf32>
    %539 = arith.addf %538, %537 : vector<8x128xf32>
    %540 = arith.divf %538, %539 : vector<8x128xf32>
    %541 = math.tanh %535 : vector<8x128xf32>
    %542 = vector.extract_strided_slice %540 {offsets = [0, 0], sizes = [8, 32], strides = [1, 1]} : vector<8x128xf32> to vector<8x32xf32>
    %543 = vector.extract_strided_slice %540 {offsets = [0, 32], sizes = [8, 32], strides = [1, 1]} : vector<8x128xf32> to vector<8x32xf32>
    %544 = vector.extract_strided_slice %541 {offsets = [0, 64], sizes = [8, 32], strides = [1, 1]} : vector<8x128xf32> to vector<8x32xf32>
    %545 = vector.extract_strided_slice %540 {offsets = [0, 96], sizes = [8, 32], strides = [1, 1]} : vector<8x128xf32> to vector<8x32xf32>
    %546 = arith.mulf %543, %522 : vector<8x32xf32>
    %547 = arith.mulf %542, %544 : vector<8x32xf32>
    %548 = arith.addf %546, %547 : vector<8x32xf32>
    %549 = math.tanh %548 : vector<8x32xf32>
    %550 = arith.mulf %545, %549 : vector<8x32xf32>
    %551 = arith.index_cast %531 : i32 to index
    %c0_197 = arith.constant 0 : index
    %552 = vector.load %arg23[%551, %c0_197] : memref<48x32xf32, #tpu.memory_space<vmem>>, vector<8x32xf32>
    tpu.vector_store %arg23[%551, %c0_197], %550 {strides = array<i32>} : memref<48x32xf32, #tpu.memory_space<vmem>>, vector<8x32xf32>,
    %c2_i32_198 = arith.constant 2 : i32
    %c8_i32_199 = arith.constant 8 : i32
    %553 = arith.muli %c2_i32_198, %c8_i32_199 : i32
    %554 = tpu.assume_multiple %553, 8 : i32
    %c8_i32_200 = arith.constant 8 : i32
    %555 = arith.muli %c2_i32_198, %c8_i32_200 : i32
    %c0_i32_201 = arith.constant 0 : i32
    %556 = arith.addi %c0_i32_201, %555 : i32
    %557 = tpu.assume_multiple %556, 8 : i32
    %558 = arith.index_cast %554 : i32 to index
    %c0_202 = arith.constant 0 : index
    %559 = vector.load %arg25[%558, %c0_202] : memref<48x128xf32, #tpu.memory_space<vmem>>, vector<8x128xf32>
    %cst_203 = arith.constant dense<0.000000e+00> : vector<8x128xf32>
    %560 = tpu.matmul %550, %494, %cst_203 {dimension_numbers = #tpu.dot_dimension_numbers<[1], [0], [0], [1], [0, 0, 1, 1], [], []>} : vector<8x32xf32>, vector<32x128xf32>, vector<8x128xf32> -> vector<8x128xf32>
    %561 = arith.addf %559, %560 : vector<8x128xf32>
    %562 = arith.negf %561 : vector<8x128xf32>
    %563 = math.exp %562 : vector<8x128xf32>
    %cst_204 = arith.constant 1.000000e+00 : f32
    %564 = vector.broadcast %cst_204 : f32 to vector<8x128xf32>
    %565 = arith.addf %564, %563 : vector<8x128xf32>
    %566 = arith.divf %564, %565 : vector<8x128xf32>
    %567 = math.tanh %561 : vector<8x128xf32>
    %568 = vector.extract_strided_slice %566 {offsets = [0, 0], sizes = [8, 32], strides = [1, 1]} : vector<8x128xf32> to vector<8x32xf32>
    %569 = vector.extract_strided_slice %566 {offsets = [0, 32], sizes = [8, 32], strides = [1, 1]} : vector<8x128xf32> to vector<8x32xf32>
    %570 = vector.extract_strided_slice %567 {offsets = [0, 64], sizes = [8, 32], strides = [1, 1]} : vector<8x128xf32> to vector<8x32xf32>
    %571 = vector.extract_strided_slice %566 {offsets = [0, 96], sizes = [8, 32], strides = [1, 1]} : vector<8x128xf32> to vector<8x32xf32>
    %572 = arith.mulf %569, %548 : vector<8x32xf32>
    %573 = arith.mulf %568, %570 : vector<8x32xf32>
    %574 = arith.addf %572, %573 : vector<8x32xf32>
    %575 = math.tanh %574 : vector<8x32xf32>
    %576 = arith.mulf %571, %575 : vector<8x32xf32>
    %577 = arith.index_cast %557 : i32 to index
    %c0_205 = arith.constant 0 : index
    %578 = vector.load %arg23[%577, %c0_205] : memref<48x32xf32, #tpu.memory_space<vmem>>, vector<8x32xf32>
    tpu.vector_store %arg23[%577, %c0_205], %576 {strides = array<i32>} : memref<48x32xf32, #tpu.memory_space<vmem>>, vector<8x32xf32>,
    %c3_i32_206 = arith.constant 3 : i32
    %c8_i32_207 = arith.constant 8 : i32
    %579 = arith.muli %c3_i32_206, %c8_i32_207 : i32
    %580 = tpu.assume_multiple %579, 8 : i32
    %c8_i32_208 = arith.constant 8 : i32
    %581 = arith.muli %c3_i32_206, %c8_i32_208 : i32
    %c0_i32_209 = arith.constant 0 : i32
    %582 = arith.addi %c0_i32_209, %581 : i32
    %583 = tpu.assume_multiple %582, 8 : i32
    %584 = arith.index_cast %580 : i32 to index
    %c0_210 = arith.constant 0 : index
    %585 = vector.load %arg25[%584, %c0_210] : memref<48x128xf32, #tpu.memory_space<vmem>>, vector<8x128xf32>
    %cst_211 = arith.constant dense<0.000000e+00> : vector<8x128xf32>
    %586 = tpu.matmul %576, %494, %cst_211 {dimension_numbers = #tpu.dot_dimension_numbers<[1], [0], [0], [1], [0, 0, 1, 1], [], []>} : vector<8x32xf32>, vector<32x128xf32>, vector<8x128xf32> -> vector<8x128xf32>
    %587 = arith.addf %585, %586 : vector<8x128xf32>
    %588 = arith.negf %587 : vector<8x128xf32>
    %589 = math.exp %588 : vector<8x128xf32>
    %cst_212 = arith.constant 1.000000e+00 : f32
    %590 = vector.broadcast %cst_212 : f32 to vector<8x128xf32>
    %591 = arith.addf %590, %589 : vector<8x128xf32>
    %592 = arith.divf %590, %591 : vector<8x128xf32>
    %593 = math.tanh %587 : vector<8x128xf32>
    %594 = vector.extract_strided_slice %592 {offsets = [0, 0], sizes = [8, 32], strides = [1, 1]} : vector<8x128xf32> to vector<8x32xf32>
    %595 = vector.extract_strided_slice %592 {offsets = [0, 32], sizes = [8, 32], strides = [1, 1]} : vector<8x128xf32> to vector<8x32xf32>
    %596 = vector.extract_strided_slice %593 {offsets = [0, 64], sizes = [8, 32], strides = [1, 1]} : vector<8x128xf32> to vector<8x32xf32>
    %597 = vector.extract_strided_slice %592 {offsets = [0, 96], sizes = [8, 32], strides = [1, 1]} : vector<8x128xf32> to vector<8x32xf32>
    %598 = arith.mulf %595, %574 : vector<8x32xf32>
    %599 = arith.mulf %594, %596 : vector<8x32xf32>
    %600 = arith.addf %598, %599 : vector<8x32xf32>
    %601 = math.tanh %600 : vector<8x32xf32>
    %602 = arith.mulf %597, %601 : vector<8x32xf32>
    %603 = arith.index_cast %583 : i32 to index
    %c0_213 = arith.constant 0 : index
    %604 = vector.load %arg23[%603, %c0_213] : memref<48x32xf32, #tpu.memory_space<vmem>>, vector<8x32xf32>
    tpu.vector_store %arg23[%603, %c0_213], %602 {strides = array<i32>} : memref<48x32xf32, #tpu.memory_space<vmem>>, vector<8x32xf32>,
    %c4_i32_214 = arith.constant 4 : i32
    %c8_i32_215 = arith.constant 8 : i32
    %605 = arith.muli %c4_i32_214, %c8_i32_215 : i32
    %606 = tpu.assume_multiple %605, 8 : i32
    %c8_i32_216 = arith.constant 8 : i32
    %607 = arith.muli %c4_i32_214, %c8_i32_216 : i32
    %c0_i32_217 = arith.constant 0 : i32
    %608 = arith.addi %c0_i32_217, %607 : i32
    %609 = tpu.assume_multiple %608, 8 : i32
    %610 = arith.index_cast %606 : i32 to index
    %c0_218 = arith.constant 0 : index
    %611 = vector.load %arg25[%610, %c0_218] : memref<48x128xf32, #tpu.memory_space<vmem>>, vector<8x128xf32>
    %cst_219 = arith.constant dense<0.000000e+00> : vector<8x128xf32>
    %612 = tpu.matmul %602, %494, %cst_219 {dimension_numbers = #tpu.dot_dimension_numbers<[1], [0], [0], [1], [0, 0, 1, 1], [], []>} : vector<8x32xf32>, vector<32x128xf32>, vector<8x128xf32> -> vector<8x128xf32>
    %613 = arith.addf %611, %612 : vector<8x128xf32>
    %614 = arith.negf %613 : vector<8x128xf32>
    %615 = math.exp %614 : vector<8x128xf32>
    %cst_220 = arith.constant 1.000000e+00 : f32
    %616 = vector.broadcast %cst_220 : f32 to vector<8x128xf32>
    %617 = arith.addf %616, %615 : vector<8x128xf32>
    %618 = arith.divf %616, %617 : vector<8x128xf32>
    %619 = math.tanh %613 : vector<8x128xf32>
    %620 = vector.extract_strided_slice %618 {offsets = [0, 0], sizes = [8, 32], strides = [1, 1]} : vector<8x128xf32> to vector<8x32xf32>
    %621 = vector.extract_strided_slice %618 {offsets = [0, 32], sizes = [8, 32], strides = [1, 1]} : vector<8x128xf32> to vector<8x32xf32>
    %622 = vector.extract_strided_slice %619 {offsets = [0, 64], sizes = [8, 32], strides = [1, 1]} : vector<8x128xf32> to vector<8x32xf32>
    %623 = vector.extract_strided_slice %618 {offsets = [0, 96], sizes = [8, 32], strides = [1, 1]} : vector<8x128xf32> to vector<8x32xf32>
    %624 = arith.mulf %621, %600 : vector<8x32xf32>
    %625 = arith.mulf %620, %622 : vector<8x32xf32>
    %626 = arith.addf %624, %625 : vector<8x32xf32>
    %627 = math.tanh %626 : vector<8x32xf32>
    %628 = arith.mulf %623, %627 : vector<8x32xf32>
    %629 = arith.index_cast %609 : i32 to index
    %c0_221 = arith.constant 0 : index
    %630 = vector.load %arg23[%629, %c0_221] : memref<48x32xf32, #tpu.memory_space<vmem>>, vector<8x32xf32>
    tpu.vector_store %arg23[%629, %c0_221], %628 {strides = array<i32>} : memref<48x32xf32, #tpu.memory_space<vmem>>, vector<8x32xf32>,
    %c5_i32_222 = arith.constant 5 : i32
    %c0_223 = arith.constant 0 : index
    %c0_224 = arith.constant 0 : index
    %631 = vector.load %arg14[%c0_223, %c0_224] : memref<32x128xf32, #tpu.memory_space<vmem>>, vector<32x128xf32>
    %c0_225 = arith.constant 0 : index
    %c0_226 = arith.constant 0 : index
    %632 = vector.load %arg15[%c0_225, %c0_226] : memref<32x128xf32, #tpu.memory_space<vmem>>, vector<32x128xf32>
    %c0_227 = arith.constant 0 : index
    %c0_228 = arith.constant 0 : index
    %633 = vector.load %arg16[%c0_227, %c0_228] : memref<1x128xf32, #tpu.memory_space<vmem>>, vector<1x128xf32>
    %c0_229 = arith.constant 0 : index
    %c0_230 = arith.constant 0 : index
    %634 = vector.load %arg23[%c0_229, %c0_230] : memref<48x32xf32, #tpu.memory_space<vmem>>, vector<40x32xf32>
    %cst_231 = arith.constant dense<0.000000e+00> : vector<40x128xf32>
    %635 = tpu.matmul %634, %631, %cst_231 {dimension_numbers = #tpu.dot_dimension_numbers<[1], [0], [0], [1], [0, 0, 1, 1], [], []>} : vector<40x32xf32>, vector<32x128xf32>, vector<40x128xf32> -> vector<40x128xf32>
    %636 = vector.broadcast %633 : vector<1x128xf32> to vector<40x128xf32>
    %637 = arith.addf %635, %636 : vector<40x128xf32>
    %c0_232 = arith.constant 0 : index
    %c0_233 = arith.constant 0 : index
    %638 = vector.load %arg25[%c0_232, %c0_233] : memref<48x128xf32, #tpu.memory_space<vmem>>, vector<40x128xf32>
    tpu.vector_store %arg25[%c0_232, %c0_233], %637 {strides = array<i32>} : memref<48x128xf32, #tpu.memory_space<vmem>>, vector<40x128xf32>,
    %c0_i32_234 = arith.constant 0 : i32
    %c8_i32_235 = arith.constant 8 : i32
    %639 = arith.muli %c0_i32_234, %c8_i32_235 : i32
    %640 = tpu.assume_multiple %639, 8 : i32
    %c8_i32_236 = arith.constant 8 : i32
    %641 = arith.muli %c0_i32_234, %c8_i32_236 : i32
    %c0_i32_237 = arith.constant 0 : i32
    %642 = arith.addi %c0_i32_237, %641 : i32
    %643 = tpu.assume_multiple %642, 8 : i32
    %644 = arith.index_cast %640 : i32 to index
    %c0_238 = arith.constant 0 : index
    %645 = vector.load %arg25[%644, %c0_238] : memref<48x128xf32, #tpu.memory_space<vmem>>, vector<8x128xf32>
    %cst_239 = arith.constant dense<0.000000e+00> : vector<8x128xf32>
    %646 = tpu.matmul %326, %632, %cst_239 {dimension_numbers = #tpu.dot_dimension_numbers<[1], [0], [0], [1], [0, 0, 1, 1], [], []>} : vector<8x32xf32>, vector<32x128xf32>, vector<8x128xf32> -> vector<8x128xf32>
    %647 = arith.addf %645, %646 : vector<8x128xf32>
    %648 = arith.negf %647 : vector<8x128xf32>
    %649 = math.exp %648 : vector<8x128xf32>
    %cst_240 = arith.constant 1.000000e+00 : f32
    %650 = vector.broadcast %cst_240 : f32 to vector<8x128xf32>
    %651 = arith.addf %650, %649 : vector<8x128xf32>
    %652 = arith.divf %650, %651 : vector<8x128xf32>
    %653 = math.tanh %647 : vector<8x128xf32>
    %654 = vector.extract_strided_slice %652 {offsets = [0, 0], sizes = [8, 32], strides = [1, 1]} : vector<8x128xf32> to vector<8x32xf32>
    %655 = vector.extract_strided_slice %652 {offsets = [0, 32], sizes = [8, 32], strides = [1, 1]} : vector<8x128xf32> to vector<8x32xf32>
    %656 = vector.extract_strided_slice %653 {offsets = [0, 64], sizes = [8, 32], strides = [1, 1]} : vector<8x128xf32> to vector<8x32xf32>
    %657 = vector.extract_strided_slice %652 {offsets = [0, 96], sizes = [8, 32], strides = [1, 1]} : vector<8x128xf32> to vector<8x32xf32>
    %658 = arith.mulf %655, %324 : vector<8x32xf32>
    %659 = arith.mulf %654, %656 : vector<8x32xf32>
    %660 = arith.addf %658, %659 : vector<8x32xf32>
    %661 = math.tanh %660 : vector<8x32xf32>
    %662 = arith.mulf %657, %661 : vector<8x32xf32>
    %663 = arith.index_cast %643 : i32 to index
    %c0_241 = arith.constant 0 : index
    %664 = vector.load %arg24[%663, %c0_241] : memref<48x32xf32, #tpu.memory_space<vmem>>, vector<8x32xf32>
    tpu.vector_store %arg24[%663, %c0_241], %662 {strides = array<i32>} : memref<48x32xf32, #tpu.memory_space<vmem>>, vector<8x32xf32>,
    %c1_i32_242 = arith.constant 1 : i32
    %c8_i32_243 = arith.constant 8 : i32
    %665 = arith.muli %c1_i32_242, %c8_i32_243 : i32
    %666 = tpu.assume_multiple %665, 8 : i32
    %c8_i32_244 = arith.constant 8 : i32
    %667 = arith.muli %c1_i32_242, %c8_i32_244 : i32
    %c0_i32_245 = arith.constant 0 : i32
    %668 = arith.addi %c0_i32_245, %667 : i32
    %669 = tpu.assume_multiple %668, 8 : i32
    %670 = arith.index_cast %666 : i32 to index
    %c0_246 = arith.constant 0 : index
    %671 = vector.load %arg25[%670, %c0_246] : memref<48x128xf32, #tpu.memory_space<vmem>>, vector<8x128xf32>
    %cst_247 = arith.constant dense<0.000000e+00> : vector<8x128xf32>
    %672 = tpu.matmul %662, %632, %cst_247 {dimension_numbers = #tpu.dot_dimension_numbers<[1], [0], [0], [1], [0, 0, 1, 1], [], []>} : vector<8x32xf32>, vector<32x128xf32>, vector<8x128xf32> -> vector<8x128xf32>
    %673 = arith.addf %671, %672 : vector<8x128xf32>
    %674 = arith.negf %673 : vector<8x128xf32>
    %675 = math.exp %674 : vector<8x128xf32>
    %cst_248 = arith.constant 1.000000e+00 : f32
    %676 = vector.broadcast %cst_248 : f32 to vector<8x128xf32>
    %677 = arith.addf %676, %675 : vector<8x128xf32>
    %678 = arith.divf %676, %677 : vector<8x128xf32>
    %679 = math.tanh %673 : vector<8x128xf32>
    %680 = vector.extract_strided_slice %678 {offsets = [0, 0], sizes = [8, 32], strides = [1, 1]} : vector<8x128xf32> to vector<8x32xf32>
    %681 = vector.extract_strided_slice %678 {offsets = [0, 32], sizes = [8, 32], strides = [1, 1]} : vector<8x128xf32> to vector<8x32xf32>
    %682 = vector.extract_strided_slice %679 {offsets = [0, 64], sizes = [8, 32], strides = [1, 1]} : vector<8x128xf32> to vector<8x32xf32>
    %683 = vector.extract_strided_slice %678 {offsets = [0, 96], sizes = [8, 32], strides = [1, 1]} : vector<8x128xf32> to vector<8x32xf32>
    %684 = arith.mulf %681, %660 : vector<8x32xf32>
    %685 = arith.mulf %680, %682 : vector<8x32xf32>
    %686 = arith.addf %684, %685 : vector<8x32xf32>
    %687 = math.tanh %686 : vector<8x32xf32>
    %688 = arith.mulf %683, %687 : vector<8x32xf32>
    %689 = arith.index_cast %669 : i32 to index
    %c0_249 = arith.constant 0 : index
    %690 = vector.load %arg24[%689, %c0_249] : memref<48x32xf32, #tpu.memory_space<vmem>>, vector<8x32xf32>
    tpu.vector_store %arg24[%689, %c0_249], %688 {strides = array<i32>} : memref<48x32xf32, #tpu.memory_space<vmem>>, vector<8x32xf32>,
    %c2_i32_250 = arith.constant 2 : i32
    %c8_i32_251 = arith.constant 8 : i32
    %691 = arith.muli %c2_i32_250, %c8_i32_251 : i32
    %692 = tpu.assume_multiple %691, 8 : i32
    %c8_i32_252 = arith.constant 8 : i32
    %693 = arith.muli %c2_i32_250, %c8_i32_252 : i32
    %c0_i32_253 = arith.constant 0 : i32
    %694 = arith.addi %c0_i32_253, %693 : i32
    %695 = tpu.assume_multiple %694, 8 : i32
    %696 = arith.index_cast %692 : i32 to index
    %c0_254 = arith.constant 0 : index
    %697 = vector.load %arg25[%696, %c0_254] : memref<48x128xf32, #tpu.memory_space<vmem>>, vector<8x128xf32>
    %cst_255 = arith.constant dense<0.000000e+00> : vector<8x128xf32>
    %698 = tpu.matmul %688, %632, %cst_255 {dimension_numbers = #tpu.dot_dimension_numbers<[1], [0], [0], [1], [0, 0, 1, 1], [], []>} : vector<8x32xf32>, vector<32x128xf32>, vector<8x128xf32> -> vector<8x128xf32>
    %699 = arith.addf %697, %698 : vector<8x128xf32>
    %700 = arith.negf %699 : vector<8x128xf32>
    %701 = math.exp %700 : vector<8x128xf32>
    %cst_256 = arith.constant 1.000000e+00 : f32
    %702 = vector.broadcast %cst_256 : f32 to vector<8x128xf32>
    %703 = arith.addf %702, %701 : vector<8x128xf32>
    %704 = arith.divf %702, %703 : vector<8x128xf32>
    %705 = math.tanh %699 : vector<8x128xf32>
    %706 = vector.extract_strided_slice %704 {offsets = [0, 0], sizes = [8, 32], strides = [1, 1]} : vector<8x128xf32> to vector<8x32xf32>
    %707 = vector.extract_strided_slice %704 {offsets = [0, 32], sizes = [8, 32], strides = [1, 1]} : vector<8x128xf32> to vector<8x32xf32>
    %708 = vector.extract_strided_slice %705 {offsets = [0, 64], sizes = [8, 32], strides = [1, 1]} : vector<8x128xf32> to vector<8x32xf32>
    %709 = vector.extract_strided_slice %704 {offsets = [0, 96], sizes = [8, 32], strides = [1, 1]} : vector<8x128xf32> to vector<8x32xf32>
    %710 = arith.mulf %707, %686 : vector<8x32xf32>
    %711 = arith.mulf %706, %708 : vector<8x32xf32>
    %712 = arith.addf %710, %711 : vector<8x32xf32>
    %713 = math.tanh %712 : vector<8x32xf32>
    %714 = arith.mulf %709, %713 : vector<8x32xf32>
    %715 = arith.index_cast %695 : i32 to index
    %c0_257 = arith.constant 0 : index
    %716 = vector.load %arg24[%715, %c0_257] : memref<48x32xf32, #tpu.memory_space<vmem>>, vector<8x32xf32>
    tpu.vector_store %arg24[%715, %c0_257], %714 {strides = array<i32>} : memref<48x32xf32, #tpu.memory_space<vmem>>, vector<8x32xf32>,
    %c3_i32_258 = arith.constant 3 : i32
    %c8_i32_259 = arith.constant 8 : i32
    %717 = arith.muli %c3_i32_258, %c8_i32_259 : i32
    %718 = tpu.assume_multiple %717, 8 : i32
    %c8_i32_260 = arith.constant 8 : i32
    %719 = arith.muli %c3_i32_258, %c8_i32_260 : i32
    %c0_i32_261 = arith.constant 0 : i32
    %720 = arith.addi %c0_i32_261, %719 : i32
    %721 = tpu.assume_multiple %720, 8 : i32
    %722 = arith.index_cast %718 : i32 to index
    %c0_262 = arith.constant 0 : index
    %723 = vector.load %arg25[%722, %c0_262] : memref<48x128xf32, #tpu.memory_space<vmem>>, vector<8x128xf32>
    %cst_263 = arith.constant dense<0.000000e+00> : vector<8x128xf32>
    %724 = tpu.matmul %714, %632, %cst_263 {dimension_numbers = #tpu.dot_dimension_numbers<[1], [0], [0], [1], [0, 0, 1, 1], [], []>} : vector<8x32xf32>, vector<32x128xf32>, vector<8x128xf32> -> vector<8x128xf32>
    %725 = arith.addf %723, %724 : vector<8x128xf32>
    %726 = arith.negf %725 : vector<8x128xf32>
    %727 = math.exp %726 : vector<8x128xf32>
    %cst_264 = arith.constant 1.000000e+00 : f32
    %728 = vector.broadcast %cst_264 : f32 to vector<8x128xf32>
    %729 = arith.addf %728, %727 : vector<8x128xf32>
    %730 = arith.divf %728, %729 : vector<8x128xf32>
    %731 = math.tanh %725 : vector<8x128xf32>
    %732 = vector.extract_strided_slice %730 {offsets = [0, 0], sizes = [8, 32], strides = [1, 1]} : vector<8x128xf32> to vector<8x32xf32>
    %733 = vector.extract_strided_slice %730 {offsets = [0, 32], sizes = [8, 32], strides = [1, 1]} : vector<8x128xf32> to vector<8x32xf32>
    %734 = vector.extract_strided_slice %731 {offsets = [0, 64], sizes = [8, 32], strides = [1, 1]} : vector<8x128xf32> to vector<8x32xf32>
    %735 = vector.extract_strided_slice %730 {offsets = [0, 96], sizes = [8, 32], strides = [1, 1]} : vector<8x128xf32> to vector<8x32xf32>
    %736 = arith.mulf %733, %712 : vector<8x32xf32>
    %737 = arith.mulf %732, %734 : vector<8x32xf32>
    %738 = arith.addf %736, %737 : vector<8x32xf32>
    %739 = math.tanh %738 : vector<8x32xf32>
    %740 = arith.mulf %735, %739 : vector<8x32xf32>
    %741 = arith.index_cast %721 : i32 to index
    %c0_265 = arith.constant 0 : index
    %742 = vector.load %arg24[%741, %c0_265] : memref<48x32xf32, #tpu.memory_space<vmem>>, vector<8x32xf32>
    tpu.vector_store %arg24[%741, %c0_265], %740 {strides = array<i32>} : memref<48x32xf32, #tpu.memory_space<vmem>>, vector<8x32xf32>,
    %c4_i32_266 = arith.constant 4 : i32
    %c8_i32_267 = arith.constant 8 : i32
    %743 = arith.muli %c4_i32_266, %c8_i32_267 : i32
    %744 = tpu.assume_multiple %743, 8 : i32
    %c8_i32_268 = arith.constant 8 : i32
    %745 = arith.muli %c4_i32_266, %c8_i32_268 : i32
    %c0_i32_269 = arith.constant 0 : i32
    %746 = arith.addi %c0_i32_269, %745 : i32
    %747 = tpu.assume_multiple %746, 8 : i32
    %748 = arith.index_cast %744 : i32 to index
    %c0_270 = arith.constant 0 : index
    %749 = vector.load %arg25[%748, %c0_270] : memref<48x128xf32, #tpu.memory_space<vmem>>, vector<8x128xf32>
    %cst_271 = arith.constant dense<0.000000e+00> : vector<8x128xf32>
    %750 = tpu.matmul %740, %632, %cst_271 {dimension_numbers = #tpu.dot_dimension_numbers<[1], [0], [0], [1], [0, 0, 1, 1], [], []>} : vector<8x32xf32>, vector<32x128xf32>, vector<8x128xf32> -> vector<8x128xf32>
    %751 = arith.addf %749, %750 : vector<8x128xf32>
    %752 = arith.negf %751 : vector<8x128xf32>
    %753 = math.exp %752 : vector<8x128xf32>
    %cst_272 = arith.constant 1.000000e+00 : f32
    %754 = vector.broadcast %cst_272 : f32 to vector<8x128xf32>
    %755 = arith.addf %754, %753 : vector<8x128xf32>
    %756 = arith.divf %754, %755 : vector<8x128xf32>
    %757 = math.tanh %751 : vector<8x128xf32>
    %758 = vector.extract_strided_slice %756 {offsets = [0, 0], sizes = [8, 32], strides = [1, 1]} : vector<8x128xf32> to vector<8x32xf32>
    %759 = vector.extract_strided_slice %756 {offsets = [0, 32], sizes = [8, 32], strides = [1, 1]} : vector<8x128xf32> to vector<8x32xf32>
    %760 = vector.extract_strided_slice %757 {offsets = [0, 64], sizes = [8, 32], strides = [1, 1]} : vector<8x128xf32> to vector<8x32xf32>
    %761 = vector.extract_strided_slice %756 {offsets = [0, 96], sizes = [8, 32], strides = [1, 1]} : vector<8x128xf32> to vector<8x32xf32>
    %762 = arith.mulf %759, %738 : vector<8x32xf32>
    %763 = arith.mulf %758, %760 : vector<8x32xf32>
    %764 = arith.addf %762, %763 : vector<8x32xf32>
    %765 = math.tanh %764 : vector<8x32xf32>
    %766 = arith.mulf %761, %765 : vector<8x32xf32>
    %767 = arith.index_cast %747 : i32 to index
    %c0_273 = arith.constant 0 : index
    %768 = vector.load %arg24[%767, %c0_273] : memref<48x32xf32, #tpu.memory_space<vmem>>, vector<8x32xf32>
    tpu.vector_store %arg24[%767, %c0_273], %766 {strides = array<i32>} : memref<48x32xf32, #tpu.memory_space<vmem>>, vector<8x32xf32>,
    %c5_i32_274 = arith.constant 5 : i32
    %c0_275 = arith.constant 0 : index
    %c0_276 = arith.constant 0 : index
    %769 = vector.load %arg17[%c0_275, %c0_276] : memref<32x128xf32, #tpu.memory_space<vmem>>, vector<32x128xf32>
    %c0_277 = arith.constant 0 : index
    %c0_278 = arith.constant 0 : index
    %770 = vector.load %arg18[%c0_277, %c0_278] : memref<32x128xf32, #tpu.memory_space<vmem>>, vector<32x128xf32>
    %c0_279 = arith.constant 0 : index
    %c0_280 = arith.constant 0 : index
    %771 = vector.load %arg19[%c0_279, %c0_280] : memref<1x128xf32, #tpu.memory_space<vmem>>, vector<1x128xf32>
    %c0_281 = arith.constant 0 : index
    %c0_282 = arith.constant 0 : index
    %772 = vector.load %arg24[%c0_281, %c0_282] : memref<48x32xf32, #tpu.memory_space<vmem>>, vector<40x32xf32>
    %cst_283 = arith.constant dense<0.000000e+00> : vector<40x128xf32>
    %773 = tpu.matmul %772, %769, %cst_283 {dimension_numbers = #tpu.dot_dimension_numbers<[1], [0], [0], [1], [0, 0, 1, 1], [], []>} : vector<40x32xf32>, vector<32x128xf32>, vector<40x128xf32> -> vector<40x128xf32>
    %774 = vector.broadcast %771 : vector<1x128xf32> to vector<40x128xf32>
    %775 = arith.addf %773, %774 : vector<40x128xf32>
    %c0_284 = arith.constant 0 : index
    %c0_285 = arith.constant 0 : index
    %776 = vector.load %arg25[%c0_284, %c0_285] : memref<48x128xf32, #tpu.memory_space<vmem>>, vector<40x128xf32>
    tpu.vector_store %arg25[%c0_284, %c0_285], %775 {strides = array<i32>} : memref<48x128xf32, #tpu.memory_space<vmem>>, vector<40x128xf32>,
    %c0_i32_286 = arith.constant 0 : i32
    %c8_i32_287 = arith.constant 8 : i32
    %777 = arith.muli %c0_i32_286, %c8_i32_287 : i32
    %778 = tpu.assume_multiple %777, 8 : i32
    %c8_i32_288 = arith.constant 8 : i32
    %779 = arith.muli %c0_i32_286, %c8_i32_288 : i32
    %c0_i32_289 = arith.constant 0 : i32
    %780 = arith.addi %c0_i32_289, %779 : i32
    %781 = tpu.assume_multiple %780, 8 : i32
    %782 = arith.index_cast %778 : i32 to index
    %c0_290 = arith.constant 0 : index
    %783 = vector.load %arg25[%782, %c0_290] : memref<48x128xf32, #tpu.memory_space<vmem>>, vector<8x128xf32>
    %cst_291 = arith.constant dense<0.000000e+00> : vector<8x128xf32>
    %784 = tpu.matmul %490, %770, %cst_291 {dimension_numbers = #tpu.dot_dimension_numbers<[1], [0], [0], [1], [0, 0, 1, 1], [], []>} : vector<8x32xf32>, vector<32x128xf32>, vector<8x128xf32> -> vector<8x128xf32>
    %785 = arith.addf %783, %784 : vector<8x128xf32>
    %786 = arith.negf %785 : vector<8x128xf32>
    %787 = math.exp %786 : vector<8x128xf32>
    %cst_292 = arith.constant 1.000000e+00 : f32
    %788 = vector.broadcast %cst_292 : f32 to vector<8x128xf32>
    %789 = arith.addf %788, %787 : vector<8x128xf32>
    %790 = arith.divf %788, %789 : vector<8x128xf32>
    %791 = math.tanh %785 : vector<8x128xf32>
    %792 = vector.extract_strided_slice %790 {offsets = [0, 0], sizes = [8, 32], strides = [1, 1]} : vector<8x128xf32> to vector<8x32xf32>
    %793 = vector.extract_strided_slice %790 {offsets = [0, 32], sizes = [8, 32], strides = [1, 1]} : vector<8x128xf32> to vector<8x32xf32>
    %794 = vector.extract_strided_slice %791 {offsets = [0, 64], sizes = [8, 32], strides = [1, 1]} : vector<8x128xf32> to vector<8x32xf32>
    %795 = vector.extract_strided_slice %790 {offsets = [0, 96], sizes = [8, 32], strides = [1, 1]} : vector<8x128xf32> to vector<8x32xf32>
    %796 = arith.mulf %793, %488 : vector<8x32xf32>
    %797 = arith.mulf %792, %794 : vector<8x32xf32>
    %798 = arith.addf %796, %797 : vector<8x32xf32>
    %799 = math.tanh %798 : vector<8x32xf32>
    %800 = arith.mulf %795, %799 : vector<8x32xf32>
    %801 = arith.index_cast %781 : i32 to index
    %c0_293 = arith.constant 0 : index
    %802 = vector.load %arg23[%801, %c0_293] : memref<48x32xf32, #tpu.memory_space<vmem>>, vector<8x32xf32>
    tpu.vector_store %arg23[%801, %c0_293], %800 {strides = array<i32>} : memref<48x32xf32, #tpu.memory_space<vmem>>, vector<8x32xf32>,
    %c1_i32_294 = arith.constant 1 : i32
    %c8_i32_295 = arith.constant 8 : i32
    %803 = arith.muli %c1_i32_294, %c8_i32_295 : i32
    %804 = tpu.assume_multiple %803, 8 : i32
    %c8_i32_296 = arith.constant 8 : i32
    %805 = arith.muli %c1_i32_294, %c8_i32_296 : i32
    %c0_i32_297 = arith.constant 0 : i32
    %806 = arith.addi %c0_i32_297, %805 : i32
    %807 = tpu.assume_multiple %806, 8 : i32
    %808 = arith.index_cast %804 : i32 to index
    %c0_298 = arith.constant 0 : index
    %809 = vector.load %arg25[%808, %c0_298] : memref<48x128xf32, #tpu.memory_space<vmem>>, vector<8x128xf32>
    %cst_299 = arith.constant dense<0.000000e+00> : vector<8x128xf32>
    %810 = tpu.matmul %800, %770, %cst_299 {dimension_numbers = #tpu.dot_dimension_numbers<[1], [0], [0], [1], [0, 0, 1, 1], [], []>} : vector<8x32xf32>, vector<32x128xf32>, vector<8x128xf32> -> vector<8x128xf32>
    %811 = arith.addf %809, %810 : vector<8x128xf32>
    %812 = arith.negf %811 : vector<8x128xf32>
    %813 = math.exp %812 : vector<8x128xf32>
    %cst_300 = arith.constant 1.000000e+00 : f32
    %814 = vector.broadcast %cst_300 : f32 to vector<8x128xf32>
    %815 = arith.addf %814, %813 : vector<8x128xf32>
    %816 = arith.divf %814, %815 : vector<8x128xf32>
    %817 = math.tanh %811 : vector<8x128xf32>
    %818 = vector.extract_strided_slice %816 {offsets = [0, 0], sizes = [8, 32], strides = [1, 1]} : vector<8x128xf32> to vector<8x32xf32>
    %819 = vector.extract_strided_slice %816 {offsets = [0, 32], sizes = [8, 32], strides = [1, 1]} : vector<8x128xf32> to vector<8x32xf32>
    %820 = vector.extract_strided_slice %817 {offsets = [0, 64], sizes = [8, 32], strides = [1, 1]} : vector<8x128xf32> to vector<8x32xf32>
    %821 = vector.extract_strided_slice %816 {offsets = [0, 96], sizes = [8, 32], strides = [1, 1]} : vector<8x128xf32> to vector<8x32xf32>
    %822 = arith.mulf %819, %798 : vector<8x32xf32>
    %823 = arith.mulf %818, %820 : vector<8x32xf32>
    %824 = arith.addf %822, %823 : vector<8x32xf32>
    %825 = math.tanh %824 : vector<8x32xf32>
    %826 = arith.mulf %821, %825 : vector<8x32xf32>
    %827 = arith.index_cast %807 : i32 to index
    %c0_301 = arith.constant 0 : index
    %828 = vector.load %arg23[%827, %c0_301] : memref<48x32xf32, #tpu.memory_space<vmem>>, vector<8x32xf32>
    tpu.vector_store %arg23[%827, %c0_301], %826 {strides = array<i32>} : memref<48x32xf32, #tpu.memory_space<vmem>>, vector<8x32xf32>,
    %c2_i32_302 = arith.constant 2 : i32
    %c8_i32_303 = arith.constant 8 : i32
    %829 = arith.muli %c2_i32_302, %c8_i32_303 : i32
    %830 = tpu.assume_multiple %829, 8 : i32
    %c8_i32_304 = arith.constant 8 : i32
    %831 = arith.muli %c2_i32_302, %c8_i32_304 : i32
    %c0_i32_305 = arith.constant 0 : i32
    %832 = arith.addi %c0_i32_305, %831 : i32
    %833 = tpu.assume_multiple %832, 8 : i32
    %834 = arith.index_cast %830 : i32 to index
    %c0_306 = arith.constant 0 : index
    %835 = vector.load %arg25[%834, %c0_306] : memref<48x128xf32, #tpu.memory_space<vmem>>, vector<8x128xf32>
    %cst_307 = arith.constant dense<0.000000e+00> : vector<8x128xf32>
    %836 = tpu.matmul %826, %770, %cst_307 {dimension_numbers = #tpu.dot_dimension_numbers<[1], [0], [0], [1], [0, 0, 1, 1], [], []>} : vector<8x32xf32>, vector<32x128xf32>, vector<8x128xf32> -> vector<8x128xf32>
    %837 = arith.addf %835, %836 : vector<8x128xf32>
    %838 = arith.negf %837 : vector<8x128xf32>
    %839 = math.exp %838 : vector<8x128xf32>
    %cst_308 = arith.constant 1.000000e+00 : f32
    %840 = vector.broadcast %cst_308 : f32 to vector<8x128xf32>
    %841 = arith.addf %840, %839 : vector<8x128xf32>
    %842 = arith.divf %840, %841 : vector<8x128xf32>
    %843 = math.tanh %837 : vector<8x128xf32>
    %844 = vector.extract_strided_slice %842 {offsets = [0, 0], sizes = [8, 32], strides = [1, 1]} : vector<8x128xf32> to vector<8x32xf32>
    %845 = vector.extract_strided_slice %842 {offsets = [0, 32], sizes = [8, 32], strides = [1, 1]} : vector<8x128xf32> to vector<8x32xf32>
    %846 = vector.extract_strided_slice %843 {offsets = [0, 64], sizes = [8, 32], strides = [1, 1]} : vector<8x128xf32> to vector<8x32xf32>
    %847 = vector.extract_strided_slice %842 {offsets = [0, 96], sizes = [8, 32], strides = [1, 1]} : vector<8x128xf32> to vector<8x32xf32>
    %848 = arith.mulf %845, %824 : vector<8x32xf32>
    %849 = arith.mulf %844, %846 : vector<8x32xf32>
    %850 = arith.addf %848, %849 : vector<8x32xf32>
    %851 = math.tanh %850 : vector<8x32xf32>
    %852 = arith.mulf %847, %851 : vector<8x32xf32>
    %853 = arith.index_cast %833 : i32 to index
    %c0_309 = arith.constant 0 : index
    %854 = vector.load %arg23[%853, %c0_309] : memref<48x32xf32, #tpu.memory_space<vmem>>, vector<8x32xf32>
    tpu.vector_store %arg23[%853, %c0_309], %852 {strides = array<i32>} : memref<48x32xf32, #tpu.memory_space<vmem>>, vector<8x32xf32>,
    %c3_i32_310 = arith.constant 3 : i32
    %c8_i32_311 = arith.constant 8 : i32
    %855 = arith.muli %c3_i32_310, %c8_i32_311 : i32
    %856 = tpu.assume_multiple %855, 8 : i32
    %c8_i32_312 = arith.constant 8 : i32
    %857 = arith.muli %c3_i32_310, %c8_i32_312 : i32
    %c0_i32_313 = arith.constant 0 : i32
    %858 = arith.addi %c0_i32_313, %857 : i32
    %859 = tpu.assume_multiple %858, 8 : i32
    %860 = arith.index_cast %856 : i32 to index
    %c0_314 = arith.constant 0 : index
    %861 = vector.load %arg25[%860, %c0_314] : memref<48x128xf32, #tpu.memory_space<vmem>>, vector<8x128xf32>
    %cst_315 = arith.constant dense<0.000000e+00> : vector<8x128xf32>
    %862 = tpu.matmul %852, %770, %cst_315 {dimension_numbers = #tpu.dot_dimension_numbers<[1], [0], [0], [1], [0, 0, 1, 1], [], []>} : vector<8x32xf32>, vector<32x128xf32>, vector<8x128xf32> -> vector<8x128xf32>
    %863 = arith.addf %861, %862 : vector<8x128xf32>
    %864 = arith.negf %863 : vector<8x128xf32>
    %865 = math.exp %864 : vector<8x128xf32>
    %cst_316 = arith.constant 1.000000e+00 : f32
    %866 = vector.broadcast %cst_316 : f32 to vector<8x128xf32>
    %867 = arith.addf %866, %865 : vector<8x128xf32>
    %868 = arith.divf %866, %867 : vector<8x128xf32>
    %869 = math.tanh %863 : vector<8x128xf32>
    %870 = vector.extract_strided_slice %868 {offsets = [0, 0], sizes = [8, 32], strides = [1, 1]} : vector<8x128xf32> to vector<8x32xf32>
    %871 = vector.extract_strided_slice %868 {offsets = [0, 32], sizes = [8, 32], strides = [1, 1]} : vector<8x128xf32> to vector<8x32xf32>
    %872 = vector.extract_strided_slice %869 {offsets = [0, 64], sizes = [8, 32], strides = [1, 1]} : vector<8x128xf32> to vector<8x32xf32>
    %873 = vector.extract_strided_slice %868 {offsets = [0, 96], sizes = [8, 32], strides = [1, 1]} : vector<8x128xf32> to vector<8x32xf32>
    %874 = arith.mulf %871, %850 : vector<8x32xf32>
    %875 = arith.mulf %870, %872 : vector<8x32xf32>
    %876 = arith.addf %874, %875 : vector<8x32xf32>
    %877 = math.tanh %876 : vector<8x32xf32>
    %878 = arith.mulf %873, %877 : vector<8x32xf32>
    %879 = arith.index_cast %859 : i32 to index
    %c0_317 = arith.constant 0 : index
    %880 = vector.load %arg23[%879, %c0_317] : memref<48x32xf32, #tpu.memory_space<vmem>>, vector<8x32xf32>
    tpu.vector_store %arg23[%879, %c0_317], %878 {strides = array<i32>} : memref<48x32xf32, #tpu.memory_space<vmem>>, vector<8x32xf32>,
    %c4_i32_318 = arith.constant 4 : i32
    %c8_i32_319 = arith.constant 8 : i32
    %881 = arith.muli %c4_i32_318, %c8_i32_319 : i32
    %882 = tpu.assume_multiple %881, 8 : i32
    %c8_i32_320 = arith.constant 8 : i32
    %883 = arith.muli %c4_i32_318, %c8_i32_320 : i32
    %c0_i32_321 = arith.constant 0 : i32
    %884 = arith.addi %c0_i32_321, %883 : i32
    %885 = tpu.assume_multiple %884, 8 : i32
    %886 = arith.index_cast %882 : i32 to index
    %c0_322 = arith.constant 0 : index
    %887 = vector.load %arg25[%886, %c0_322] : memref<48x128xf32, #tpu.memory_space<vmem>>, vector<8x128xf32>
    %cst_323 = arith.constant dense<0.000000e+00> : vector<8x128xf32>
    %888 = tpu.matmul %878, %770, %cst_323 {dimension_numbers = #tpu.dot_dimension_numbers<[1], [0], [0], [1], [0, 0, 1, 1], [], []>} : vector<8x32xf32>, vector<32x128xf32>, vector<8x128xf32> -> vector<8x128xf32>
    %889 = arith.addf %887, %888 : vector<8x128xf32>
    %890 = arith.negf %889 : vector<8x128xf32>
    %891 = math.exp %890 : vector<8x128xf32>
    %cst_324 = arith.constant 1.000000e+00 : f32
    %892 = vector.broadcast %cst_324 : f32 to vector<8x128xf32>
    %893 = arith.addf %892, %891 : vector<8x128xf32>
    %894 = arith.divf %892, %893 : vector<8x128xf32>
    %895 = math.tanh %889 : vector<8x128xf32>
    %896 = vector.extract_strided_slice %894 {offsets = [0, 0], sizes = [8, 32], strides = [1, 1]} : vector<8x128xf32> to vector<8x32xf32>
    %897 = vector.extract_strided_slice %894 {offsets = [0, 32], sizes = [8, 32], strides = [1, 1]} : vector<8x128xf32> to vector<8x32xf32>
    %898 = vector.extract_strided_slice %895 {offsets = [0, 64], sizes = [8, 32], strides = [1, 1]} : vector<8x128xf32> to vector<8x32xf32>
    %899 = vector.extract_strided_slice %894 {offsets = [0, 96], sizes = [8, 32], strides = [1, 1]} : vector<8x128xf32> to vector<8x32xf32>
    %900 = arith.mulf %897, %876 : vector<8x32xf32>
    %901 = arith.mulf %896, %898 : vector<8x32xf32>
    %902 = arith.addf %900, %901 : vector<8x32xf32>
    %903 = math.tanh %902 : vector<8x32xf32>
    %904 = arith.mulf %899, %903 : vector<8x32xf32>
    %905 = arith.index_cast %885 : i32 to index
    %c0_325 = arith.constant 0 : index
    %906 = vector.load %arg23[%905, %c0_325] : memref<48x32xf32, #tpu.memory_space<vmem>>, vector<8x32xf32>
    tpu.vector_store %arg23[%905, %c0_325], %904 {strides = array<i32>} : memref<48x32xf32, #tpu.memory_space<vmem>>, vector<8x32xf32>,
    %c5_i32_326 = arith.constant 5 : i32
    %c0_327 = arith.constant 0 : index
    %c0_328 = arith.constant 0 : index
    %907 = vector.load %arg23[%c0_327, %c0_328] : memref<48x32xf32, #tpu.memory_space<vmem>>, vector<40x32xf32>
    %c0_329 = arith.constant 0 : index
    %c0_330 = arith.constant 0 : index
    %908 = vector.load %arg20[%c0_329, %c0_330] : memref<32x128xf32, #tpu.memory_space<vmem>>, vector<32x128xf32>
    %cst_331 = arith.constant dense<0.000000e+00> : vector<40x128xf32>
    %909 = tpu.matmul %907, %908, %cst_331 {dimension_numbers = #tpu.dot_dimension_numbers<[1], [0], [0], [1], [0, 0, 1, 1], [], []>} : vector<40x32xf32>, vector<32x128xf32>, vector<40x128xf32> -> vector<40x128xf32>
    %c0_332 = arith.constant 0 : index
    %c0_333 = arith.constant 0 : index
    %910 = vector.load %arg21[%c0_332, %c0_333] : memref<1x128xf32, #tpu.memory_space<vmem>>, vector<1x128xf32>
    %911 = vector.broadcast %910 : vector<1x128xf32> to vector<40x128xf32>
    %912 = arith.addf %909, %911 : vector<40x128xf32>
    %c0_334 = arith.constant 0 : index
    %c0_335 = arith.constant 0 : index
    %913 = vector.load %arg22[%c0_334, %c0_335] : memref<40x128xf32, #tpu.memory_space<vmem>>, vector<40x128xf32>
    tpu.vector_store %arg22[%c0_334, %c0_335], %912 {strides = array<i32>} : memref<40x128xf32, #tpu.memory_space<vmem>>, vector<40x128xf32>,
    return
  }
}

</mosaic_0001>

<bundles_post_ra>
// kernel: seq2seq_forward.1
= control target key start
LH: loop header
LB: loop body
LE: loop exit
PB: predicated region body
PF: predicated region fallthrough
CT: control target
= control target key end

     0   :  { %s7035_s0 = inlined_call_operand.vmem [shape: f32[48,8], index: 0, kind: input, shape index: {}]   ;;  %s7036_s1 = inlined_call_operand.vmem [shape: f32[40,4], index: 1, kind: input, shape index: {}]   ;;  %s7037_s2 = inlined_call_operand.hbm [shape: f32[8,128], index: 2, kind: input, shape index: {}]   ;;  %s7038_s3 = inlined_call_operand.vmem [shape: f32[32,128], index: 3, kind: input, shape index: {}]   ;;  %s7039_s4 = inlined_call_operand.hbm [shape: f32[1,128], index: 4, kind: input, shape index: {}]   ;;  %s7040_s5 = inlined_call_operand.vmem [shape: f32[32,128], index: 5, kind: input, shape index: {}]   ;;  %s7041_s6 = inlined_call_operand.vmem [shape: f32[32,128], index: 6, kind: input, shape index: {}]   ;;  %s7042_s7 = inlined_call_operand.hbm [shape: f32[1,128], index: 7, kind: input, shape index: {}]   ;;  %s7043_s8 = inlined_call_operand.vmem [shape: f32[32,128], index: 8, kind: input, shape index: {}]   ;;  %s7044_s9 = inlined_call_operand.vmem [shape: f32[32,128], index: 9, kind: input, shape index: {}]   ;;  %s7045_s10 = inlined_call_operand.hbm [shape: f32[1,128], index: 10, kind: input, shape index: {}]   ;;  %s7046_s11 = inlined_call_operand.hbm [shape: f32[4,128], index: 11, kind: input, shape index: {}]   ;;  %s7047_s12 = inlined_call_operand.vmem [shape: f32[32,128], index: 12, kind: input, shape index: {}]   ;;  %s7048_s13 = inlined_call_operand.hbm [shape: f32[1,128], index: 13, kind: input, shape index: {}]   ;;  %s7049_s14 = inlined_call_operand.vmem [shape: f32[32,128], index: 14, kind: input, shape index: {}]   ;;  %s7050_s15 = inlined_call_operand.hbm [shape: f32[32,128], index: 15, kind: input, shape index: {}]   ;;  %s7051_s16 = inlined_call_operand.hbm [shape: f32[1,128], index: 16, kind: input, shape index: {}]   ;;  %s7052_s17 = inlined_call_operand.hbm [shape: f32[32,128], index: 17, kind: input, shape index: {}]   ;;  %s7053_s18 = inlined_call_operand.vmem [shape: f32[32,128], index: 18, kind: input, shape index: {}]   ;;  %s7054_s19 = inlined_call_operand.hbm [shape: f32[1,128], index: 19, kind: input, shape index: {}]   ;;  %s7055_s20 = inlined_call_operand.vmem [shape: f32[32,128], index: 20, kind: input, shape index: {}]   ;;  %s7056_s21 = inlined_call_operand.vmem [shape: f32[1,128], index: 21, kind: input, shape index: {}]   ;;  %s7057_s22 = inlined_call_operand.vmem [shape: f32[40,128], index: 22, kind: output, shape index: {}]  }
   0x1   :  { %7063 = sst [smem:[#allocation27_spill]] %s7035_s0 }
   0x2   :  { %7064 = sst [smem:[#allocation28_spill]] %s7036_s1 }
   0x3   :  { %7065 = sst [smem:[#allocation29_spill]] %s7037_s2 }
   0x4   :  { %7066 = sst [smem:[#allocation30_spill]] %s7038_s3 }
   0x5   :  { %7067 = sst [smem:[#allocation31_spill]] %s7039_s4 }
   0x6   :  { %7068 = sst [smem:[#allocation32_spill]] %s7040_s5 }
   0x7   :  { %7069 = sst [smem:[#allocation33_spill]] %s7041_s6 }
   0x8   :  { %27 = vsyncpa [#allocation6], 0 }
   0x9   :  { %28 = vsyncpa [#allocation8], 0 }
   0xa   :  { %29 = vsyncpa [#allocation11], 0 }
   0xb   :  { %30 = vsyncpa [#allocation14], 0 }
   0xc   :  { %31 = vsyncpa [#allocation17], 0 }
   0xd   :  { %32 = vsyncpa [#allocation20], 0  ;;  %s5871_s3 = smov [#allocation7]   ;;  %s5872_s29 = smov [#allocation10]  }
   0xe   :  { %s55_s28 = sshll.u32 %s5871_s3, 4  ;;  %s83_s30 = sshll.u32 %s5872_s29, 4  ;;  %s56_s28 = int_to_ptr.vmem [resolvable:$true] %s55_s28  ;;  %s84_s30 = int_to_ptr.vmem [resolvable:$true] %s83_s30 }
   0xf   :  { %s5667_s4 = scalar_lea.vmem %s56_s28, 16  ;;  %s5671_s0 = scalar_lea.vmem %s56_s28, 32 }
  0x10   :  { %p5668_p0 = scmp.ne.s32.totalorder %s56_s28, %s5667_s4  ;;  %p5672_p1 = scmp.lt.s32.totalorder %s56_s28, %s56_s28 }
  0x11   :  { %p5673_p2 = scmp.lt.s32.totalorder %s5671_s0, %s5667_s4 }
  0x13   :  { %p5674_p3 = por %p5673_p2, %p5672_p1 }
  0x15   :  { %p5675_p4 = pnand %p5674_p3, %p5668_p0 }
  0x17   :  { %5678 = shalt.err (!%p5675_p4)
}
  0x18   :  { %s7070_s5 = sld [smem:[#allocation31_spill]]  ;;  %s5687_s24 = scalar_lea.vmem %s84_s30, 16 }
  0x19   :  { %p5688_p5 = scmp.ne.s32.totalorder %s84_s30, %s5687_s24  ;;  %s5691_s6 = scalar_lea.vmem %s84_s30, 32 }
  0x1a   :  { %p5692_p6 = scmp.lt.s32.totalorder %s84_s30, %s84_s30  ;;  %p5693_p7 = scmp.lt.s32.totalorder %s5691_s6, %s5687_s24 }
  0x1c   :  { %p5694_p8 = por %p5693_p7, %p5692_p6 }
  0x1e   :  { %58 = dma.hbm_to_vmem [thread:$0]  %s7070_s5, 16, %s56_s28, [#allocation8]  }
  0x1f   :  { %p5695_p9 = pnand %p5694_p8, %p5688_p5 }
  0x21   :  { %5698 = shalt.err (!%p5695_p9)
}
  0x22   :  { %86 = dma.hbm_to_vmem [thread:$0]  %s7045_s10, 16, %s84_s30, [#allocation11]  }
  0x23   :  { %s5873_s2 = smov [#allocation13]   ;;  %s5874_s3 = smov [#allocation16]  }
  0x24   :  { %s105_s27 = sshll.u32 %s5873_s2, 4  ;;  %s129_s29 = sshll.u32 %s5874_s3, 4  ;;  %s106_s27 = int_to_ptr.vmem [resolvable:$true] %s105_s27  ;;  %s130_s29 = int_to_ptr.vmem [resolvable:$true] %s129_s29 }
  0x25   :  { %s5707_s4 = scalar_lea.vmem %s106_s27, 16  ;;  %s5711_s28 = scalar_lea.vmem %s106_s27, 32 }
  0x26   :  { %p5708_p10 = scmp.ne.s32.totalorder %s106_s27, %s5707_s4  ;;  %p5712_p11 = scmp.lt.s32.totalorder %s106_s27, %s106_s27 }
  0x27   :  { %p5713_p12 = scmp.lt.s32.totalorder %s5711_s28, %s5707_s4 }
  0x29   :  { %p5714_p13 = por %p5713_p12, %p5712_p11 }
  0x2b   :  { %p5715_p0 = pnand %p5714_p13, %p5708_p10 }
  0x2d   :  { %5718 = shalt.err (!%p5715_p0)
}
  0x2e   :  { %108 = dma.hbm_to_vmem [thread:$0]  %s7048_s13, 16, %s106_s27, [#allocation14]  }
  0x2f   :  { %s5727_s1 = scalar_lea.vmem %s130_s29, 16  ;;  %s5731_s10 = scalar_lea.vmem %s130_s29, 32 }
  0x30   :  { %p5728_p1 = scmp.ne.s32.totalorder %s130_s29, %s5727_s1  ;;  %p5732_p2 = scmp.lt.s32.totalorder %s130_s29, %s130_s29 }
  0x31   :  { %p5733_p3 = scmp.lt.s32.totalorder %s5731_s10, %s5727_s1 }
  0x33   :  { %p5734_p4 = por %p5733_p3, %p5732_p2 }
  0x35   :  { %p5735_p5 = pnand %p5734_p4, %p5728_p1 }
  0x37   :  { %5738 = shalt.err (!%p5735_p5)
}
  0x38   :  { %132 = dma.hbm_to_vmem [thread:$0]  %s7051_s16, 16, %s130_s29, [#allocation17]  }
  0x39   :  { %s5875_s24 = smov [#allocation5]   ;;  %s5876_s25 = smov [#allocation9]  }
  0x3a   :  { %s43_s6 = sshll.u32 %s5875_s24, 4  ;;  %s69_s26 = sshll.u32 %s5876_s25, 4  ;;  %s44_s6 = int_to_ptr.vmem [resolvable:$true] %s43_s6  ;;  %s70_s26 = int_to_ptr.vmem [resolvable:$true] %s69_s26 }
  0x3b   :  { %s5747_s2 = scalar_lea.vmem %s44_s6, 128  ;;  %p5752_p7 = scmp.lt.s32.totalorder %s44_s6, %s44_s6 }
  0x3c   :  { %p5748_p6 = scmp.ne.s32.totalorder %s44_s6, %s5747_s2  ;;  %p5753_p8 = scmp.lt.s32.totalorder %s5747_s2, %s5747_s2 }
  0x3e   :  { %p5754_p9 = por %p5753_p8, %p5752_p7 }
  0x40   :  { %p5755_p10 = pnand %p5754_p9, %p5748_p6 }
  0x42   :  { %5758 = shalt.err (!%p5755_p10)
}
  0x43   :  { %s7071_s3 = sld [smem:[#allocation29_spill]]  ;;  %s5767_s4 = scalar_lea.vmem %s70_s26, 16 }
  0x44   :  { %p5768_p11 = scmp.ne.s32.totalorder %s70_s26, %s5767_s4  ;;  %s5771_s16 = scalar_lea.vmem %s70_s26, 32 }
  0x45   :  { %p5772_p12 = scmp.lt.s32.totalorder %s70_s26, %s70_s26  ;;  %p5773_p13 = scmp.lt.s32.totalorder %s5771_s16, %s5767_s4 }
  0x47   :  { %p5774_p0 = por %p5773_p13, %p5772_p12 }
  0x49   :  { %46 = dma.hbm_to_vmem [thread:$0]  %s7071_s3, 128, %s44_s6, [#allocation6]  }
  0x4a   :  { %p5775_p1 = pnand %p5774_p0, %p5768_p11 }
  0x4c   :  { %5778 = shalt.err (!%p5775_p1)
}
  0x4d   :  { %72 = dma.hbm_to_vmem [thread:$0]  %s7042_s7, 16, %s70_s26, [#allocation8]  }
  0x4e   :  { %s5877_s0 = smov [#allocation12]   ;;  %s5878_s1 = smov [#allocation15]  }
  0x4f   :  { %s93_s23 = sshll.u32 %s5877_s0, 4  ;;  %s116_s10 = sshll.u32 %s5878_s1, 4  ;;  %s94_s23 = int_to_ptr.vmem [resolvable:$true] %s93_s23  ;;  %s117_s10 = int_to_ptr.vmem [resolvable:$true] %s116_s10 }
  0x50   :  { %s5787_s30 = scalar_lea.vmem %s94_s23, 64  ;;  %p5792_p3 = scmp.lt.s32.totalorder %s94_s23, %s94_s23 }
  0x51   :  { %p5788_p2 = scmp.ne.s32.totalorder %s94_s23, %s5787_s30  ;;  %p5793_p4 = scmp.lt.s32.totalorder %s5787_s30, %s5787_s30 }
  0x53   :  { %p5794_p5 = por %p5793_p4, %p5792_p3 }
  0x55   :  { %p5795_p6 = pnand %p5794_p5, %p5788_p2 }
  0x57   :  { %5798 = shalt.err (!%p5795_p6)
}
  0x58   :  { %96 = dma.hbm_to_vmem [thread:$0]  %s7046_s11, 64, %s94_s23, [#allocation11]  }
  0x59   :  { %s5807_s6 = scalar_lea.vmem %s117_s10, 512  ;;  %p5812_p8 = scmp.lt.s32.totalorder %s117_s10, %s117_s10 }
  0x5a   :  { %p5808_p7 = scmp.ne.s32.totalorder %s117_s10, %s5807_s6  ;;  %p5813_p9 = scmp.lt.s32.totalorder %s5807_s6, %s5807_s6 }
  0x5c   :  { %p5814_p10 = por %p5813_p9, %p5812_p8 }
  0x5e   :  { %p5815_p11 = pnand %p5814_p10, %p5808_p7 }
  0x60   :  { %5818 = shalt.err (!%p5815_p11)
}
  0x61   :  { %s5879_s7 = smov 128   ;;  %s5880_s25 = smov 8  }
  0x62   :  { %122 = dma.hbm_to_vmem [thread:$0]  %s7050_s15, 512, %s117_s10, [#allocation14], %s5879_s7, %s5879_s7, %s5880_s25  }
  0x63   :  { %s5881_s13 = smov [#allocation18]   ;;  %s5882_s3 = smov [#allocation19]  }
  0x64   :  { %s138_s27 = sshll.u32 %s5881_s13, 4  ;;  %s153_s4 = sshll.u32 %s5882_s3, 4  ;;  %s139_s27 = int_to_ptr.vmem [resolvable:$true] %s138_s27  ;;  %s154_s4 = int_to_ptr.vmem [resolvable:$true] %s153_s4 }
  0x65   :  { %s5827_s11 = scalar_lea.vmem %s139_s27, 512  ;;  %p5832_p13 = scmp.lt.s32.totalorder %s139_s27, %s139_s27 }
  0x66   :  { %p5828_p12 = scmp.ne.s32.totalorder %s139_s27, %s5827_s11  ;;  %p5833_p0 = scmp.lt.s32.totalorder %s5827_s11, %s5827_s11 }
  0x68   :  { %p5834_p1 = por %p5833_p0, %p5832_p13 }
  0x6a   :  { %p5835_p2 = pnand %p5834_p1, %p5828_p12 }
  0x6c   :  { %5838 = shalt.err (!%p5835_p2)
}
  0x6d   :  { %144 = dma.hbm_to_vmem [thread:$0]  %s7052_s17, 512, %s139_s27, [#allocation17], %s5879_s7, %s5879_s7, %s5880_s25  }
  0x6e   :  { %s5847_s28 = scalar_lea.vmem %s154_s4, 16  ;;  %s5851_s15 = scalar_lea.vmem %s154_s4, 32 }
  0x6f   :  { %p5848_p3 = scmp.ne.s32.totalorder %s154_s4, %s5847_s28  ;;  %p5852_p4 = scmp.lt.s32.totalorder %s154_s4, %s154_s4 }
  0x70   :  { %p5853_p5 = scmp.lt.s32.totalorder %s5851_s15, %s5847_s28 }
  0x72   :  { %p5854_p6 = por %p5853_p5, %p5852_p4 }
  0x74   :  { %p5855_p7 = pnand %p5854_p6, %p5848_p3 }
  0x76   :  { %5858 = shalt.err (!%p5855_p7)
}
  0x77   :  { %156 = dma.hbm_to_vmem [thread:$0]  %s7054_s19, 16, %s154_s4, [#allocation20]  }
  0x78   :  { %5859 = dma.done.wait [#allocation6], 128  }
  0x79   :  { %5860 = vsyncadd [#allocation6], 4294967168 }
  0x7a   :  { %5861 = dma.done.wait [#allocation8], 32  }
  0x7b   :  { %5862 = vsyncadd [#allocation8], 4294967264 }
  0x7c   :  { %5863 = dma.done.wait [#allocation11], 80  }
  0x7d   :  { %5864 = vsyncadd [#allocation11], 4294967216 }
  0x7e   :  { %5865 = dma.done.wait [#allocation14], 528  }
  0x7f   :  { %5866 = vsyncadd [#allocation14], 4294966768 }
  0x80   :  { %5867 = dma.done.wait [#allocation17], 528  }
  0x81   :  { %5868 = vsyncadd [#allocation17], 4294966768 }
  0x82   :  { %5869 = dma.done.wait [#allocation20], 16  }
  0x83   :  { %5870 = vsyncadd [#allocation20], 4294967280  ;;  %v5883_v0 = vmov 0.0   ;;  %vm5884_vm0 = vmmov 0   ;;  %vm209_vm1 = vcmask 64512   ;;  %v191_v1 = vld [vmem:[#allocation5] sm:$0xff] }
  0x84   :  { %4894 = vmatprep.subr.mxu1 %v5883_v0  ;;  %4902 = vmatprep.mubr.msk.f32.mxu1 %vm5884_vm0, %v5883_v0  ;;  %s7072_s1 = sld [smem:[#allocation30_spill]]  ;;  %v6091_v9 = vld [vmem:[#allocation7] ss:$0 sm:$0xff]  ;;  %s5885_s3 = smov 64   ;;  %vm330_vm2 = vcmask 261120   ;;  %vm2509_vm3 = vcmask 1043456  }
  0x85   :  { %s7073_s5 = sld [smem:[#allocation27_spill]]  ;;  %4883 = vmatprep.subr.mxu0 %v191_v1  ;;  %s5886_s4 = smov 32   ;;  %vm2493_vm4 = vcmask 31744  }
  0x86   :  { %4884 = vmatpush3.msra.mxu0 %v191_v1  ;;  %s7074_s10 = sld [smem:[#allocation32_spill]] }
  0x87   :  { %4905 = vmatprep.subr.mxu0 %v5883_v0  ;;  %s7075_s13 = sld [smem:[#allocation33_spill]] }
  0x88   :  { %s7076_s11 = sld [smem:[#allocation28_spill]] }
  0x8a   :  { %v6038_v2 = vld [vmem:[%s7072_s1 + $0x18] sm:$0xff]  ;;  %v6050_v5 = vld [vmem:[%s7072_s1 + $0x10] sm:$0xff]  ;;  %v6058_v6 = vld [vmem:[%s7072_s1 + $0x8] sm:$0xff] }
  0x8b   :  { %v197_v3 = vld [vmem:[%s7073_s5] sm:$0xff]  ;;  %4895 = vmatpush3.msra.mxu1 %v6038_v2  ;;  %v198_v4 = vld [vmem:[%s7073_s5 + $0x8] sm:$0xff]  ;;  %v199_v25 = vld [vmem:[%s7073_s5 + $0x10] sm:$0xff] }
  0x8c   :  { %4885 = vmatprep.mubr.msk.f32.mxu0 %vm209_vm1, %v197_v3  ;;  %4896 = vmatprep.subr.mxu1 %v5883_v0  ;;  %v6066_v7 = vld [vmem:[%s7072_s1] sm:$0xff]  ;;  %v200_v26 = vld [vmem:[%s7073_s5 + $0x18] sm:$0xff]  ;;  %v202_v28 = vld [vmem:[%s7073_s5 + $0x28] sm:$0xff] }
  0x8d   :  { %4886 = vmatmul.mubr.msk.f32.vlgmr.msra.gmra.mxu0 %vm209_vm1, %v198_v4  ;;  %4897 = vmatpush3.msra.mxu1 %v6050_v5  ;;  %v201_v27 = vld [vmem:[%s7073_s5 + $0x20] sm:$0xff] }
  0x8e   :  { %4898 = vmatprep.subr.mxu1 %v5883_v0  ;;  %4906 = vmatpush3.msra.mxu0 %v6038_v2 }
  0x8f   :  { %4899 = vmatpush3.msra.mxu1 %v6058_v6  ;;  %4907 = vmatprep.subr.mxu0 %v5883_v0 }
  0x90   :  { %4900 = vmatprep.subr.mxu1 %v5883_v0  ;;  %4908 = vmatpush3.msra.mxu0 %v6050_v5 }
  0x91   :  { %4901 = vmatpush3.msra.mxu1 %v6066_v7  ;;  %4909 = vmatprep.subr.mxu0 %v5883_v0 }
  0x92   :  { %4903 = vmatmul.mubr.f32.vlgmr.msra.gmra.mxu1 %v5883_v0  ;;  %4910 = vmatpush3.msra.mxu0 %v6058_v6 }
  0x93   :  { %4911 = vmatprep.subr.mxu0 %v5883_v0  ;;  %4916 = vmatprep.subr.mxu1 %v5883_v0 }
  0x94   :  { %4912 = vmatpush3.msra.mxu0 %v6066_v7  ;;  %4917 = vmatpush3.msra.mxu1 %v6038_v2 }
  0x95   :  { %4918 = vmatprep.subr.mxu1 %v5883_v0  ;;  %4924 = vmatprep.mubr.msk.f32.mxu1 %vm5884_vm0, %v5883_v0 }
  0x96   :  { %4919 = vmatpush3.msra.mxu1 %v6050_v5  ;;  %4927 = vmatprep.subr.mxu0 %v5883_v0 }
  0x97   :  { %4920 = vmatprep.subr.mxu1 %v5883_v0  ;;  %4888 = vmatprep.mubr.msk.f32.mxu0 %vm209_vm1, %v199_v25  ;;  %v962_v25 = vld [vmem:[%s7074_s10 + $0x18] sm:$0xff] }
  0x98   :  { %4921 = vmatpush3.msra.mxu1 %v6058_v6  ;;  %4889 = vmatmul.mubr.msk.f32.gmra.mxu0 %vm209_vm1, %v200_v26 }
  0x99   :  { %4922 = vmatprep.subr.mxu1 %v5883_v0  ;;  %4891 = vmatprep.mubr.msk.f32.mxu0 %vm209_vm1, %v201_v27 }
  0x9a   :  { %4923 = vmatpush3.msra.mxu1 %v6066_v7 }
  0x9b   :  { %4938 = vmatprep.subr.mxu1 %v5883_v0 }
  0x9c   :  { %4892 = vmatmul.mubr.msk.f32.gmra.mxu0 %vm209_vm1, %v202_v28 }
  0x9d   :  { %4913 = vmatprep.mubr.msk.f32.mxu0 %vm5884_vm0, %v5883_v0 }
 0x14d   :  { %v4887_v8 = vpop.f32.mrf.mxu0 }
 0x14e   :  { %v300_v37 = vadd.f32 %v4887_v8, %v6091_v9 }
 0x14f   :  { %v294_v10 = vpop.f32.mrf.mxu0 }
 0x150   :  { %v295_v11 = vadd.f32 %v6091_v9, %v294_v10 }
 0x152   :  { %v400_v12 = vpop.f32.mrf.mxu1 }
 0x153   :  { %v404_v13 = vadd.f32 %v400_v12, %v295_v11 }
 0x154   :  { %v4904_v14 = vpop.f32.mrf.mxu1 }
 0x155   :  { %5395 = vtanh.f32 %v404_v13  ;;  %v4556_v16 = vmul.f32 -1.442695, %v404_v13 }
 0x157   :  { %5397 = vpow2.f32 %v4556_v16 }
 0x158   :  { %v6128_v33 = vpop.f32.mrf.mxu0 }
 0x15a   :  { %v304_v34 = vpop.f32.mrf.mxu0 }
 0x15b   :  { %v305_v55 = vadd.f32 %v6091_v9, %v304_v34 }
 0x15c   :  { %v6130_v35 = vpop.f32.mrf.mxu0 }
 0x15e   :  { %v6132_v36 = vpop.f32.mrf.mxu0 }
 0x162   :  { %v5396_v15 = vpop.eup %5395 }
 0x163   :  { %414 = vrot.lane.b32.xlu0 %v5396_v15, %s5885_s3 }
 0x164   :  { %v5398_v17 = vpop.eup %5397 }
 0x165   :  { %v408_v18 = vadd.f32 1.0, %v5398_v17 }
 0x167   :  { %5399 = vrcp.f32 %v408_v18 }
 0x174   :  { %v5400_v19 = vpop.eup %5399 }
 0x175   :  { %v412_v22 = vmul.f32 0.0, %v5400_v19 }
 0x1d5   :  { %v415_v20 = vpop.permute.xlu0 %414 }
 0x1d6   :  { %v417_v21 = vmul.f32 %v5400_v19, %v415_v20 }
 0x1d8   :  { %419 = vrot.lane.b32.xlu0 %v417_v21, %s5886_s4 }
 0x24a   :  { %v420_v23 = vpop.permute.xlu0 %419 }
 0x24b   :  { %v422_v24 = vadd.f32 %v420_v23, %v412_v22 }
 0x24d   :  { %5401 = vtanh.f32 %v422_v24 }
 0x25a   :  { %v5402_v29 = vpop.eup %5401 }
 0x25b   :  { %425 = vrot.lane.b32.xlu1 %v5402_v29, %s5885_s3 }
 0x2cd   :  { %v426_v30 = vpop.permute.xlu1 %425 }
 0x2ce   :  { %v428_v31 = vmul.f32 %v5400_v19, %v426_v30  ;;  %v961_v30 = vld [vmem:[%s7074_s10 + $0x10] sm:$0xff] }
 0x2d0   :  { %430 = vrot.lane.b32.xlu1 %v428_v31, %s5886_s4 }
 0x342   :  { %v431_v32 = vpop.permute.xlu1 %430 }
 0x343   :  { %433 = vst.msk [vmem:[#allocation2] sm:$0xff] %vm330_vm2, %v431_v32  ;;  %4914 = vmatmul.mubr.msk.f32.vlgmr.msra.gmra.mxu0 %vm330_vm2, %v431_v32  ;;  %v960_v32 = vld [vmem:[%s7074_s10 + $0x8] sm:$0xff] }
 0x344   :  { %4928 = vmatpush3.msra.mxu0 %v6038_v2  ;;  %4935 = vmatprep.mubr.msk.f32.mxu0 %vm5884_vm0, %v5883_v0 }
 0x345   :  { %4929 = vmatprep.subr.mxu0 %v5883_v0 }
 0x346   :  { %4930 = vmatpush3.msra.mxu0 %v6050_v5 }
 0x347   :  { %4931 = vmatprep.subr.mxu0 %v5883_v0 }
 0x348   :  { %4932 = vmatpush3.msra.mxu0 %v6058_v6 }
 0x349   :  { %4933 = vmatprep.subr.mxu0 %v5883_v0 }
 0x34a   :  { %4934 = vmatpush3.msra.mxu0 %v6066_v7  ;;  %v968_v31 = vld [vmem:[#allocation2] sm:$0xff] }
 0x34b   :  { %4949 = vmatprep.subr.mxu0 %v5883_v0 }
 0x403   :  { %v504_v38 = vpop.f32.mrf.mxu0 }
 0x404   :  { %v508_v39 = vadd.f32 %v504_v38, %v300_v37 }
 0x405   :  { %v4915_v40 = vpop.f32.mrf.mxu0 }
 0x406   :  { %5403 = vtanh.f32 %v508_v39  ;;  %v4558_v42 = vmul.f32 -1.442695, %v508_v39  ;;  %v315_v39 = vadd.f32 %v6091_v9, %v6132_v36 }
 0x408   :  { %5405 = vpow2.f32 %v4558_v42 }
 0x413   :  { %v5404_v41 = vpop.eup %5403 }
 0x414   :  { %518 = vrot.lane.b32.xlu0 %v5404_v41, %s5885_s3 }
 0x415   :  { %v5406_v43 = vpop.eup %5405 }
 0x416   :  { %v512_v44 = vadd.f32 1.0, %v5406_v43 }
 0x418   :  { %5407 = vrcp.f32 %v512_v44 }
 0x425   :  { %v5408_v45 = vpop.eup %5407 }
 0x426   :  { %v516_v48 = vmul.f32 %v5408_v45, %v422_v24 }
 0x486   :  { %v519_v46 = vpop.permute.xlu0 %518 }
 0x487   :  { %v521_v47 = vmul.f32 %v5408_v45, %v519_v46 }
 0x489   :  { %523 = vrot.lane.b32.xlu1 %v521_v47, %s5886_s4 }
 0x4fb   :  { %v524_v49 = vpop.permute.xlu1 %523 }
 0x4fc   :  { %v526_v50 = vadd.f32 %v524_v49, %v516_v48 }
 0x4fe   :  { %5409 = vtanh.f32 %v526_v50 }
 0x50b   :  { %v5410_v51 = vpop.eup %5409 }
 0x50c   :  { %529 = vrot.lane.b32.xlu0 %v5410_v51, %s5885_s3 }
 0x57e   :  { %v530_v52 = vpop.permute.xlu0 %529 }
 0x57f   :  { %v532_v53 = vmul.f32 %v5408_v45, %v530_v52 }
 0x581   :  { %534 = vrot.lane.b32.xlu1 %v532_v53, %s5886_s4  ;;  %v6203_v53 = vld [vmem:[%s7075_s13 + $0x18] sm:$0xff] }
 0x5f3   :  { %v535_v54 = vpop.permute.xlu1 %534 }
 0x5f4   :  { %538 = vst.msk [vmem:[#allocation2 + $0x8] sm:$0xff] %vm330_vm2, %v535_v54  ;;  %4925 = vmatmul.mubr.msk.f32.vlgmr.msra.gmra.mxu1 %vm330_vm2, %v535_v54  ;;  %v6209_v54 = vld [vmem:[%s7075_s13 + $0x10] sm:$0xff] }
 0x5f5   :  { %4939 = vmatpush3.msra.mxu1 %v6038_v2  ;;  %4946 = vmatprep.mubr.msk.f32.mxu1 %vm5884_vm0, %v5883_v0 }
 0x5f6   :  { %4940 = vmatprep.subr.mxu1 %v5883_v0 }
 0x5f7   :  { %4941 = vmatpush3.msra.mxu1 %v6050_v5 }
 0x5f8   :  { %4942 = vmatprep.subr.mxu1 %v5883_v0 }
 0x5f9   :  { %4943 = vmatpush3.msra.mxu1 %v6058_v6 }
 0x5fa   :  { %4944 = vmatprep.subr.mxu1 %v5883_v0 }
 0x5fb   :  { %4945 = vmatpush3.msra.mxu1 %v6066_v7  ;;  %v969_v34 = vld [vmem:[#allocation2 + $0x8] sm:$0xff] }
 0x5fc   :  { %4960 = vmatprep.subr.mxu1 %v962_v25 }
 0x6b4   :  { %v609_v56 = vpop.f32.mrf.mxu1 }
 0x6b5   :  { %v613_v57 = vadd.f32 %v609_v56, %v305_v55  ;;  %v6216_v55 = vld [vmem:[%s7075_s13 + $0x8] sm:$0xff]  ;;  %v6223_v56 = vld [vmem:[%s7075_s13] sm:$0xff] }
 0x6b6   :  { %v4926_v58 = vpop.f32.mrf.mxu1 }
 0x6b7   :  { %5411 = vtanh.f32 %v613_v57  ;;  %v4560_v60 = vmul.f32 -1.442695, %v613_v57 }
 0x6b9   :  { %5413 = vpow2.f32 %v4560_v60 }
 0x6c4   :  { %v5412_v59 = vpop.eup %5411 }
 0x6c5   :  { %623 = vrot.lane.b32.xlu0 %v5412_v59, %s5885_s3 }
 0x6c6   :  { %v5414_v61 = vpop.eup %5413 }
 0x6c7   :  { %v617_v62 = vadd.f32 1.0, %v5414_v61  ;;  %v320_v61 = vadd.f32 %v6130_v35, %v6091_v9 }
 0x6c9   :  { %5415 = vrcp.f32 %v617_v62 }
 0x6d6   :  { %v5416_v63 = vpop.eup %5415 }
 0x6d7   :  { %v621_v4 = vmul.f32 %v5416_v63, %v526_v50 }
 0x737   :  { %v624_v1 = vpop.permute.xlu0 %623 }
 0x738   :  { %v626_v3 = vmul.f32 %v5416_v63, %v624_v1 }
 0x73a   :  { %628 = vrot.lane.b32.xlu1 %v626_v3, %s5886_s4 }
 0x7ac   :  { %v629_v8 = vpop.permute.xlu1 %628 }
 0x7ad   :  { %v631_v10 = vadd.f32 %v629_v8, %v621_v4  ;;  %v6257_v8 = vld [vmem:[#allocation9] ss:$0 sm:$0xff] }
 0x7af   :  { %5417 = vtanh.f32 %v631_v10 }
 0x7bc   :  { %v5418_v11 = vpop.eup %5417 }
 0x7bd   :  { %634 = vrot.lane.b32.xlu0 %v5418_v11, %s5885_s3 }
 0x82f   :  { %v635_v12 = vpop.permute.xlu0 %634 }
 0x830   :  { %v637_v13 = vmul.f32 %v5416_v63, %v635_v12 }
 0x832   :  { %639 = vrot.lane.b32.xlu1 %v637_v13, %s5886_s4 }
 0x8a4   :  { %v640_v14 = vpop.permute.xlu1 %639 }
 0x8a5   :  { %643 = vst.msk [vmem:[#allocation2 + $0x10] sm:$0xff] %vm330_vm2, %v640_v14  ;;  %4936 = vmatmul.mubr.msk.f32.vlgmr.msra.gmra.mxu0 %vm330_vm2, %v640_v14 }
 0x8a6   :  { %4950 = vmatpush3.msra.mxu0 %v6038_v2  ;;  %4957 = vmatprep.mubr.msk.f32.mxu0 %vm5884_vm0, %v5883_v0  ;;  %v310_v2 = vadd.f32 %v6128_v33, %v6091_v9  ;;  %v959_v33 = vld [vmem:[%s7074_s10] sm:$0xff] }
 0x8a7   :  { %4951 = vmatprep.subr.mxu0 %v5883_v0 }
 0x8a8   :  { %4952 = vmatpush3.msra.mxu0 %v6050_v5 }
 0x8a9   :  { %4953 = vmatprep.subr.mxu0 %v5883_v0 }
 0x8aa   :  { %4954 = vmatpush3.msra.mxu0 %v6058_v6 }
 0x8ab   :  { %4955 = vmatprep.subr.mxu0 %v5883_v0 }
 0x8ac   :  { %4956 = vmatpush3.msra.mxu0 %v6066_v7  ;;  %v970_v37 = vld [vmem:[#allocation2 + $0x10] sm:$0xff] }
 0x8ad   :  { %4977 = vmatprep.subr.mxu0 %v5883_v0 }
 0x965   :  { %v714_v15 = vpop.f32.mrf.mxu0 }
 0x966   :  { %v718_v16 = vadd.f32 %v714_v15, %v310_v2 }
 0x967   :  { %v4937_v17 = vpop.f32.mrf.mxu0 }
 0x968   :  { %5419 = vtanh.f32 %v718_v16  ;;  %v4562_v5 = vmul.f32 -1.442695, %v718_v16 }
 0x96a   :  { %5421 = vpow2.f32 %v4562_v5 }
 0x975   :  { %v5420_v18 = vpop.eup %5419 }
 0x976   :  { %728 = vrot.lane.b32.xlu0 %v5420_v18, %s5885_s3 }
 0x977   :  { %v5422_v19 = vpop.eup %5421 }
 0x978   :  { %v722_v6 = vadd.f32 1.0, %v5422_v19 }
 0x97a   :  { %5423 = vrcp.f32 %v722_v6 }
 0x987   :  { %v5424_v20 = vpop.eup %5423 }
 0x988   :  { %v726_v22 = vmul.f32 %v5424_v20, %v631_v10 }
 0x9e8   :  { %v729_v21 = vpop.permute.xlu0 %728 }
 0x9e9   :  { %v731_v7 = vmul.f32 %v5424_v20, %v729_v21 }
 0x9eb   :  { %733 = vrot.lane.b32.xlu1 %v731_v7, %s5886_s4 }
 0xa5d   :  { %v734_v23 = vpop.permute.xlu1 %733 }
 0xa5e   :  { %v736_v24 = vadd.f32 %v734_v23, %v726_v22 }
 0xa60   :  { %5425 = vtanh.f32 %v736_v24 }
 0xa6d   :  { %v5426_v26 = vpop.eup %5425 }
 0xa6e   :  { %739 = vrot.lane.b32.xlu0 %v5426_v26, %s5885_s3 }
 0xae0   :  { %v740_v27 = vpop.permute.xlu0 %739 }
 0xae1   :  { %v742_v28 = vmul.f32 %v5424_v20, %v740_v27 }
 0xae3   :  { %744 = vrot.lane.b32.xlu1 %v742_v28, %s5886_s4 }
 0xb55   :  { %v745_v29 = vpop.permute.xlu1 %744 }
 0xb56   :  { %748 = vst.msk [vmem:[#allocation2 + $0x18] sm:$0xff] %vm330_vm2, %v745_v29  ;;  %4947 = vmatmul.mubr.msk.f32.vlgmr.msra.gmra.mxu1 %vm330_vm2, %v745_v29 }
 0xb57   :  { %4961 = vmatpush3.msra.mxu1 %v962_v25  ;;  %4968 = vmatprep.mubr.msk.f32.mxu1 %vm330_vm2, %v968_v31 }
 0xb58   :  { %4962 = vmatprep.subr.mxu1 %v961_v30 }
 0xb59   :  { %4963 = vmatpush3.msra.mxu1 %v961_v30 }
 0xb5a   :  { %4964 = vmatprep.subr.mxu1 %v960_v32 }
 0xb5b   :  { %4965 = vmatpush3.msra.mxu1 %v960_v32 }
 0xb5c   :  { %4966 = vmatprep.subr.mxu1 %v959_v33 }
 0xb5d   :  { %4967 = vmatpush3.msra.mxu1 %v959_v33  ;;  %v971_v38 = vld [vmem:[#allocation2 + $0x18] sm:$0xff] }
 0xb5e   :  { %4969 = vmatmul.mubr.msk.f32.vlgmr.msra.gmra.mxu1 %vm330_vm2, %v969_v34  ;;  %4988 = vmatprep.subr.mxu1 %v5883_v0 }
 0xb5f   :  { %4971 = vmatprep.mubr.msk.f32.mxu1 %vm330_vm2, %v970_v37  ;;  %4989 = vmatpush3.msra.mxu1 %v6203_v53 }
 0xb60   :  { %4990 = vmatprep.subr.mxu1 %v5883_v0 }
 0xb61   :  { %4991 = vmatpush3.msra.mxu1 %v6209_v54 }
 0xb62   :  { %4972 = vmatmul.mubr.msk.f32.gmra.mxu1 %vm330_vm2, %v971_v38  ;;  %4992 = vmatprep.subr.mxu1 %v5883_v0 }
 0xb63   :  { %4993 = vmatpush3.msra.mxu1 %v6216_v55 }
 0xb64   :  { %4994 = vmatprep.subr.mxu1 %v5883_v0 }
 0xb65   :  { %4995 = vmatpush3.msra.mxu1 %v6223_v56 }
 0xb66   :  { %5010 = vmatprep.subr.mxu1 %v5883_v0 }
 0xc16   :  { %v819_v40 = vpop.f32.mrf.mxu1 }
 0xc17   :  { %v823_v41 = vadd.f32 %v819_v40, %v315_v39 }
 0xc18   :  { %v4948_v42 = vpop.f32.mrf.mxu1 }
 0xc19   :  { %5427 = vtanh.f32 %v823_v41  ;;  %v4564_v44 = vmul.f32 -1.442695, %v823_v41 }
 0xc1b   :  { %5429 = vpow2.f32 %v4564_v44 }
 0xc1e   :  { %v6255_v62 = vpop.f32.mrf.mxu1 }
 0xc20   :  { %v1064_v4 = vpop.f32.mrf.mxu1 }
 0xc21   :  { %v1065_v10 = vadd.f32 %v6257_v8, %v1064_v4 }
 0xc22   :  { %v6291_v39 = vpop.f32.mrf.mxu1 }
 0xc24   :  { %v1074_v40 = vpop.f32.mrf.mxu1 }
 0xc26   :  { %v5428_v43 = vpop.eup %5427 }
 0xc27   :  { %833 = vrot.lane.b32.xlu0 %v5428_v43, %s5885_s3  ;;  %v1070_v43 = vadd.f32 %v6255_v62, %v6257_v8 }
 0xc28   :  { %v5430_v45 = vpop.eup %5429 }
 0xc29   :  { %v827_v46 = vadd.f32 1.0, %v5430_v45 }
 0xc2b   :  { %5431 = vrcp.f32 %v827_v46 }
 0xc38   :  { %v5432_v47 = vpop.eup %5431 }
 0xc39   :  { %v831_v50 = vmul.f32 %v5432_v47, %v736_v24 }
 0xc99   :  { %v834_v48 = vpop.permute.xlu0 %833 }
 0xc9a   :  { %v836_v49 = vmul.f32 %v5432_v47, %v834_v48 }
 0xc9c   :  { %838 = vrot.lane.b32.xlu1 %v836_v49, %s5886_s4 }
 0xd0e   :  { %v839_v51 = vpop.permute.xlu1 %838 }
 0xd0f   :  { %v6196_v36 = vadd.f32 %v839_v51, %v831_v50 }
 0xd11   :  { %5433 = vtanh.f32 %v6196_v36 }
 0xd1e   :  { %v5434_v52 = vpop.eup %5433 }
 0xd1f   :  { %844 = vrot.lane.b32.xlu0 %v5434_v52, %s5885_s3 }
 0xd91   :  { %v845_v57 = vpop.permute.xlu0 %844 }
 0xd92   :  { %v847_v58 = vmul.f32 %v5432_v47, %v845_v57 }
 0xd94   :  { %849 = vrot.lane.b32.xlu1 %v847_v58, %s5886_s4 }
 0xe06   :  { %v850_v59 = vpop.permute.xlu1 %849 }
 0xe07   :  { %853 = vst.msk [vmem:[#allocation2 + $0x20] sm:$0xff] %vm330_vm2, %v850_v59  ;;  %4958 = vmatmul.mubr.msk.f32.vlgmr.msra.gmra.mxu0 %vm330_vm2, %v850_v59 }
 0xe08   :  { %4978 = vmatpush3.msra.mxu0 %v6203_v53  ;;  %4985 = vmatprep.mubr.msk.f32.mxu0 %vm5884_vm0, %v5883_v0 }
 0xe09   :  { %4979 = vmatprep.subr.mxu0 %v5883_v0 }
 0xe0a   :  { %4980 = vmatpush3.msra.mxu0 %v6209_v54 }
 0xe0b   :  { %4981 = vmatprep.subr.mxu0 %v5883_v0 }
 0xe0c   :  { %4982 = vmatpush3.msra.mxu0 %v6216_v55 }
 0xe0d   :  { %4983 = vmatprep.subr.mxu0 %v5883_v0 }
 0xe0e   :  { %4984 = vmatpush3.msra.mxu0 %v6223_v56  ;;  %v972_v60 = vld [vmem:[#allocation2 + $0x20] sm:$0xff] }
 0xe0f   :  { %4986 = vmatmul.mubr.f32.vlgmr.msra.gmra.mxu0 %v5883_v0  ;;  %4974 = vmatprep.mubr.msk.f32.mxu1 %vm330_vm2, %v972_v60 }
 0xe10   :  { %4999 = vmatprep.subr.mxu0 %v5883_v0  ;;  %5007 = vmatprep.mubr.msk.f32.mxu0 %vm5884_vm0, %v5883_v0 }
 0xe11   :  { %5000 = vmatpush3.msra.mxu0 %v6203_v53 }
 0xe12   :  { %5001 = vmatprep.subr.mxu0 %v5883_v0 }
 0xe13   :  { %5002 = vmatpush3.msra.mxu0 %v6209_v54 }
 0xe14   :  { %5003 = vmatprep.subr.mxu0 %v5883_v0 }
 0xe15   :  { %5004 = vmatpush3.msra.mxu0 %v6216_v55 }
 0xe16   :  { %5005 = vmatprep.subr.mxu0 %v5883_v0 }
 0xe17   :  { %5006 = vmatpush3.msra.mxu0 %v6223_v56 }
 0xe18   :  { %5021 = vmatprep.subr.mxu0 %v5883_v0 }
 0xec7   :  { %v924_v63 = vpop.f32.mrf.mxu0 }
 0xec8   :  { %v928_v1 = vadd.f32 %v924_v63, %v320_v61 }
 0xec9   :  { %v4959_v3 = vpop.f32.mrf.mxu0 }
 0xeca   :  { %5435 = vtanh.f32 %v928_v1  ;;  %v4566_v9 = vmul.f32 -1.442695, %v928_v1  ;;  %v1075_v1 = vadd.f32 %v6257_v8, %v1074_v40  ;;  %v1721_v40 = vld [vmem:[%s7043_s8 + $0x8] sm:$0xff] }
 0xecf   :  { %v1166_v11 = vpop.f32.mrf.mxu0 }
 0xed0   :  { %v1170_v12 = vadd.f32 %v1166_v11, %v1065_v10 }
 0xed1   :  { %v4987_v13 = vpop.f32.mrf.mxu0 }
 0xed2   :  { %5437 = vtanh.f32 %v1170_v12  ;;  %v4574_v35 = vmul.f32 -1.442695, %v1170_v12 }
 0xed3   :  { %5439 = vpow2.f32 %v4566_v9 }
 0xed4   :  { %5441 = vpow2.f32 %v4574_v35 }
 0xed7   :  { %v5436_v14 = vpop.eup %5435 }
 0xed8   :  { %938 = vrot.lane.b32.xlu0 %v5436_v14, %s5885_s3 }
 0xedf   :  { %v5438_v2 = vpop.eup %5437 }
 0xee0   :  { %1180 = vrot.lane.b32.xlu1 %v5438_v2, %s5885_s3  ;;  %v5440_v15 = vpop.eup %5439 }
 0xee1   :  { %v932_v16 = vadd.f32 1.0, %v5440_v15  ;;  %v5442_v17 = vpop.eup %5441 }
 0xee2   :  { %v1174_v18 = vadd.f32 1.0, %v5442_v17 }
 0xee3   :  { %5443 = vrcp.f32 %v932_v16 }
 0xee4   :  { %5445 = vrcp.f32 %v1174_v18 }
 0xef0   :  { %v5444_v5 = vpop.eup %5443 }
 0xef1   :  { %v5446_v20 = vpop.eup %5445  ;;  %v936_v22 = vmul.f32 %v5444_v5, %v6196_v36 }
 0xef2   :  { %v1178_v25 = vmul.f32 0.0, %v5446_v20 }
 0xf4a   :  { %v939_v19 = vpop.permute.xlu0 %938 }
 0xf4b   :  { %v941_v6 = vmul.f32 %v5444_v5, %v939_v19 }
 0xf4d   :  { %943 = vrot.lane.b32.xlu0 %v941_v6, %s5886_s4 }
 0xf52   :  { %v1181_v21 = vpop.permute.xlu1 %1180 }
 0xf53   :  { %v1183_v7 = vmul.f32 %v5446_v20, %v1181_v21 }
 0xf55   :  { %1185 = vrot.lane.b32.xlu1 %v1183_v7, %s5886_s4 }
 0xfbf   :  { %v944_v23 = vpop.permute.xlu0 %943 }
 0xfc0   :  { %v6265_v24 = vadd.f32 %v944_v23, %v936_v22 }
 0xfc2   :  { %5447 = vtanh.f32 %v6265_v24 }
 0xfc7   :  { %v1186_v26 = vpop.permute.xlu1 %1185 }
 0xfc8   :  { %v1188_v27 = vadd.f32 %v1186_v26, %v1178_v25 }
 0xfca   :  { %5449 = vtanh.f32 %v1188_v27 }
 0xfcf   :  { %v5448_v28 = vpop.eup %5447 }
 0xfd0   :  { %949 = vrot.lane.b32.xlu0 %v5448_v28, %s5885_s3 }
 0xfd7   :  { %v5450_v29 = vpop.eup %5449 }
 0xfd8   :  { %1191 = vrot.lane.b32.xlu1 %v5450_v29, %s5885_s3 }
0x1042   :  { %v950_v30 = vpop.permute.xlu0 %949 }
0x1043   :  { %v952_v31 = vmul.f32 %v5444_v5, %v950_v30  ;;  %v1723_v30 = vld [vmem:[%s7043_s8 + $0x18] sm:$0xff] }
0x1045   :  { %954 = vrot.lane.b32.xlu0 %v952_v31, %s5886_s4 }
0x104a   :  { %v1192_v32 = vpop.permute.xlu1 %1191 }
0x104b   :  { %v1194_v33 = vmul.f32 %v5446_v20, %v1192_v32 }
0x104d   :  { %1196 = vrot.lane.b32.xlu1 %v1194_v33, %s5886_s4 }
0x10b7   :  { %v6272_v34 = vpop.permute.xlu0 %954 }
0x10b8   :  { %958 = vst.msk [vmem:[#allocation2 + $0x28] sm:$0xff] %vm330_vm2, %v6272_v34 }
0x10bf   :  { %v1197_v37 = vpop.permute.xlu1 %1196  ;;  %v973_v38 = vld [vmem:[#allocation2 + $0x28] sm:$0xff] }
0x10c0   :  { %1199 = vst.msk [vmem:[#allocation3] sm:$0xff] %vm330_vm2, %v1197_v37  ;;  %4975 = vmatmul.mubr.msk.f32.gmra.mxu1 %vm330_vm2, %v973_v38  ;;  %v1722_v38 = vld [vmem:[%s7043_s8 + $0x10] sm:$0xff] }
0x10c1   :  { %4996 = vmatprep.mubr.msk.f32.mxu1 %vm5884_vm0, %v5883_v0 }
0x10c4   :  { %4997 = vmatmul.mubr.msk.f32.vlgmr.msra.gmra.mxu1 %vm330_vm2, %v1197_v37 }
0x10c5   :  { %5011 = vmatpush3.msra.mxu1 %v6203_v53  ;;  %5018 = vmatprep.mubr.msk.f32.mxu1 %vm5884_vm0, %v5883_v0 }
0x10c6   :  { %5012 = vmatprep.subr.mxu1 %v5883_v0 }
0x10c7   :  { %5013 = vmatpush3.msra.mxu1 %v6209_v54 }
0x10c8   :  { %5014 = vmatprep.subr.mxu1 %v5883_v0 }
0x10c9   :  { %5015 = vmatpush3.msra.mxu1 %v6216_v55 }
0x10ca   :  { %5016 = vmatprep.subr.mxu1 %v5883_v0 }
0x10cb   :  { %5017 = vmatpush3.msra.mxu1 %v6223_v56 }
0x10cc   :  { %5032 = vmatprep.subr.mxu1 %v5883_v0 }
0x1180   :  { %v6293_v41 = vpop.f32.mrf.mxu1 }
0x1182   :  { %v6295_v42 = vpop.f32.mrf.mxu1 }
0x1184   :  { %v1269_v44 = vpop.f32.mrf.mxu1 }
0x1185   :  { %v1273_v45 = vadd.f32 %v1269_v44, %v1070_v43  ;;  %v1720_v43 = vld [vmem:[%s7043_s8] sm:$0xff] }
0x1186   :  { %v4998_v46 = vpop.f32.mrf.mxu1 }
0x1187   :  { %5451 = vtanh.f32 %v1273_v45  ;;  %v4576_v48 = vmul.f32 -1.442695, %v1273_v45 }
0x1189   :  { %5453 = vpow2.f32 %v4576_v48 }
0x1194   :  { %v5452_v47 = vpop.eup %5451 }
0x1195   :  { %1283 = vrot.lane.b32.xlu0 %v5452_v47, %s5885_s3  ;;  %v1085_v47 = vadd.f32 %v6257_v8, %v6295_v42 }
0x1196   :  { %v5454_v49 = vpop.eup %5453 }
0x1197   :  { %v1277_v50 = vadd.f32 1.0, %v5454_v49 }
0x1199   :  { %5455 = vrcp.f32 %v1277_v50 }
0x11a6   :  { %v5456_v51 = vpop.eup %5455 }
0x11a7   :  { %v1281_v57 = vmul.f32 %v5456_v51, %v1188_v27 }
0x1207   :  { %v1284_v36 = vpop.permute.xlu0 %1283 }
0x1208   :  { %v1286_v52 = vmul.f32 %v5456_v51, %v1284_v36 }
0x120a   :  { %1288 = vrot.lane.b32.xlu1 %v1286_v52, %s5886_s4 }
0x127c   :  { %v1289_v58 = vpop.permute.xlu1 %1288 }
0x127d   :  { %v1291_v59 = vadd.f32 %v1289_v58, %v1281_v57 }
0x127f   :  { %5457 = vtanh.f32 %v1291_v59 }
0x128c   :  { %v5458_v60 = vpop.eup %5457 }
0x128d   :  { %1294 = vrot.lane.b32.xlu0 %v5458_v60, %s5885_s3 }
0x12ff   :  { %v1295_v61 = vpop.permute.xlu0 %1294 }
0x1300   :  { %v1297_v62 = vmul.f32 %v5456_v51, %v1295_v61 }
0x1302   :  { %1299 = vrot.lane.b32.xlu1 %v1297_v62, %s5886_s4 }
0x1374   :  { %v1300_v63 = vpop.permute.xlu1 %1299 }
0x1375   :  { %1303 = vst.msk [vmem:[#allocation3 + $0x8] sm:$0xff] %vm330_vm2, %v1300_v63  ;;  %5008 = vmatmul.mubr.msk.f32.vlgmr.msra.gmra.mxu0 %vm330_vm2, %v1300_v63 }
0x1376   :  { %5022 = vmatpush3.msra.mxu0 %v6203_v53  ;;  %5029 = vmatprep.mubr.msk.f32.mxu0 %vm5884_vm0, %v5883_v0 }
0x1377   :  { %5023 = vmatprep.subr.mxu0 %v5883_v0 }
0x1378   :  { %5024 = vmatpush3.msra.mxu0 %v6209_v54 }
0x1379   :  { %5025 = vmatprep.subr.mxu0 %v5883_v0 }
0x137a   :  { %5026 = vmatpush3.msra.mxu0 %v6216_v55 }
0x137b   :  { %5027 = vmatprep.subr.mxu0 %v5883_v0 }
0x137c   :  { %5028 = vmatpush3.msra.mxu0 %v6223_v56  ;;  %v1730_v44 = vld [vmem:[#allocation3 + $0x8] sm:$0xff] }
0x137d   :  { %5043 = vmatprep.subr.mxu0 %v1723_v30 }
0x1435   :  { %v1373_v3 = vpop.f32.mrf.mxu0 }
0x1436   :  { %v1377_v4 = vadd.f32 %v1373_v3, %v1075_v1  ;;  %v6367_v1 = vld [vmem:[%s7044_s9 + $0x18] sm:$0xff]  ;;  %v6373_v3 = vld [vmem:[%s7044_s9 + $0x10] sm:$0xff] }
0x1437   :  { %v5009_v10 = vpop.f32.mrf.mxu0 }
0x1438   :  { %5459 = vtanh.f32 %v1377_v4  ;;  %v4578_v12 = vmul.f32 -1.442695, %v1377_v4  ;;  %v6380_v4 = vld [vmem:[%s7044_s9 + $0x8] sm:$0xff]  ;;  %v6387_v10 = vld [vmem:[%s7044_s9] sm:$0xff] }
0x143a   :  { %5461 = vpow2.f32 %v4578_v12 }
0x1445   :  { %v5460_v11 = vpop.eup %5459 }
0x1446   :  { %1387 = vrot.lane.b32.xlu0 %v5460_v11, %s5885_s3 }
0x1447   :  { %v5462_v13 = vpop.eup %5461 }
0x1448   :  { %v1381_v14 = vadd.f32 1.0, %v5462_v13 }
0x144a   :  { %5463 = vrcp.f32 %v1381_v14 }
0x1457   :  { %v5464_v2 = vpop.eup %5463 }
0x1458   :  { %v1385_v15 = vmul.f32 %v5464_v2, %v1291_v59 }
0x14b8   :  { %v1388_v9 = vpop.permute.xlu0 %1387 }
0x14b9   :  { %v1390_v35 = vmul.f32 %v5464_v2, %v1388_v9 }
0x14bb   :  { %1392 = vrot.lane.b32.xlu1 %v1390_v35, %s5886_s4 }
0x152d   :  { %v1393_v16 = vpop.permute.xlu1 %1392 }
0x152e   :  { %v1395_v17 = vadd.f32 %v1393_v16, %v1385_v15 }
0x1530   :  { %5465 = vtanh.f32 %v1395_v17 }
0x153d   :  { %v5466_v18 = vpop.eup %5465 }
0x153e   :  { %1398 = vrot.lane.b32.xlu0 %v5466_v18, %s5885_s3  ;;  %v6421_v18 = vld [vmem:[#allocation10] ss:$0 sm:$0xff] }
0x15b0   :  { %v1399_v5 = vpop.permute.xlu0 %1398 }
0x15b1   :  { %v1401_v19 = vmul.f32 %v5464_v2, %v1399_v5  ;;  %v1090_v2 = vadd.f32 %v6293_v41, %v6257_v8 }
0x15b3   :  { %1403 = vrot.lane.b32.xlu1 %v1401_v19, %s5886_s4 }
0x1625   :  { %v1404_v6 = vpop.permute.xlu1 %1403 }
0x1626   :  { %1407 = vst.msk [vmem:[#allocation3 + $0x10] sm:$0xff] %vm330_vm2, %v1404_v6  ;;  %5019 = vmatmul.mubr.msk.f32.vlgmr.msra.gmra.mxu1 %vm330_vm2, %v1404_v6 }
0x1627   :  { %5033 = vmatpush3.msra.mxu1 %v6203_v53  ;;  %5040 = vmatprep.mubr.msk.f32.mxu1 %vm5884_vm0, %v5883_v0  ;;  %v1080_v53 = vadd.f32 %v6291_v39, %v6257_v8  ;;  %v1729_v39 = vld [vmem:[#allocation3] sm:$0xff] }
0x1628   :  { %5034 = vmatprep.subr.mxu1 %v5883_v0 }
0x1629   :  { %5035 = vmatpush3.msra.mxu1 %v6209_v54 }
0x162a   :  { %5036 = vmatprep.subr.mxu1 %v5883_v0 }
0x162b   :  { %5037 = vmatpush3.msra.mxu1 %v6216_v55 }
0x162c   :  { %5038 = vmatprep.subr.mxu1 %v5883_v0 }
0x162d   :  { %5039 = vmatpush3.msra.mxu1 %v6223_v56  ;;  %v1731_v45 = vld [vmem:[#allocation3 + $0x10] sm:$0xff] }
0x162e   :  { %5060 = vmatprep.subr.mxu1 %v5883_v0 }
0x16e6   :  { %v1477_v20 = vpop.f32.mrf.mxu1 }
0x16e7   :  { %v1481_v21 = vadd.f32 %v1477_v20, %v1080_v53 }
0x16e8   :  { %v5020_v7 = vpop.f32.mrf.mxu1 }
0x16e9   :  { %5467 = vtanh.f32 %v1481_v21  ;;  %v4580_v54 = vmul.f32 -1.442695, %v1481_v21 }
0x16eb   :  { %5469 = vpow2.f32 %v4580_v54 }
0x16f6   :  { %v5468_v22 = vpop.eup %5467 }
0x16f7   :  { %1491 = vrot.lane.b32.xlu0 %v5468_v22, %s5885_s3 }
0x16f8   :  { %v5470_v23 = vpop.eup %5469 }
0x16f9   :  { %v1485_v55 = vadd.f32 1.0, %v5470_v23 }
0x16fb   :  { %5471 = vrcp.f32 %v1485_v55 }
0x1708   :  { %v5472_v25 = vpop.eup %5471 }
0x1709   :  { %v1489_v27 = vmul.f32 %v5472_v25, %v1395_v17 }
0x1769   :  { %v1492_v26 = vpop.permute.xlu0 %1491 }
0x176a   :  { %v1494_v56 = vmul.f32 %v5472_v25, %v1492_v26 }
0x176c   :  { %1496 = vrot.lane.b32.xlu1 %v1494_v56, %s5886_s4 }
0x17de   :  { %v1497_v28 = vpop.permute.xlu1 %1496 }
0x17df   :  { %v1499_v29 = vadd.f32 %v1497_v28, %v1489_v27 }
0x17e1   :  { %5473 = vtanh.f32 %v1499_v29 }
0x17ee   :  { %v5474_v31 = vpop.eup %5473 }
0x17ef   :  { %1502 = vrot.lane.b32.xlu0 %v5474_v31, %s5885_s3 }
0x1861   :  { %v1503_v32 = vpop.permute.xlu0 %1502 }
0x1862   :  { %v1505_v33 = vmul.f32 %v5472_v25, %v1503_v32 }
0x1864   :  { %1507 = vrot.lane.b32.xlu1 %v1505_v33, %s5886_s4 }
0x18d6   :  { %v1508_v37 = vpop.permute.xlu1 %1507 }
0x18d7   :  { %1511 = vst.msk [vmem:[#allocation3 + $0x18] sm:$0xff] %vm330_vm2, %v1508_v37  ;;  %5030 = vmatmul.mubr.msk.f32.vlgmr.msra.gmra.mxu0 %vm330_vm2, %v1508_v37 }
0x18d8   :  { %5044 = vmatpush3.msra.mxu0 %v1723_v30  ;;  %5051 = vmatprep.mubr.msk.f32.mxu0 %vm330_vm2, %v1729_v39 }
0x18d9   :  { %5045 = vmatprep.subr.mxu0 %v1722_v38 }
0x18da   :  { %5046 = vmatpush3.msra.mxu0 %v1722_v38 }
0x18db   :  { %5047 = vmatprep.subr.mxu0 %v1721_v40 }
0x18dc   :  { %5048 = vmatpush3.msra.mxu0 %v1721_v40 }
0x18dd   :  { %5049 = vmatprep.subr.mxu0 %v1720_v43 }
0x18de   :  { %5050 = vmatpush3.msra.mxu0 %v1720_v43  ;;  %v1732_v46 = vld [vmem:[#allocation3 + $0x18] sm:$0xff] }
0x18df   :  { %5052 = vmatmul.mubr.msk.f32.vlgmr.msra.gmra.mxu0 %vm330_vm2, %v1730_v44  ;;  %5071 = vmatprep.subr.mxu0 %v5883_v0 }
0x18e0   :  { %5054 = vmatprep.mubr.msk.f32.mxu0 %vm330_vm2, %v1731_v45  ;;  %5072 = vmatpush3.msra.mxu0 %v6367_v1 }
0x18e1   :  { %5073 = vmatprep.subr.mxu0 %v5883_v0 }
0x18e2   :  { %5074 = vmatpush3.msra.mxu0 %v6373_v3 }
0x18e3   :  { %5055 = vmatmul.mubr.msk.f32.gmra.mxu0 %vm330_vm2, %v1732_v46  ;;  %5075 = vmatprep.subr.mxu0 %v5883_v0 }
0x18e4   :  { %5076 = vmatpush3.msra.mxu0 %v6380_v4 }
0x18e5   :  { %5077 = vmatprep.subr.mxu0 %v5883_v0 }
0x18e6   :  { %5078 = vmatpush3.msra.mxu0 %v6387_v10 }
0x18e7   :  { %5093 = vmatprep.subr.mxu0 %v5883_v0 }
0x1997   :  { %v1581_v48 = vpop.f32.mrf.mxu0 }
0x1998   :  { %v1585_v49 = vadd.f32 %v1581_v48, %v1085_v47 }
0x1999   :  { %v5031_v50 = vpop.f32.mrf.mxu0 }
0x199a   :  { %5475 = vtanh.f32 %v1585_v49  ;;  %v4582_v36 = vmul.f32 -1.442695, %v1585_v49 }
0x199c   :  { %5477 = vpow2.f32 %v4582_v36 }
0x199f   :  { %v6419_v9 = vpop.f32.mrf.mxu0 }
0x19a1   :  { %v1825_v17 = vpop.f32.mrf.mxu0 }
0x19a2   :  { %v1826_v5 = vadd.f32 %v6421_v18, %v1825_v17 }
0x19a3   :  { %v6455_v49 = vpop.f32.mrf.mxu0 }
0x19a5   :  { %v1835_v50 = vpop.f32.mrf.mxu0 }
0x19a6   :  { %v1836_v17 = vadd.f32 %v6421_v18, %v1835_v50 }
0x19a7   :  { %v5476_v51 = vpop.eup %5475 }
0x19a8   :  { %1595 = vrot.lane.b32.xlu0 %v5476_v51, %s5885_s3 }
0x19a9   :  { %v5478_v52 = vpop.eup %5477 }
0x19aa   :  { %v1589_v57 = vadd.f32 1.0, %v5478_v52  ;;  %v1831_v52 = vadd.f32 %v6419_v9, %v6421_v18 }
0x19ac   :  { %5479 = vrcp.f32 %v1589_v57 }
0x19b9   :  { %v5480_v58 = vpop.eup %5479 }
0x19ba   :  { %v1593_v61 = vmul.f32 %v5480_v58, %v1499_v29 }
0x1a1a   :  { %v1596_v59 = vpop.permute.xlu0 %1595 }
0x1a1b   :  { %v1598_v60 = vmul.f32 %v5480_v58, %v1596_v59 }
0x1a1d   :  { %1600 = vrot.lane.b32.xlu1 %v1598_v60, %s5886_s4 }
0x1a8f   :  { %v1601_v62 = vpop.permute.xlu1 %1600 }
0x1a90   :  { %v6360_v42 = vadd.f32 %v1601_v62, %v1593_v61 }
0x1a92   :  { %5481 = vtanh.f32 %v6360_v42 }
0x1a9f   :  { %v5482_v63 = vpop.eup %5481 }
0x1aa0   :  { %1606 = vrot.lane.b32.xlu0 %v5482_v63, %s5885_s3 }
0x1b12   :  { %v1607_v11 = vpop.permute.xlu0 %1606 }
0x1b13   :  { %v1609_v12 = vmul.f32 %v5480_v58, %v1607_v11 }
0x1b15   :  { %1611 = vrot.lane.b32.xlu1 %v1609_v12, %s5886_s4 }
0x1b87   :  { %v1612_v13 = vpop.permute.xlu1 %1611 }
0x1b88   :  { %1615 = vst.msk [vmem:[#allocation3 + $0x20] sm:$0xff] %vm330_vm2, %v1612_v13  ;;  %5041 = vmatmul.mubr.msk.f32.vlgmr.msra.gmra.mxu1 %vm330_vm2, %v1612_v13 }
0x1b89   :  { %5061 = vmatpush3.msra.mxu1 %v6367_v1  ;;  %5068 = vmatprep.mubr.msk.f32.mxu1 %vm5884_vm0, %v5883_v0 }
0x1b8a   :  { %5062 = vmatprep.subr.mxu1 %v5883_v0 }
0x1b8b   :  { %5063 = vmatpush3.msra.mxu1 %v6373_v3 }
0x1b8c   :  { %5064 = vmatprep.subr.mxu1 %v5883_v0 }
0x1b8d   :  { %5065 = vmatpush3.msra.mxu1 %v6380_v4 }
0x1b8e   :  { %5066 = vmatprep.subr.mxu1 %v5883_v0 }
0x1b8f   :  { %5067 = vmatpush3.msra.mxu1 %v6387_v10  ;;  %v1733_v14 = vld [vmem:[#allocation3 + $0x20] sm:$0xff] }
0x1b90   :  { %5069 = vmatmul.mubr.f32.vlgmr.msra.gmra.mxu1 %v5883_v0  ;;  %5057 = vmatprep.mubr.msk.f32.mxu0 %vm330_vm2, %v1733_v14 }
0x1b91   :  { %5082 = vmatprep.subr.mxu1 %v5883_v0  ;;  %5090 = vmatprep.mubr.msk.f32.mxu1 %vm5884_vm0, %v5883_v0 }
0x1b92   :  { %5083 = vmatpush3.msra.mxu1 %v6367_v1 }
0x1b93   :  { %5084 = vmatprep.subr.mxu1 %v5883_v0 }
0x1b94   :  { %5085 = vmatpush3.msra.mxu1 %v6373_v3 }
0x1b95   :  { %5086 = vmatprep.subr.mxu1 %v5883_v0 }
0x1b96   :  { %5087 = vmatpush3.msra.mxu1 %v6380_v4 }
0x1b97   :  { %5088 = vmatprep.subr.mxu1 %v5883_v0 }
0x1b98   :  { %5089 = vmatpush3.msra.mxu1 %v6387_v10 }
0x1b99   :  { %5104 = vmatprep.subr.mxu1 %v5883_v0 }
0x1c48   :  { %v1685_v35 = vpop.f32.mrf.mxu1 }
0x1c49   :  { %v1689_v15 = vadd.f32 %v1685_v35, %v1090_v2 }
0x1c4a   :  { %v5042_v16 = vpop.f32.mrf.mxu1 }
0x1c4b   :  { %5483 = vtanh.f32 %v1689_v15  ;;  %v4584_v8 = vmul.f32 -1.442695, %v1689_v15 }
0x1c50   :  { %v1927_v19 = vpop.f32.mrf.mxu1 }
0x1c51   :  { %v1931_v6 = vadd.f32 %v1927_v19, %v1826_v5 }
0x1c52   :  { %v5070_v53 = vpop.f32.mrf.mxu1 }
0x1c53   :  { %5485 = vtanh.f32 %v1931_v6  ;;  %v4592_v41 = vmul.f32 -1.442695, %v1931_v6 }
0x1c54   :  { %5487 = vpow2.f32 %v4584_v8 }
0x1c55   :  { %5489 = vpow2.f32 %v4592_v41 }
0x1c58   :  { %v5484_v20 = vpop.eup %5483 }
0x1c59   :  { %1699 = vrot.lane.b32.xlu0 %v5484_v20, %s5885_s3 }
0x1c60   :  { %v5486_v21 = vpop.eup %5485 }
0x1c61   :  { %1941 = vrot.lane.b32.xlu1 %v5486_v21, %s5885_s3  ;;  %v5488_v7 = vpop.eup %5487 }
0x1c62   :  { %v1693_v22 = vadd.f32 1.0, %v5488_v7  ;;  %v5490_v54 = vpop.eup %5489 }
0x1c63   :  { %v1935_v23 = vadd.f32 1.0, %v5490_v54 }
0x1c64   :  { %5491 = vrcp.f32 %v1693_v22 }
0x1c65   :  { %5493 = vrcp.f32 %v1935_v23 }
0x1c71   :  { %v5492_v55 = vpop.eup %5491 }
0x1c72   :  { %v5494_v56 = vpop.eup %5493  ;;  %v1697_v29 = vmul.f32 %v5492_v55, %v6360_v42 }
0x1c73   :  { %v1939_v32 = vmul.f32 0.0, %v5494_v56 }
0x1ccb   :  { %v1700_v25 = vpop.permute.xlu0 %1699 }
0x1ccc   :  { %v1702_v26 = vmul.f32 %v5492_v55, %v1700_v25 }
0x1cce   :  { %1704 = vrot.lane.b32.xlu0 %v1702_v26, %s5886_s4 }
0x1cd3   :  { %v1942_v27 = vpop.permute.xlu1 %1941 }
0x1cd4   :  { %v1944_v28 = vmul.f32 %v5494_v56, %v1942_v27 }
0x1cd6   :  { %1946 = vrot.lane.b32.xlu1 %v1944_v28, %s5886_s4 }
0x1d40   :  { %v1705_v30 = vpop.permute.xlu0 %1704 }
0x1d41   :  { %v6429_v31 = vadd.f32 %v1705_v30, %v1697_v29 }
0x1d43   :  { %5495 = vtanh.f32 %v6429_v31 }
0x1d48   :  { %v1947_v33 = vpop.permute.xlu1 %1946 }
0x1d49   :  { %v1949_v37 = vadd.f32 %v1947_v33, %v1939_v32 }
0x1d4b   :  { %5497 = vtanh.f32 %v1949_v37 }
0x1d50   :  { %v5496_v38 = vpop.eup %5495 }
0x1d51   :  { %1710 = vrot.lane.b32.xlu0 %v5496_v38, %s5885_s3 }
0x1d58   :  { %v5498_v39 = vpop.eup %5497 }
0x1d59   :  { %1952 = vrot.lane.b32.xlu1 %v5498_v39, %s5885_s3 }
0x1dc3   :  { %v1711_v40 = vpop.permute.xlu0 %1710 }
0x1dc4   :  { %v1713_v43 = vmul.f32 %v5492_v55, %v1711_v40 }
0x1dc6   :  { %1715 = vrot.lane.b32.xlu0 %v1713_v43, %s5886_s4 }
0x1dcb   :  { %v1953_v44 = vpop.permute.xlu1 %1952 }
0x1dcc   :  { %v1955_v45 = vmul.f32 %v5494_v56, %v1953_v44 }
0x1dce   :  { %1957 = vrot.lane.b32.xlu1 %v1955_v45, %s5886_s4 }
0x1e38   :  { %v6436_v46 = vpop.permute.xlu0 %1715 }
0x1e39   :  { %1719 = vst.msk [vmem:[#allocation3 + $0x28] sm:$0xff] %vm330_vm2, %v6436_v46 }
0x1e40   :  { %v1958_v47 = vpop.permute.xlu1 %1957  ;;  %v1734_v48 = vld [vmem:[#allocation3 + $0x28] sm:$0xff] }
0x1e41   :  { %1960 = vst.msk [vmem:[#allocation2] sm:$0xff] %vm330_vm2, %v1958_v47  ;;  %5058 = vmatmul.mubr.msk.f32.gmra.mxu0 %vm330_vm2, %v1734_v48 }
0x1e42   :  { %5079 = vmatprep.mubr.msk.f32.mxu0 %vm5884_vm0, %v5883_v0 }
0x1e45   :  { %5080 = vmatmul.mubr.msk.f32.vlgmr.msra.gmra.mxu0 %vm330_vm2, %v1958_v47 }
0x1e46   :  { %5094 = vmatpush3.msra.mxu0 %v6367_v1  ;;  %5101 = vmatprep.mubr.msk.f32.mxu0 %vm5884_vm0, %v5883_v0 }
0x1e47   :  { %5095 = vmatprep.subr.mxu0 %v5883_v0 }
0x1e48   :  { %5096 = vmatpush3.msra.mxu0 %v6373_v3 }
0x1e49   :  { %5097 = vmatprep.subr.mxu0 %v5883_v0 }
0x1e4a   :  { %5098 = vmatpush3.msra.mxu0 %v6380_v4 }
0x1e4b   :  { %5099 = vmatprep.subr.mxu0 %v5883_v0 }
0x1e4c   :  { %5100 = vmatpush3.msra.mxu0 %v6387_v10 }
0x1e4d   :  { %5115 = vmatprep.subr.mxu0 %v5883_v0 }
0x1f01   :  { %v6457_v51 = vpop.f32.mrf.mxu0 }
0x1f03   :  { %v6459_v36 = vpop.f32.mrf.mxu0 }
0x1f05   :  { %v2030_v57 = vpop.f32.mrf.mxu0 }
0x1f06   :  { %v2034_v58 = vadd.f32 %v2030_v57, %v1831_v52 }
0x1f07   :  { %v5081_v59 = vpop.f32.mrf.mxu0 }
0x1f08   :  { %5499 = vtanh.f32 %v2034_v58  ;;  %v4594_v61 = vmul.f32 -1.442695, %v2034_v58 }
0x1f0a   :  { %5501 = vpow2.f32 %v4594_v61 }
0x1f15   :  { %v5500_v60 = vpop.eup %5499 }
0x1f16   :  { %2044 = vrot.lane.b32.xlu0 %v5500_v60, %s5885_s3 }
0x1f17   :  { %v5502_v62 = vpop.eup %5501 }
0x1f18   :  { %v2038_v42 = vadd.f32 1.0, %v5502_v62 }
0x1f1a   :  { %5503 = vrcp.f32 %v2038_v42 }
0x1f27   :  { %v5504_v63 = vpop.eup %5503 }
0x1f28   :  { %v2042_v13 = vmul.f32 %v5504_v63, %v1949_v37 }
0x1f88   :  { %v2045_v11 = vpop.permute.xlu0 %2044 }
0x1f89   :  { %v2047_v12 = vmul.f32 %v5504_v63, %v2045_v11 }
0x1f8b   :  { %2049 = vrot.lane.b32.xlu1 %v2047_v12, %s5886_s4 }
0x1ffd   :  { %v2050_v14 = vpop.permute.xlu1 %2049 }
0x1ffe   :  { %v2052_v2 = vadd.f32 %v2050_v14, %v2042_v13  ;;  %v2476_v14 = vld [vmem:[#allocation12] sm:$0xf] }
0x2000   :  { %5505 = vtanh.f32 %v2052_v2 }
0x200d   :  { %v5506_v9 = vpop.eup %5505 }
0x200e   :  { %2055 = vrot.lane.b32.xlu0 %v5506_v9, %s5885_s3 }
0x2080   :  { %v2056_v35 = vpop.permute.xlu0 %2055 }
0x2081   :  { %v2058_v15 = vmul.f32 %v5504_v63, %v2056_v35 }
0x2083   :  { %2060 = vrot.lane.b32.xlu1 %v2058_v15, %s5886_s4  ;;  %v2482_v15 = vld [vmem:[%s7076_s11] sm:$0xff] }
0x20f5   :  { %v2061_v16 = vpop.permute.xlu1 %2060 }
0x20f6   :  { %2063 = vst.msk [vmem:[#allocation2 + $0x8] sm:$0xff] %vm330_vm2, %v2061_v16  ;;  %5091 = vmatmul.mubr.msk.f32.vlgmr.msra.gmra.mxu1 %vm330_vm2, %v2061_v16  ;;  %v6527_v16 = vld [vmem:[%s7047_s12 + $0x18] sm:$0xff] }
0x20f7   :  { %5105 = vmatpush3.msra.mxu1 %v6367_v1  ;;  %5112 = vmatprep.mubr.msk.f32.mxu1 %vm5884_vm0, %v5883_v0 }
0x20f8   :  { %5106 = vmatprep.subr.mxu1 %v5883_v0 }
0x20f9   :  { %5107 = vmatpush3.msra.mxu1 %v6373_v3 }
0x20fa   :  { %5108 = vmatprep.subr.mxu1 %v5883_v0 }
0x20fb   :  { %5109 = vmatpush3.msra.mxu1 %v6380_v4 }
0x20fc   :  { %5110 = vmatprep.subr.mxu1 %v5883_v0 }
0x20fd   :  { %5111 = vmatpush3.msra.mxu1 %v6387_v10 }
0x20fe   :  { %5377 = vmatprep.subr.mxu1 %v5883_v0 }
0x21b6   :  { %v2133_v5 = vpop.f32.mrf.mxu1 }
0x21b7   :  { %v2137_v19 = vadd.f32 %v2133_v5, %v1836_v17  ;;  %v6533_v17 = vld [vmem:[%s7047_s12 + $0x10] sm:$0xff]  ;;  %v2483_v5 = vld [vmem:[%s7076_s11 + $0x8] sm:$0xff] }
0x21b8   :  { %v5092_v6 = vpop.f32.mrf.mxu1 }
0x21b9   :  { %5507 = vtanh.f32 %v2137_v19  ;;  %v4596_v20 = vmul.f32 -1.442695, %v2137_v19  ;;  %v6545_v19 = vld [vmem:[%s7047_s12 + $0x8] sm:$0xff]  ;;  %v6553_v6 = vld [vmem:[%s7047_s12] sm:$0xff] }
0x21bb   :  { %5509 = vpow2.f32 %v4596_v20 }
0x21c6   :  { %v5508_v53 = vpop.eup %5507 }
0x21c7   :  { %2147 = vrot.lane.b32.xlu0 %v5508_v53, %s5885_s3  ;;  %v2484_v53 = vld [vmem:[%s7076_s11 + $0x10] sm:$0xff] }
0x21c8   :  { %v5510_v21 = vpop.eup %5509 }
0x21c9   :  { %v2141_v8 = vadd.f32 1.0, %v5510_v21 }
0x21cb   :  { %5511 = vrcp.f32 %v2141_v8 }
0x21d8   :  { %v5512_v41 = vpop.eup %5511 }
0x21d9   :  { %v2145_v54 = vmul.f32 %v5512_v41, %v2052_v2 }
0x2239   :  { %v2148_v7 = vpop.permute.xlu0 %2147 }
0x223a   :  { %v2150_v22 = vmul.f32 %v5512_v41, %v2148_v7 }
0x223c   :  { %2152 = vrot.lane.b32.xlu1 %v2150_v22, %s5886_s4 }
0x22ae   :  { %v2153_v23 = vpop.permute.xlu1 %2152 }
0x22af   :  { %v2155_v55 = vadd.f32 %v2153_v23, %v2145_v54  ;;  %v6583_v23 = vld [vmem:[#allocation13] ss:$0 sm:$0xff] }
0x22b1   :  { %5513 = vtanh.f32 %v2155_v55 }
0x22be   :  { %v5514_v25 = vpop.eup %5513 }
0x22bf   :  { %2158 = vrot.lane.b32.xlu0 %v5514_v25, %s5885_s3 }
0x2331   :  { %v2159_v26 = vpop.permute.xlu0 %2158 }
0x2332   :  { %v2161_v56 = vmul.f32 %v5512_v41, %v2159_v26 }
0x2334   :  { %2163 = vrot.lane.b32.xlu1 %v2161_v56, %s5886_s4 }
0x23a6   :  { %v2164_v27 = vpop.permute.xlu1 %2163 }
0x23a7   :  { %2166 = vst.msk [vmem:[#allocation2 + $0x10] sm:$0xff] %vm330_vm2, %v2164_v27  ;;  %5102 = vmatmul.mubr.msk.f32.vlgmr.msra.gmra.mxu0 %vm330_vm2, %v2164_v27 }
0x23a8   :  { %5116 = vmatpush3.msra.mxu0 %v6367_v1  ;;  %5123 = vmatprep.mubr.msk.f32.mxu0 %vm5884_vm0, %v5883_v0  ;;  %v1841_v1 = vadd.f32 %v6455_v49, %v6421_v18  ;;  %v1846_v49 = vadd.f32 %v6421_v18, %v6459_v36 }
0x23a9   :  { %5117 = vmatprep.subr.mxu0 %v5883_v0 }
0x23aa   :  { %5118 = vmatpush3.msra.mxu0 %v6373_v3 }
0x23ab   :  { %5119 = vmatprep.subr.mxu0 %v5883_v0 }
0x23ac   :  { %5120 = vmatpush3.msra.mxu0 %v6380_v4 }
0x23ad   :  { %5121 = vmatprep.subr.mxu0 %v5883_v0 }
0x23ae   :  { %5122 = vmatpush3.msra.mxu0 %v6387_v10 }
0x23af   :  { %5126 = vmatprep.subr.mxu0 %v5883_v0 }
0x2467   :  { %v2236_v28 = vpop.f32.mrf.mxu0 }
0x2468   :  { %v2240_v29 = vadd.f32 %v2236_v28, %v1841_v1 }
0x2469   :  { %v5103_v30 = vpop.f32.mrf.mxu0 }
0x246a   :  { %5515 = vtanh.f32 %v2240_v29  ;;  %v4598_v3 = vmul.f32 -1.442695, %v2240_v29 }
0x246c   :  { %5517 = vpow2.f32 %v4598_v3 }
0x2477   :  { %v5516_v32 = vpop.eup %5515 }
0x2478   :  { %2250 = vrot.lane.b32.xlu0 %v5516_v32, %s5885_s3 }
0x2479   :  { %v5518_v33 = vpop.eup %5517 }
0x247a   :  { %v2244_v4 = vadd.f32 1.0, %v5518_v33 }
0x247c   :  { %5519 = vrcp.f32 %v2244_v4 }
0x2489   :  { %v5520_v37 = vpop.eup %5519 }
0x248a   :  { %v2248_v39 = vmul.f32 %v5520_v37, %v2155_v55 }
0x24ea   :  { %v2251_v38 = vpop.permute.xlu0 %2250 }
0x24eb   :  { %v2253_v10 = vmul.f32 %v5520_v37, %v2251_v38 }
0x24ed   :  { %2255 = vrot.lane.b32.xlu1 %v2253_v10, %s5886_s4 }
0x255f   :  { %v2256_v40 = vpop.permute.xlu1 %2255 }
0x2560   :  { %v2258_v43 = vadd.f32 %v2256_v40, %v2248_v39 }
0x2562   :  { %5521 = vtanh.f32 %v2258_v43 }
0x256f   :  { %v5522_v44 = vpop.eup %5521 }
0x2570   :  { %2261 = vrot.lane.b32.xlu0 %v5522_v44, %s5885_s3 }
0x25e2   :  { %v2262_v45 = vpop.permute.xlu0 %2261 }
0x25e3   :  { %v2264_v47 = vmul.f32 %v5520_v37, %v2262_v45 }
0x25e5   :  { %2266 = vrot.lane.b32.xlu1 %v2264_v47, %s5886_s4 }
0x2657   :  { %v2267_v48 = vpop.permute.xlu1 %2266 }
0x2658   :  { %2269 = vst.msk [vmem:[#allocation2 + $0x18] sm:$0xff] %vm330_vm2, %v2267_v48  ;;  %5113 = vmatmul.mubr.msk.f32.vlgmr.msra.gmra.mxu1 %vm330_vm2, %v2267_v48 }
0x2659   :  { %5137 = vmatprep.mubr.msk.f32.mxu1 %vm5884_vm0, %v5883_v0  ;;  %5378 = vmatpush3.msk.msra.mxu1 %vm2509_vm3, %v2476_v14 }
0x265a   :  { %5165 = vmatprep.subr.mxu1 %v5883_v0 }
0x2718   :  { %v2339_v50 = vpop.f32.mrf.mxu1 }
0x2719   :  { %v2343_v52 = vadd.f32 %v2339_v50, %v1846_v49 }
0x271a   :  { %v5114_v57 = vpop.f32.mrf.mxu1 }
0x271b   :  { %5523 = vtanh.f32 %v2343_v52  ;;  %v4600_v59 = vmul.f32 -1.442695, %v2343_v52 }
0x271d   :  { %5525 = vpow2.f32 %v4600_v59 }
0x2728   :  { %v5524_v58 = vpop.eup %5523 }
0x2729   :  { %2353 = vrot.lane.b32.xlu0 %v5524_v58, %s5885_s3 }
0x272a   :  { %v5526_v60 = vpop.eup %5525 }
0x272b   :  { %v2347_v61 = vadd.f32 1.0, %v5526_v60 }
0x272d   :  { %5527 = vrcp.f32 %v2347_v61 }
0x273a   :  { %v5528_v62 = vpop.eup %5527 }
0x273b   :  { %v2351_v11 = vmul.f32 %v5528_v62, %v2258_v43 }
0x279b   :  { %v2354_v42 = vpop.permute.xlu0 %2353 }
0x279c   :  { %v2356_v63 = vmul.f32 %v5528_v62, %v2354_v42  ;;  %v2486_v42 = vld [vmem:[%s7076_s11 + $0x20] sm:$0xff] }
0x279e   :  { %2358 = vrot.lane.b32.xlu1 %v2356_v63, %s5886_s4 }
0x2810   :  { %v2359_v12 = vpop.permute.xlu1 %2358 }
0x2811   :  { %v6510_v36 = vadd.f32 %v2359_v12, %v2351_v11 }
0x2813   :  { %5529 = vtanh.f32 %v6510_v36 }
0x2820   :  { %v5530_v13 = vpop.eup %5529 }
0x2821   :  { %2364 = vrot.lane.b32.xlu0 %v5530_v13, %s5885_s3 }
0x2893   :  { %v2365_v2 = vpop.permute.xlu0 %2364 }
0x2894   :  { %v2367_v9 = vmul.f32 %v5528_v62, %v2365_v2  ;;  %v2485_v62 = vld [vmem:[%s7076_s11 + $0x18] sm:$0xff] }
0x2895   :  { %5138 = vmatmul.mubr.msk.f32.vlgmr.msra.gmra.mxu1 %vm2493_vm4, %v2485_v62  ;;  %v6702_v62 = vld [vmem:[#allocation15 + $0x8] sm:$0xff] }
0x2896   :  { %2369 = vrot.lane.b32.xlu1 %v2367_v9, %s5886_s4  ;;  %5166 = vmatpush3.msra.mxu1 %v6527_v16 }
0x2897   :  { %5140 = vmatprep.mubr.msk.f32.mxu1 %vm5884_vm0, %v5883_v0  ;;  %5167 = vmatprep.subr.mxu1 %v5883_v0 }
0x2898   :  { %5168 = vmatpush3.msra.mxu1 %v6533_v17 }
0x2899   :  { %5141 = vmatmul.mubr.msk.f32.gmra.mxu1 %vm2493_vm4, %v2486_v42  ;;  %5169 = vmatprep.subr.mxu1 %v5883_v0  ;;  %v6706_v42 = vld [vmem:[#allocation15] sm:$0xff] }
0x289a   :  { %5170 = vmatpush3.msra.mxu1 %v6545_v19  ;;  %5173 = vmatprep.mubr.msk.f32.mxu1 %vm5884_vm0, %v5883_v0 }
0x289b   :  { %5171 = vmatprep.subr.mxu1 %v5883_v0 }
0x289c   :  { %5172 = vmatpush3.msra.mxu1 %v6553_v6 }
0x289d   :  { %5187 = vmatprep.subr.mxu1 %v5883_v0 }
0x2908   :  { %v2370_v35 = vpop.permute.xlu1 %2369 }
0x2909   :  { %2372 = vst.msk [vmem:[#allocation2 + $0x20] sm:$0xff] %vm330_vm2, %v2370_v35  ;;  %5124 = vmatmul.mubr.msk.f32.vlgmr.msra.gmra.mxu0 %vm330_vm2, %v2370_v35 }
0x290a   :  { %5127 = vmatpush3.msk.msra.mxu0 %vm2509_vm3, %v2476_v14  ;;  %5128 = vmatprep.mubr.msk.f32.mxu0 %vm5884_vm0, %v5883_v0 }
0x290b   :  { %5143 = vmatprep.subr.mxu0 %v5883_v0 }
0x290d   :  { %5129 = vmatmul.mubr.msk.f32.vlgmr.msra.gmra.mxu0 %vm2493_vm4, %v2482_v15 }
0x290e   :  { %5144 = vmatpush3.msra.mxu0 %v6527_v16  ;;  %5131 = vmatprep.mubr.msk.f32.mxu0 %vm5884_vm0, %v5883_v0 }
0x290f   :  { %5145 = vmatprep.subr.mxu0 %v5883_v0 }
0x2910   :  { %5146 = vmatpush3.msra.mxu0 %v6533_v17 }
0x2911   :  { %5132 = vmatmul.mubr.msk.f32.gmra.mxu0 %vm2493_vm4, %v2483_v5  ;;  %5147 = vmatprep.subr.mxu0 %v5883_v0 }
0x2912   :  { %5148 = vmatpush3.msra.mxu0 %v6545_v19  ;;  %5134 = vmatprep.mubr.msk.f32.mxu0 %vm5884_vm0, %v5883_v0 }
0x2913   :  { %5149 = vmatprep.subr.mxu0 %v5883_v0 }
0x2914   :  { %5150 = vmatpush3.msra.mxu0 %v6553_v6 }
0x2915   :  { %5135 = vmatmul.mubr.msk.f32.gmra.mxu0 %vm2493_vm4, %v2484_v53  ;;  %5154 = vmatprep.subr.mxu0 %v5883_v0 }
0x2916   :  { %5151 = vmatprep.mubr.msk.f32.mxu0 %vm5884_vm0, %v5883_v0 }
0x2919   :  { %5152 = vmatmul.mubr.msk.f32.vlgmr.msra.gmra.mxu0 %vm330_vm2, %v6272_v34  ;;  %v1851_v34 = vadd.f32 %v6457_v51, %v6421_v18 }
0x291a   :  { %5155 = vmatpush3.msra.mxu0 %v6527_v16  ;;  %5162 = vmatprep.mubr.msk.f32.mxu0 %vm5884_vm0, %v5883_v0 }
0x291b   :  { %5156 = vmatprep.subr.mxu0 %v5883_v0 }
0x291c   :  { %5157 = vmatpush3.msra.mxu0 %v6533_v17 }
0x291d   :  { %5158 = vmatprep.subr.mxu0 %v5883_v0 }
0x291e   :  { %5159 = vmatpush3.msra.mxu0 %v6545_v19 }
0x291f   :  { %5160 = vmatprep.subr.mxu0 %v5883_v0 }
0x2920   :  { %5161 = vmatpush3.msra.mxu0 %v6553_v6 }
0x2921   :  { %5176 = vmatprep.subr.mxu0 %v5883_v0 }
0x2955   :  { %v6630_v13 = vpop.f32.mrf.mxu1 }
0x2957   :  { %v5139_v14 = vpop.f32.mrf.mxu1 }
0x2959   :  { %v6632_v2 = vpop.f32.mrf.mxu1 }
0x295b   :  { %v5142_v9 = vpop.f32.mrf.mxu1 }
0x29c9   :  { %v2442_v20 = vpop.f32.mrf.mxu0 }
0x29ca   :  { %v6581_v21 = vadd.f32 %v2442_v20, %v1851_v34 }
0x29cb   :  { %v5125_v8 = vpop.f32.mrf.mxu0 }
0x29cd   :  { %v2579_v41 = vpop.f32.mrf.mxu0 }
0x29ce   :  { %v2580_v26 = vadd.f32 %v6583_v23, %v2579_v41 }
0x29cf   :  { %v5130_v7 = vpop.f32.mrf.mxu0 }
0x29d1   :  { %v2584_v22 = vpop.f32.mrf.mxu0 }
0x29d3   :  { %v5133_v54 = vpop.f32.mrf.mxu0 }
0x29d5   :  { %v6585_v55 = vpop.f32.mrf.mxu0 }
0x29d6   :  { %v2590_v15 = vadd.f32 %v6583_v23, %v6585_v55 }
0x29d7   :  { %v5136_v25 = vpop.f32.mrf.mxu0 }
0x29d9   :  { %v2677_v56 = vpop.f32.mrf.mxu0 }
0x29da   :  { %v2681_v27 = vadd.f32 %v2677_v56, %v2580_v26  ;;  %v3126_v56 = vld [vmem:[%s7049_s14 + $0x18] sm:$0xff] }
0x29db   :  { %v5153_v1 = vpop.f32.mrf.mxu0 }
0x29dc   :  { %5531 = vtanh.f32 %v2681_v27  ;;  %v4611_v51 = vmul.f32 -1.442695, %v2681_v27  ;;  %v3125_v1 = vld [vmem:[%s7049_s14 + $0x10] sm:$0xff] }
0x29de   :  { %5533 = vpow2.f32 %v4611_v51  ;;  %v3123_v51 = vld [vmem:[%s7049_s14] sm:$0xff] }
0x29e9   :  { %v5532_v18 = vpop.eup %5531 }
0x29ea   :  { %2691 = vrot.lane.b32.xlu0 %v5532_v18, %s5885_s3  ;;  %v3124_v18 = vld [vmem:[%s7049_s14 + $0x8] sm:$0xff] }
0x29eb   :  { %v5534_v28 = vpop.eup %5533 }
0x29ec   :  { %v2685_v29 = vadd.f32 1.0, %v5534_v28 }
0x29ee   :  { %5535 = vrcp.f32 %v2685_v29 }
0x29fb   :  { %v5536_v30 = vpop.eup %5535 }
0x29fc   :  { %v2689_v33 = vmul.f32 %v5536_v30, %v6265_v24  ;;  %v2585_v24 = vadd.f32 %v6583_v23, %v2584_v22 }
0x2a5c   :  { %v2692_v32 = vpop.permute.xlu0 %2691 }
0x2a5d   :  { %v2694_v3 = vmul.f32 %v5536_v30, %v2692_v32  ;;  %v2595_v32 = vadd.f32 %v6583_v23, %v6630_v13 }
0x2a5f   :  { %2696 = vrot.lane.b32.xlu1 %v2694_v3, %s5886_s4 }
0x2ad1   :  { %v2697_v4 = vpop.permute.xlu1 %2696 }
0x2ad2   :  { %v2699_v37 = vadd.f32 %v2697_v4, %v2689_v33 }
0x2ad4   :  { %5537 = vtanh.f32 %v2699_v37 }
0x2ae1   :  { %v5538_v38 = vpop.eup %5537 }
0x2ae2   :  { %2702 = vrot.lane.b32.xlu0 %v5538_v38, %s5885_s3 }
0x2b54   :  { %v2703_v10 = vpop.permute.xlu0 %2702 }
0x2b55   :  { %v2705_v39 = vmul.f32 %v5536_v30, %v2703_v10 }
0x2b57   :  { %2707 = vrot.lane.b32.xlu1 %v2705_v39, %s5886_s4 }
0x2bc9   :  { %v2708_v40 = vpop.permute.xlu1 %2707 }
0x2bca   :  { %2710 = vst.msk [vmem:[#allocation2] sm:$0xff] %vm330_vm2, %v2708_v40  ;;  %5163 = vmatmul.mubr.msk.f32.vlgmr.msra.gmra.mxu0 %vm330_vm2, %v2708_v40 }
0x2bcb   :  { %5177 = vmatpush3.msra.mxu0 %v6527_v16  ;;  %5184 = vmatprep.mubr.msk.f32.mxu0 %vm5884_vm0, %v5883_v0 }
0x2bcc   :  { %5178 = vmatprep.subr.mxu0 %v5883_v0 }
0x2bcd   :  { %5179 = vmatpush3.msra.mxu0 %v6533_v17 }
0x2bce   :  { %5180 = vmatprep.subr.mxu0 %v5883_v0 }
0x2bcf   :  { %5181 = vmatpush3.msra.mxu0 %v6545_v19 }
0x2bd0   :  { %5182 = vmatprep.subr.mxu0 %v5883_v0 }
0x2bd1   :  { %5183 = vmatpush3.msra.mxu0 %v6553_v6  ;;  %v3132_v28 = vld [vmem:[#allocation2] sm:$0xff] }
0x2bd2   :  { %5198 = vmatprep.subr.mxu0 %v5883_v0 }
0x2c8a   :  { %v2780_v43 = vpop.f32.mrf.mxu0 }
0x2c8b   :  { %v2784_v44 = vadd.f32 %v2780_v43, %v2585_v24 }
0x2c8c   :  { %v5164_v45 = vpop.f32.mrf.mxu0 }
0x2c8d   :  { %5539 = vtanh.f32 %v2784_v44  ;;  %v4613_v48 = vmul.f32 -1.442695, %v2784_v44 }
0x2c8f   :  { %5541 = vpow2.f32 %v4613_v48 }
0x2c9a   :  { %v5540_v47 = vpop.eup %5539 }
0x2c9b   :  { %2794 = vrot.lane.b32.xlu0 %v5540_v47, %s5885_s3 }
0x2c9c   :  { %v5542_v49 = vpop.eup %5541 }
0x2c9d   :  { %v2788_v50 = vadd.f32 1.0, %v5542_v49 }
0x2c9f   :  { %5543 = vrcp.f32 %v2788_v50 }
0x2cac   :  { %v5544_v52 = vpop.eup %5543 }
0x2cad   :  { %v2792_v59 = vmul.f32 %v5544_v52, %v2699_v37 }
0x2d0d   :  { %v2795_v57 = vpop.permute.xlu0 %2794 }
0x2d0e   :  { %v2797_v58 = vmul.f32 %v5544_v52, %v2795_v57 }
0x2d10   :  { %2799 = vrot.lane.b32.xlu1 %v2797_v58, %s5886_s4 }
0x2d82   :  { %v2800_v60 = vpop.permute.xlu1 %2799 }
0x2d83   :  { %v2802_v61 = vadd.f32 %v2800_v60, %v2792_v59  ;;  %v6695_v60 = vld [vmem:[#allocation15 + $0x18] sm:$0xff] }
0x2d85   :  { %5545 = vtanh.f32 %v2802_v61 }
0x2d92   :  { %v5546_v63 = vpop.eup %5545 }
0x2d93   :  { %2805 = vrot.lane.b32.xlu0 %v5546_v63, %s5885_s3 }
0x2e05   :  { %v2806_v11 = vpop.permute.xlu0 %2805 }
0x2e06   :  { %v2808_v12 = vmul.f32 %v5544_v52, %v2806_v11 }
0x2e08   :  { %2810 = vrot.lane.b32.xlu1 %v2808_v12, %s5886_s4 }
0x2e7a   :  { %v2811_v35 = vpop.permute.xlu1 %2810 }
0x2e7b   :  { %2813 = vst.msk [vmem:[#allocation2 + $0x8] sm:$0xff] %vm330_vm2, %v2811_v35  ;;  %5174 = vmatmul.mubr.msk.f32.vlgmr.msra.gmra.mxu1 %vm330_vm2, %v2811_v35 }
0x2e7c   :  { %5188 = vmatpush3.msra.mxu1 %v6527_v16  ;;  %5195 = vmatprep.mubr.msk.f32.mxu1 %vm5884_vm0, %v5883_v0 }
0x2e7d   :  { %5189 = vmatprep.subr.mxu1 %v5883_v0 }
0x2e7e   :  { %5190 = vmatpush3.msra.mxu1 %v6533_v17 }
0x2e7f   :  { %5191 = vmatprep.subr.mxu1 %v5883_v0 }
0x2e80   :  { %5192 = vmatpush3.msra.mxu1 %v6545_v19 }
0x2e81   :  { %5193 = vmatprep.subr.mxu1 %v5883_v0 }
0x2e82   :  { %5194 = vmatpush3.msra.mxu1 %v6553_v6  ;;  %v3133_v29 = vld [vmem:[#allocation2 + $0x8] sm:$0xff] }
0x2e83   :  { %5221 = vmatprep.subr.mxu1 %v5883_v0 }
0x2f3b   :  { %v2883_v16 = vpop.f32.mrf.mxu1 }
0x2f3c   :  { %v2887_v5 = vadd.f32 %v2883_v16, %v2590_v15  ;;  %v6743_v15 = vld [vmem:[#allocation16] ss:$0 sm:$0xff] }
0x2f3d   :  { %v5175_v53 = vpop.f32.mrf.mxu1 }
0x2f3e   :  { %5547 = vtanh.f32 %v2887_v5  ;;  %v4615_v17 = vmul.f32 -1.442695, %v2887_v5 }
0x2f40   :  { %5549 = vpow2.f32 %v4615_v17 }
0x2f4b   :  { %v5548_v34 = vpop.eup %5547 }
0x2f4c   :  { %2897 = vrot.lane.b32.xlu0 %v5548_v34, %s5885_s3 }
0x2f4d   :  { %v5550_v20 = vpop.eup %5549 }
0x2f4e   :  { %v2891_v19 = vadd.f32 1.0, %v5550_v20 }
0x2f50   :  { %5551 = vrcp.f32 %v2891_v19 }
0x2f5d   :  { %v5552_v8 = vpop.eup %5551 }
0x2f5e   :  { %v2895_v7 = vmul.f32 %v5552_v8, %v2802_v61  ;;  %v6698_v61 = vld [vmem:[#allocation15 + $0x10] sm:$0xff] }
0x2fbe   :  { %v2898_v41 = vpop.permute.xlu0 %2897 }
0x2fbf   :  { %v2900_v6 = vmul.f32 %v5552_v8, %v2898_v41 }
0x2fc1   :  { %2902 = vrot.lane.b32.xlu1 %v2900_v6, %s5886_s4 }
0x3033   :  { %v2903_v22 = vpop.permute.xlu1 %2902 }
0x3034   :  { %v2905_v54 = vadd.f32 %v2903_v22, %v2895_v7 }
0x3036   :  { %5553 = vtanh.f32 %v2905_v54 }
0x3043   :  { %v5554_v55 = vpop.eup %5553 }
0x3044   :  { %2908 = vrot.lane.b32.xlu0 %v5554_v55, %s5885_s3 }
0x30b6   :  { %v2909_v25 = vpop.permute.xlu0 %2908 }
0x30b7   :  { %v2911_v26 = vmul.f32 %v5552_v8, %v2909_v25 }
0x30b9   :  { %2913 = vrot.lane.b32.xlu1 %v2911_v26, %s5886_s4 }
0x312b   :  { %v2914_v27 = vpop.permute.xlu1 %2913 }
0x312c   :  { %2916 = vst.msk [vmem:[#allocation2 + $0x10] sm:$0xff] %vm330_vm2, %v2914_v27  ;;  %5185 = vmatmul.mubr.msk.f32.vlgmr.msra.gmra.mxu0 %vm330_vm2, %v2914_v27 }
0x312d   :  { %5199 = vmatpush3.msra.mxu0 %v3126_v56  ;;  %5206 = vmatprep.mubr.msk.f32.mxu0 %vm5884_vm0, %v5883_v0 }
0x312e   :  { %5200 = vmatprep.subr.mxu0 %v5883_v0 }
0x312f   :  { %5201 = vmatpush3.msra.mxu0 %v3125_v1 }
0x3130   :  { %5202 = vmatprep.subr.mxu0 %v5883_v0 }
0x3131   :  { %5203 = vmatpush3.msra.mxu0 %v3124_v18 }
0x3132   :  { %5204 = vmatprep.subr.mxu0 %v5883_v0 }
0x3133   :  { %5205 = vmatpush3.msra.mxu0 %v3123_v51  ;;  %v3134_v30 = vld [vmem:[#allocation2 + $0x10] sm:$0xff] }
0x3134   :  { %5207 = vmatmul.mubr.msk.f32.vlgmr.msra.gmra.mxu0 %vm330_vm2, %v3132_v28  ;;  %5254 = vmatprep.subr.mxu0 %v5883_v0 }
0x3135   :  { %5209 = vmatprep.mubr.msk.f32.mxu0 %vm5884_vm0, %v5883_v0  ;;  %5255 = vmatpush3.msra.mxu0 %v6695_v60 }
0x3136   :  { %5256 = vmatprep.subr.mxu0 %v5883_v0 }
0x3137   :  { %5257 = vmatpush3.msra.mxu0 %v6698_v61 }
0x3138   :  { %5210 = vmatmul.mubr.msk.f32.gmra.mxu0 %vm330_vm2, %v3133_v29  ;;  %5258 = vmatprep.subr.mxu0 %v5883_v0 }
0x3139   :  { %5212 = vmatprep.mubr.msk.f32.mxu0 %vm5884_vm0, %v5883_v0  ;;  %5259 = vmatpush3.msra.mxu0 %v6702_v62 }
0x313a   :  { %5260 = vmatprep.subr.mxu0 %v5883_v0 }
0x313b   :  { %5261 = vmatpush3.msra.mxu0 %v6706_v42 }
0x313c   :  { %5213 = vmatmul.mubr.msk.f32.gmra.mxu0 %vm330_vm2, %v3134_v30  ;;  %5276 = vmatprep.subr.mxu0 %v5883_v0 }
0x313d   :  { %5215 = vmatprep.mubr.msk.f32.mxu0 %vm5884_vm0, %v5883_v0 }
0x31ec   :  { %v2986_v3 = vpop.f32.mrf.mxu0 }
0x31ed   :  { %v2990_v33 = vadd.f32 %v2986_v3, %v2595_v32 }
0x31ee   :  { %v5186_v4 = vpop.f32.mrf.mxu0 }
0x31ef   :  { %5555 = vtanh.f32 %v2990_v33  ;;  %v4617_v44 = vmul.f32 -1.442695, %v2990_v33 }
0x31f1   :  { %5557 = vpow2.f32 %v4617_v44 }
0x31f4   :  { %v6683_v37 = vpop.f32.mrf.mxu0 }
0x31f5   :  { %v3225_v16 = vadd.f32 %v6743_v15, %v6683_v37 }
0x31f6   :  { %v5208_v38 = vpop.f32.mrf.mxu0 }
0x31f8   :  { %v6685_v10 = vpop.f32.mrf.mxu0 }
0x31fa   :  { %v5211_v39 = vpop.f32.mrf.mxu0 }
0x31fc   :  { %v5556_v40 = vpop.eup %5555  ;;  %v6687_v24 = vpop.f32.mrf.mxu0 }
0x31fd   :  { %3000 = vrot.lane.b32.xlu0 %v5556_v40, %s5885_s3 }
0x31fe   :  { %v5214_v43 = vpop.f32.mrf.mxu0  ;;  %v5558_v45 = vpop.eup %5557 }
0x31ff   :  { %v2994_v47 = vadd.f32 1.0, %v5558_v45 }
0x3201   :  { %5559 = vrcp.f32 %v2994_v47 }
0x320e   :  { %v5560_v48 = vpop.eup %5559 }
0x320f   :  { %v2998_v52 = vmul.f32 %v5560_v48, %v2905_v54 }
0x326f   :  { %v3001_v49 = vpop.permute.xlu0 %3000 }
0x3270   :  { %v3003_v50 = vmul.f32 %v5560_v48, %v3001_v49 }
0x3272   :  { %3005 = vrot.lane.b32.xlu1 %v3003_v50, %s5886_s4 }
0x32e4   :  { %v3006_v57 = vpop.permute.xlu1 %3005 }
0x32e5   :  { %v6691_v58 = vadd.f32 %v3006_v57, %v2998_v52 }
0x32e7   :  { %5561 = vtanh.f32 %v6691_v58 }
0x32f4   :  { %v5562_v59 = vpop.eup %5561 }
0x32f5   :  { %3011 = vrot.lane.b32.xlu0 %v5562_v59, %s5885_s3 }
0x3367   :  { %v3012_v63 = vpop.permute.xlu0 %3011 }
0x3368   :  { %v3014_v11 = vmul.f32 %v5560_v48, %v3012_v63 }
0x336a   :  { %3016 = vrot.lane.b32.xlu1 %v3014_v11, %s5886_s4 }
0x33dc   :  { %v3017_v12 = vpop.permute.xlu1 %3016 }
0x33dd   :  { %3019 = vst.msk [vmem:[#allocation2 + $0x18] sm:$0xff] %vm330_vm2, %v3017_v12  ;;  %5196 = vmatmul.mubr.msk.f32.vlgmr.msra.gmra.mxu1 %vm330_vm2, %v3017_v12 }
0x33de   :  { %5222 = vmatpush3.msra.mxu1 %v6695_v60  ;;  %5229 = vmatprep.mubr.msk.f32.mxu1 %vm5884_vm0, %v5883_v0 }
0x33df   :  { %5223 = vmatprep.subr.mxu1 %v5883_v0 }
0x33e0   :  { %5224 = vmatpush3.msra.mxu1 %v6698_v61 }
0x33e1   :  { %5225 = vmatprep.subr.mxu1 %v5883_v0 }
0x33e2   :  { %5226 = vmatpush3.msra.mxu1 %v6702_v62 }
0x33e3   :  { %5227 = vmatprep.subr.mxu1 %v5883_v0 }
0x33e4   :  { %5228 = vmatpush3.msra.mxu1 %v6706_v42  ;;  %v3135_v13 = vld [vmem:[#allocation2 + $0x18] sm:$0xff] }
0x33e5   :  { %5230 = vmatmul.mubr.msk.f32.vlgmr.msra.gmra.mxu1 %vm330_vm2, %v6436_v46  ;;  %5216 = vmatmul.mubr.msk.f32.gmra.mxu0 %vm330_vm2, %v3135_v13  ;;  %v2600_v46 = vadd.f32 %v6583_v23, %v6632_v2 }
0x33e6   :  { %5232 = vmatprep.subr.mxu1 %v5883_v0  ;;  %5240 = vmatprep.mubr.msk.f32.mxu1 %vm5884_vm0, %v5883_v0 }
0x33e7   :  { %5233 = vmatpush3.msra.mxu1 %v6695_v60  ;;  %5218 = vmatprep.mubr.msk.f32.mxu0 %vm5884_vm0, %v5883_v0 }
0x33e8   :  { %5234 = vmatprep.subr.mxu1 %v5883_v0 }
0x33e9   :  { %5235 = vmatpush3.msra.mxu1 %v6698_v61 }
0x33ea   :  { %5236 = vmatprep.subr.mxu1 %v5883_v0 }
0x33eb   :  { %5237 = vmatpush3.msra.mxu1 %v6702_v62 }
0x33ec   :  { %5238 = vmatprep.subr.mxu1 %v5883_v0 }
0x33ed   :  { %5239 = vmatpush3.msra.mxu1 %v6706_v42 }
0x33ee   :  { %5243 = vmatprep.subr.mxu1 %v5883_v0 }
0x349d   :  { %v3089_v14 = vpop.f32.mrf.mxu1 }
0x349e   :  { %v6741_v9 = vadd.f32 %v3089_v14, %v2600_v46 }
0x349f   :  { %v5197_v35 = vpop.f32.mrf.mxu1 }
0x34a0   :  { %v4619_v43 = vmul.f32 -1.442695, %v6741_v9 }
0x34a5   :  { %v3322_v5 = vpop.f32.mrf.mxu1  ;;  %v6747_v53 = vpop.f32.mrf.mxu0 }
0x34a6   :  { %v3326_v34 = vadd.f32 %v3322_v5, %v3225_v16 }
0x34a7   :  { %v5231_v17 = vpop.f32.mrf.mxu1  ;;  %v5217_v20 = vpop.f32.mrf.mxu0 }
0x34a8   :  { %5563 = vtanh.f32 %v3326_v34  ;;  %v4627_v23 = vmul.f32 -1.442695, %v3326_v34 }
0x34aa   :  { %5565 = vpow2.f32 %v4627_v23 }
0x34b5   :  { %v5564_v19 = vpop.eup %5563 }
0x34b6   :  { %3336 = vrot.lane.b32.xlu0 %v5564_v19, %s5885_s3 }
0x34b7   :  { %v5566_v2 = vpop.eup %5565 }
0x34b8   :  { %v3330_v8 = vadd.f32 1.0, %v5566_v2 }
0x34ba   :  { %5567 = vrcp.f32 %v3330_v8 }
0x34c7   :  { %v5568_v41 = vpop.eup %5567 }
0x34c8   :  { %v3334_v22 = vmul.f32 %v5568_v41, %v6429_v31  ;;  %v3230_v31 = vadd.f32 %v6743_v15, %v6685_v10 }
0x3528   :  { %v3337_v6 = vpop.permute.xlu0 %3336 }
0x3529   :  { %v3339_v7 = vmul.f32 %v5568_v41, %v3337_v6 }
0x352b   :  { %3341 = vrot.lane.b32.xlu1 %v3339_v7, %s5886_s4 }
0x359d   :  { %v3342_v54 = vpop.permute.xlu1 %3341 }
0x359e   :  { %v3344_v55 = vadd.f32 %v3342_v54, %v3334_v22  ;;  %v4602_v54 = vmul.f32 -1.442695, %v6581_v21 }
0x35a0   :  { %5569 = vtanh.f32 %v3344_v55 }
0x35ad   :  { %v5570_v25 = vpop.eup %5569 }
0x35ae   :  { %3347 = vrot.lane.b32.xlu0 %v5570_v25, %s5885_s3 }
0x3620   :  { %v3348_v26 = vpop.permute.xlu0 %3347 }
0x3621   :  { %v3350_v56 = vmul.f32 %v5568_v41, %v3348_v26  ;;  %v3771_v26 = vld [vmem:[#allocation18 + $0x18] sm:$0xff] }
0x3623   :  { %3352 = vrot.lane.b32.xlu1 %v3350_v56, %s5886_s4 }
0x3695   :  { %v3353_v27 = vpop.permute.xlu1 %3352 }
0x3696   :  { %3355 = vst.msk [vmem:[#allocation3] sm:$0xff] %vm330_vm2, %v3353_v27  ;;  %5241 = vmatmul.mubr.msk.f32.vlgmr.msra.gmra.mxu1 %vm330_vm2, %v3353_v27  ;;  %v3770_v27 = vld [vmem:[#allocation18 + $0x10] sm:$0xff] }
0x3697   :  { %5244 = vmatpush3.msra.mxu1 %v6695_v60  ;;  %5251 = vmatprep.mubr.msk.f32.mxu1 %vm5884_vm0, %v5883_v0 }
0x3698   :  { %5245 = vmatprep.subr.mxu1 %v5883_v0 }
0x3699   :  { %5246 = vmatpush3.msra.mxu1 %v6698_v61 }
0x369a   :  { %5247 = vmatprep.subr.mxu1 %v5883_v0 }
0x369b   :  { %5248 = vmatpush3.msra.mxu1 %v6702_v62 }
0x369c   :  { %5249 = vmatprep.subr.mxu1 %v5883_v0 }
0x369d   :  { %5250 = vmatpush3.msra.mxu1 %v6706_v42 }
0x369e   :  { %5265 = vmatprep.subr.mxu1 %v5883_v0 }
0x3756   :  { %v3425_v1 = vpop.f32.mrf.mxu1 }
0x3757   :  { %v3429_v18 = vadd.f32 %v3425_v1, %v3230_v31  ;;  %v3769_v31 = vld [vmem:[#allocation18 + $0x8] sm:$0xff] }
0x3758   :  { %v5242_v51 = vpop.f32.mrf.mxu1 }
0x3759   :  { %5571 = vtanh.f32 %v3429_v18  ;;  %v4629_v29 = vmul.f32 -1.442695, %v3429_v18  ;;  %v3768_v51 = vld [vmem:[#allocation18] sm:$0xff] }
0x375b   :  { %5573 = vpow2.f32 %v4629_v29 }
0x3766   :  { %v5572_v28 = vpop.eup %5571 }
0x3767   :  { %3439 = vrot.lane.b32.xlu0 %v5572_v28, %s5885_s3  ;;  %v3777_v28 = vld [vmem:[#allocation3] sm:$0xff] }
0x3768   :  { %v5574_v30 = vpop.eup %5573 }
0x3769   :  { %v3433_v32 = vadd.f32 1.0, %v5574_v30 }
0x376b   :  { %5575 = vrcp.f32 %v3433_v32 }
0x3778   :  { %v5576_v3 = vpop.eup %5575 }
0x3779   :  { %v3437_v37 = vmul.f32 %v5576_v3, %v3344_v55 }
0x37d9   :  { %v3440_v33 = vpop.permute.xlu0 %3439 }
0x37da   :  { %v3442_v4 = vmul.f32 %v5576_v3, %v3440_v33 }
0x37dc   :  { %3444 = vrot.lane.b32.xlu1 %v3442_v4, %s5886_s4 }
0x384e   :  { %v3445_v38 = vpop.permute.xlu1 %3444 }
0x384f   :  { %v3447_v10 = vadd.f32 %v3445_v38, %v3437_v37  ;;  %v3240_v37 = vadd.f32 %v6743_v15, %v6747_v53 }
0x3851   :  { %5577 = vtanh.f32 %v3447_v10 }
0x3852   :  { %5579 = vtanh.f32 %v6741_v9 }
0x3853   :  { %5581 = vpow2.f32 %v4619_v43 }
0x385e   :  { %v5578_v39 = vpop.eup %5577 }
0x385f   :  { %3450 = vrot.lane.b32.xlu0 %v5578_v39, %s5885_s3  ;;  %v5580_v40 = vpop.eup %5579 }
0x3860   :  { %v5582_v44 = vpop.eup %5581 }
0x3861   :  { %v3097_v45 = vadd.f32 1.0, %v5582_v44 }
0x3863   :  { %3103 = vrot.lane.b32.xlu0 %v5580_v40, %s5885_s3  ;;  %5583 = vrcp.f32 %v3097_v45 }
0x3870   :  { %v5584_v49 = vpop.eup %5583 }
0x3871   :  { %v3101_v59 = vmul.f32 %v5584_v49, %v6691_v58 }
0x38d1   :  { %v3451_v47 = vpop.permute.xlu0 %3450 }
0x38d2   :  { %v3453_v48 = vmul.f32 %v5576_v3, %v3451_v47 }
0x38d4   :  { %3455 = vrot.lane.b32.xlu1 %v3453_v48, %s5886_s4 }
0x38d5   :  { %v3104_v50 = vpop.permute.xlu0 %3103 }
0x38d6   :  { %v3106_v52 = vmul.f32 %v5584_v49, %v3104_v50 }
0x38d8   :  { %3108 = vrot.lane.b32.xlu0 %v3106_v52, %s5886_s4 }
0x3946   :  { %v3456_v57 = vpop.permute.xlu1 %3455 }
0x3947   :  { %3458 = vst.msk [vmem:[#allocation3 + $0x8] sm:$0xff] %vm330_vm2, %v3456_v57  ;;  %5252 = vmatmul.mubr.msk.f32.vlgmr.msra.gmra.mxu1 %vm330_vm2, %v3456_v57 }
0x3948   :  { %5266 = vmatpush3.msra.mxu1 %v6695_v60  ;;  %5273 = vmatprep.mubr.msk.f32.mxu1 %vm5884_vm0, %v5883_v0 }
0x3949   :  { %5267 = vmatprep.subr.mxu1 %v5883_v0 }
0x394a   :  { %v3109_v63 = vpop.permute.xlu0 %3108  ;;  %5268 = vmatpush3.msra.mxu1 %v6698_v61  ;;  %v3235_v61 = vadd.f32 %v6743_v15, %v6687_v24 }
0x394b   :  { %v3111_v11 = vadd.f32 %v3109_v63, %v3101_v59  ;;  %5269 = vmatprep.subr.mxu1 %v5883_v0 }
0x394c   :  { %5270 = vmatpush3.msra.mxu1 %v6702_v62 }
0x394d   :  { %5585 = vtanh.f32 %v3111_v11  ;;  %5271 = vmatprep.subr.mxu1 %v5883_v0 }
0x394e   :  { %5272 = vmatpush3.msra.mxu1 %v6706_v42  ;;  %v3778_v29 = vld [vmem:[#allocation3 + $0x8] sm:$0xff] }
0x394f   :  { %5299 = vmatprep.subr.mxu1 %v5883_v0 }
0x395a   :  { %v5586_v60 = vpop.eup %5585 }
0x395b   :  { %3114 = vrot.lane.b32.xlu0 %v5586_v60, %s5885_s3 }
0x39cd   :  { %v3115_v58 = vpop.permute.xlu0 %3114 }
0x39ce   :  { %v3117_v12 = vmul.f32 %v5584_v49, %v3115_v58 }
0x39d0   :  { %3119 = vrot.lane.b32.xlu0 %v3117_v12, %s5886_s4 }
0x3a07   :  { %v3528_v13 = vpop.f32.mrf.mxu1 }
0x3a08   :  { %v3532_v46 = vadd.f32 %v3528_v13, %v3235_v61 }
0x3a09   :  { %v5253_v62 = vpop.f32.mrf.mxu1 }
0x3a0a   :  { %5587 = vtanh.f32 %v3532_v46  ;;  %v4631_v35 = vmul.f32 -1.442695, %v3532_v46  ;;  %v6852_v46 = vld [vmem:[%s7053_s18 + $0x18] sm:$0xff]  ;;  %v6858_v62 = vld [vmem:[%s7053_s18 + $0x10] sm:$0xff] }
0x3a0c   :  { %5589 = vpow2.f32 %v4631_v35 }
0x3a17   :  { %v5588_v14 = vpop.eup %5587 }
0x3a18   :  { %3542 = vrot.lane.b32.xlu1 %v5588_v14, %s5885_s3  ;;  %v6865_v14 = vld [vmem:[%s7053_s18 + $0x8] sm:$0xff] }
0x3a19   :  { %v5590_v16 = vpop.eup %5589 }
0x3a1a   :  { %v3536_v24 = vadd.f32 1.0, %v5590_v16 }
0x3a1c   :  { %5591 = vrcp.f32 %v3536_v24 }
0x3a29   :  { %v5592_v5 = vpop.eup %5591 }
0x3a2a   :  { %v3540_v20 = vmul.f32 %v5592_v5, %v3447_v10 }
0x3a42   :  { %v3120_v42 = vpop.permute.xlu0 %3119 }
0x3a43   :  { %3122 = vst.msk [vmem:[#allocation2 + $0x20] sm:$0xff] %vm330_vm2, %v3120_v42  ;;  %v6872_v42 = vld [vmem:[%s7053_s18] sm:$0xff] }
0x3a4a   :  { %v3136_v9 = vld [vmem:[#allocation2 + $0x20] sm:$0xff] }
0x3a4b   :  { %5219 = vmatmul.mubr.msk.f32.gmra.mxu0 %vm330_vm2, %v3136_v9 }
0x3a4c   :  { %5262 = vmatprep.mubr.msk.f32.mxu0 %vm5884_vm0, %v5883_v0 }
0x3a8a   :  { %v3543_v34 = vpop.permute.xlu1 %3542 }
0x3a8b   :  { %v3545_v17 = vmul.f32 %v5592_v5, %v3543_v34 }
0x3a8d   :  { %3547 = vrot.lane.b32.xlu1 %v3545_v17, %s5886_s4 }
0x3aff   :  { %v3548_v19 = vpop.permute.xlu1 %3547 }
0x3b00   :  { %v6799_v23 = vadd.f32 %v3548_v19, %v3540_v20  ;;  %v6906_v19 = vld [vmem:[#allocation19] ss:$0 sm:$0xff] }
0x3b02   :  { %5593 = vtanh.f32 %v6799_v23 }
0x3b03   :  { %5595 = vtanh.f32 %v6581_v21 }
0x3b04   :  { %5597 = vpow2.f32 %v4602_v54 }
0x3b0b   :  { %v6802_v2 = vpop.f32.mrf.mxu0 }
0x3b0d   :  { %v5220_v8 = vpop.f32.mrf.mxu0 }
0x3b0f   :  { %v5594_v41 = vpop.eup %5593 }
0x3b10   :  { %3553 = vrot.lane.b32.xlu1 %v5594_v41, %s5885_s3  ;;  %v5596_v22 = vpop.eup %5595 }
0x3b11   :  { %v5598_v55 = vpop.eup %5597 }
0x3b12   :  { %v2450_v25 = vadd.f32 1.0, %v5598_v55 }
0x3b14   :  { %5599 = vrcp.f32 %v2450_v25 }
0x3b21   :  { %v5600_v1 = vpop.eup %5599 }
0x3b22   :  { %v2454_v32 = vmul.f32 %v5600_v1, %v6510_v36 }
0x3b82   :  { %v3554_v6 = vpop.permute.xlu1 %3553 }
0x3b83   :  { %v3556_v7 = vmul.f32 %v5592_v5, %v3554_v6  ;;  %v3245_v5 = vadd.f32 %v6743_v15, %v6802_v2 }
0x3b85   :  { %3558 = vrot.lane.b32.xlu1 %v3556_v7, %s5886_s4 }
0x3b89   :  { %2456 = vrot.lane.b32.xlu1 %v5596_v22, %s5885_s3 }
0x3bf7   :  { %v3559_v56 = vpop.permute.xlu1 %3558 }
0x3bf8   :  { %3561 = vst.msk [vmem:[#allocation3 + $0x10] sm:$0xff] %vm330_vm2, %v3559_v56  ;;  %5263 = vmatmul.mubr.msk.f32.vlgmr.msra.gmra.mxu0 %vm330_vm2, %v3559_v56 }
0x3bf9   :  { %5277 = vmatpush3.msra.mxu0 %v3771_v26  ;;  %5284 = vmatprep.mubr.msk.f32.mxu0 %vm5884_vm0, %v5883_v0 }
0x3bfa   :  { %5278 = vmatprep.subr.mxu0 %v5883_v0 }
0x3bfb   :  { %5279 = vmatpush3.msra.mxu0 %v3770_v27  ;;  %v2457_v21 = vpop.permute.xlu1 %2456 }
0x3bfc   :  { %5280 = vmatprep.subr.mxu0 %v5883_v0  ;;  %v2459_v18 = vmul.f32 %v5600_v1, %v2457_v21 }
0x3bfd   :  { %5281 = vmatpush3.msra.mxu0 %v3769_v31 }
0x3bfe   :  { %5282 = vmatprep.subr.mxu0 %v5883_v0  ;;  %2461 = vrot.lane.b32.xlu1 %v2459_v18, %s5886_s4 }
0x3bff   :  { %5283 = vmatpush3.msra.mxu0 %v3768_v51  ;;  %v3779_v30 = vld [vmem:[#allocation3 + $0x10] sm:$0xff] }
0x3c00   :  { %5285 = vmatmul.mubr.msk.f32.vlgmr.msra.gmra.mxu0 %vm330_vm2, %v3777_v28  ;;  %5321 = vmatprep.subr.mxu0 %v5883_v0 }
0x3c01   :  { %5287 = vmatprep.mubr.msk.f32.mxu0 %vm5884_vm0, %v5883_v0  ;;  %5322 = vmatpush3.msra.mxu0 %v6852_v46 }
0x3c02   :  { %5323 = vmatprep.subr.mxu0 %v5883_v0 }
0x3c03   :  { %5324 = vmatpush3.msra.mxu0 %v6858_v62 }
0x3c04   :  { %5288 = vmatmul.mubr.msk.f32.gmra.mxu0 %vm330_vm2, %v3778_v29  ;;  %5325 = vmatprep.subr.mxu0 %v5883_v0 }
0x3c05   :  { %5290 = vmatprep.mubr.msk.f32.mxu0 %vm5884_vm0, %v5883_v0  ;;  %5326 = vmatpush3.msra.mxu0 %v6865_v14 }
0x3c06   :  { %5327 = vmatprep.subr.mxu0 %v5883_v0 }
0x3c07   :  { %5328 = vmatpush3.msra.mxu0 %v6872_v42 }
0x3c08   :  { %5291 = vmatmul.mubr.msk.f32.gmra.mxu0 %vm330_vm2, %v3779_v30  ;;  %5343 = vmatprep.subr.mxu0 %v5883_v0 }
0x3c09   :  { %5293 = vmatprep.mubr.msk.f32.mxu0 %vm5884_vm0, %v5883_v0 }
0x3c70   :  { %v2462_v3 = vpop.permute.xlu1 %2461 }
0x3c71   :  { %v6828_v33 = vadd.f32 %v2462_v3, %v2454_v32 }
0x3c73   :  { %5601 = vtanh.f32 %v6828_v33 }
0x3c80   :  { %v5602_v4 = vpop.eup %5601 }
0x3c81   :  { %2467 = vrot.lane.b32.xlu1 %v5602_v4, %s5885_s3 }
0x3cb8   :  { %v3631_v38 = vpop.f32.mrf.mxu0 }
0x3cb9   :  { %v3635_v10 = vadd.f32 %v3631_v38, %v3240_v37 }
0x3cba   :  { %v5264_v39 = vpop.f32.mrf.mxu0 }
0x3cbb   :  { %5603 = vtanh.f32 %v3635_v10  ;;  %v4633_v53 = vmul.f32 -1.442695, %v3635_v10 }
0x3cbd   :  { %5605 = vpow2.f32 %v4633_v53 }
0x3cc0   :  { %v6834_v40 = vpop.f32.mrf.mxu0 }
0x3cc2   :  { %v5286_v43 = vpop.f32.mrf.mxu0 }
0x3cc4   :  { %v6836_v44 = vpop.f32.mrf.mxu0 }
0x3cc6   :  { %v5289_v36 = vpop.f32.mrf.mxu0 }
0x3cc8   :  { %v5604_v45 = vpop.eup %5603  ;;  %v6838_v47 = vpop.f32.mrf.mxu0 }
0x3cc9   :  { %3645 = vrot.lane.b32.xlu0 %v5604_v45, %s5885_s3  ;;  %v3875_v45 = vadd.f32 %v6906_v19, %v6836_v44 }
0x3cca   :  { %v5292_v48 = vpop.f32.mrf.mxu0  ;;  %v5606_v52 = vpop.eup %5605 }
0x3ccb   :  { %v3639_v57 = vadd.f32 1.0, %v5606_v52 }
0x3ccd   :  { %5607 = vrcp.f32 %v3639_v57 }
0x3cda   :  { %v5608_v59 = vpop.eup %5607 }
0x3cdb   :  { %v3643_v58 = vmul.f32 %v5608_v59, %v6799_v23  ;;  %v3870_v23 = vadd.f32 %v6906_v19, %v6834_v40 }
0x3cf3   :  { %v2468_v49 = vpop.permute.xlu1 %2467 }
0x3cf4   :  { %v2470_v50 = vmul.f32 %v5600_v1, %v2468_v49 }
0x3cf6   :  { %2472 = vrot.lane.b32.xlu1 %v2470_v50, %s5886_s4 }
0x3d3b   :  { %v3646_v63 = vpop.permute.xlu0 %3645 }
0x3d3c   :  { %v3648_v11 = vmul.f32 %v5608_v59, %v3646_v63 }
0x3d3e   :  { %3650 = vrot.lane.b32.xlu0 %v3648_v11, %s5886_s4 }
0x3d68   :  { %v2473_v60 = vpop.permute.xlu1 %2472 }
0x3d69   :  { %2475 = vst.msk [vmem:[#allocation2 + $0x28] sm:$0xff] %vm330_vm2, %v2473_v60 }
0x3db0   :  { %v3651_v12 = vpop.permute.xlu0 %3650 }
0x3db1   :  { %v6845_v61 = vadd.f32 %v3651_v12, %v3643_v58 }
0x3db3   :  { %5609 = vtanh.f32 %v6845_v61 }
0x3dc0   :  { %v5610_v13 = vpop.eup %5609 }
0x3dc1   :  { %3656 = vrot.lane.b32.xlu0 %v5610_v13, %s5885_s3 }
0x3e33   :  { %v3657_v9 = vpop.permute.xlu0 %3656 }
0x3e34   :  { %v3659_v35 = vmul.f32 %v5608_v59, %v3657_v9 }
0x3e36   :  { %3661 = vrot.lane.b32.xlu0 %v3659_v35, %s5886_s4 }
0x3ea8   :  { %v3662_v16 = vpop.permute.xlu0 %3661 }
0x3ea9   :  { %3664 = vst.msk [vmem:[#allocation3 + $0x18] sm:$0xff] %vm330_vm2, %v3662_v16  ;;  %5274 = vmatmul.mubr.msk.f32.vlgmr.msra.gmra.mxu1 %vm330_vm2, %v3662_v16 }
0x3eaa   :  { %5300 = vmatpush3.msra.mxu1 %v6852_v46  ;;  %5307 = vmatprep.mubr.msk.f32.mxu1 %vm5884_vm0, %v5883_v0 }
0x3eab   :  { %5301 = vmatprep.subr.mxu1 %v5883_v0 }
0x3eac   :  { %5302 = vmatpush3.msra.mxu1 %v6858_v62 }
0x3ead   :  { %5303 = vmatprep.subr.mxu1 %v5883_v0 }
0x3eae   :  { %5304 = vmatpush3.msra.mxu1 %v6865_v14 }
0x3eaf   :  { %5305 = vmatprep.subr.mxu1 %v5883_v0 }
0x3eb0   :  { %5306 = vmatpush3.msra.mxu1 %v6872_v42  ;;  %v3780_v24 = vld [vmem:[#allocation3 + $0x18] sm:$0xff] }
0x3eb1   :  { %5308 = vmatmul.mubr.msk.f32.vlgmr.msra.gmra.mxu1 %vm330_vm2, %v2473_v60  ;;  %5294 = vmatmul.mubr.msk.f32.gmra.mxu0 %vm330_vm2, %v3780_v24 }
0x3eb2   :  { %5310 = vmatprep.subr.mxu1 %v5883_v0  ;;  %5318 = vmatprep.mubr.msk.f32.mxu1 %vm5884_vm0, %v5883_v0 }
0x3eb3   :  { %5311 = vmatpush3.msra.mxu1 %v6852_v46  ;;  %5296 = vmatprep.mubr.msk.f32.mxu0 %vm5884_vm0, %v5883_v0 }
0x3eb4   :  { %5312 = vmatprep.subr.mxu1 %v5883_v0 }
0x3eb5   :  { %5313 = vmatpush3.msra.mxu1 %v6858_v62 }
0x3eb6   :  { %5314 = vmatprep.subr.mxu1 %v5883_v0 }
0x3eb7   :  { %5315 = vmatpush3.msra.mxu1 %v6865_v14 }
0x3eb8   :  { %5316 = vmatprep.subr.mxu1 %v5883_v0 }
0x3eb9   :  { %5317 = vmatpush3.msra.mxu1 %v6872_v42 }
0x3eba   :  { %5332 = vmatprep.subr.mxu1 %v5883_v0 }
0x3f69   :  { %v3734_v34 = vpop.f32.mrf.mxu1 }
0x3f6a   :  { %v3738_v17 = vadd.f32 %v3734_v34, %v3245_v5 }
0x3f6b   :  { %v5275_v20 = vpop.f32.mrf.mxu1 }
0x3f6c   :  { %v4635_v51 = vmul.f32 -1.442695, %v3738_v17 }
0x3f71   :  { %v3967_v8 = vpop.f32.mrf.mxu1  ;;  %v6910_v41 = vpop.f32.mrf.mxu0 }
0x3f72   :  { %v3971_v6 = vadd.f32 %v3967_v8, %v3870_v23 }
0x3f73   :  { %v5309_v7 = vpop.f32.mrf.mxu1  ;;  %v5295_v22 = vpop.f32.mrf.mxu0 }
0x3f74   :  { %5611 = vtanh.f32 %v3971_v6  ;;  %v4643_v55 = vmul.f32 -1.442695, %v3971_v6 }
0x3f76   :  { %5613 = vpow2.f32 %v4643_v55 }
0x3f81   :  { %v5612_v54 = vpop.eup %5611 }
0x3f82   :  { %3981 = vrot.lane.b32.xlu0 %v5612_v54, %s5885_s3 }
0x3f83   :  { %v5614_v15 = vpop.eup %5613 }
0x3f84   :  { %v3975_v2 = vadd.f32 1.0, %v5614_v15 }
0x3f86   :  { %5615 = vrcp.f32 %v3975_v2 }
0x3f93   :  { %v5616_v25 = vpop.eup %5615 }
0x3f94   :  { %v3979_v27 = vmul.f32 %v5616_v25, %v6828_v33 }
0x3ff4   :  { %v3982_v26 = vpop.permute.xlu0 %3981 }
0x3ff5   :  { %v3984_v56 = vmul.f32 %v5616_v25, %v3982_v26  ;;  %v4421_v26 = vld [vmem:[%s7055_s20 + $0x18] sm:$0xff] }
0x3ff7   :  { %3986 = vrot.lane.b32.xlu1 %v3984_v56, %s5886_s4 }
0x4069   :  { %v3987_v31 = vpop.permute.xlu1 %3986 }
0x406a   :  { %v3989_v1 = vadd.f32 %v3987_v31, %v3979_v27  ;;  %v4420_v27 = vld [vmem:[%s7055_s20 + $0x10] sm:$0xff]  ;;  %v4419_v31 = vld [vmem:[%s7055_s20 + $0x8] sm:$0xff] }
0x406c   :  { %5617 = vtanh.f32 %v3989_v1 }
0x406d   :  { %5619 = vtanh.f32 %v3738_v17  ;;  %v3880_v17 = vadd.f32 %v6906_v19, %v6838_v47 }
0x406e   :  { %5621 = vpow2.f32 %v4635_v51 }
0x4079   :  { %v5618_v21 = vpop.eup %5617 }
0x407a   :  { %3992 = vrot.lane.b32.xlu0 %v5618_v21, %s5885_s3  ;;  %v5620_v18 = vpop.eup %5619 }
0x407b   :  { %v5622_v28 = vpop.eup %5621 }
0x407c   :  { %v3742_v29 = vadd.f32 1.0, %v5622_v28  ;;  %v3885_v28 = vadd.f32 %v6906_v19, %v6910_v41 }
0x407e   :  { %3748 = vrot.lane.b32.xlu0 %v5620_v18, %s5885_s3  ;;  %5623 = vrcp.f32 %v3742_v29 }
0x408b   :  { %v5624_v3 = vpop.eup %5623 }
0x408c   :  { %v3746_v38 = vmul.f32 %v5624_v3, %v6845_v61 }
0x40ec   :  { %v3993_v30 = vpop.permute.xlu0 %3992 }
0x40ed   :  { %v3995_v32 = vmul.f32 %v5616_v25, %v3993_v30 }
0x40ef   :  { %3997 = vrot.lane.b32.xlu1 %v3995_v32, %s5886_s4 }
0x40f0   :  { %v3749_v33 = vpop.permute.xlu0 %3748 }
0x40f1   :  { %v3751_v4 = vmul.f32 %v5624_v3, %v3749_v33 }
0x40f3   :  { %3753 = vrot.lane.b32.xlu0 %v3751_v4, %s5886_s4 }
0x4161   :  { %v3998_v37 = vpop.permute.xlu1 %3997 }
0x4162   :  { %4000 = vst.msk [vmem:[#allocation2] sm:$0xff] %vm330_vm2, %v3998_v37  ;;  %5319 = vmatmul.mubr.msk.f32.vlgmr.msra.gmra.mxu1 %vm330_vm2, %v3998_v37 }
0x4163   :  { %5333 = vmatpush3.msra.mxu1 %v6852_v46  ;;  %5340 = vmatprep.mubr.msk.f32.mxu1 %vm5884_vm0, %v5883_v0 }
0x4164   :  { %5334 = vmatprep.subr.mxu1 %v5883_v0 }
0x4165   :  { %v3754_v10 = vpop.permute.xlu0 %3753  ;;  %5335 = vmatpush3.msra.mxu1 %v6858_v62 }
0x4166   :  { %v3756_v39 = vadd.f32 %v3754_v10, %v3746_v38  ;;  %5336 = vmatprep.subr.mxu1 %v5883_v0 }
0x4167   :  { %5337 = vmatpush3.msra.mxu1 %v6865_v14 }
0x4168   :  { %5625 = vtanh.f32 %v3756_v39  ;;  %5338 = vmatprep.subr.mxu1 %v5883_v0 }
0x4169   :  { %5339 = vmatpush3.msra.mxu1 %v6872_v42  ;;  %v4413_v21 = vld [vmem:[#allocation2] sm:$0xff] }
0x416a   :  { %5354 = vmatprep.subr.mxu1 %v5883_v0 }
0x4175   :  { %v5626_v40 = vpop.eup %5625 }
0x4176   :  { %3759 = vrot.lane.b32.xlu0 %v5626_v40, %s5885_s3 }
0x41e8   :  { %v3760_v43 = vpop.permute.xlu0 %3759 }
0x41e9   :  { %v3762_v36 = vmul.f32 %v5624_v3, %v3760_v43  ;;  %v6996_v3 = vld [vmem:[%s7056_s21] ss:$0 sm:$0xff] }
0x41eb   :  { %3764 = vrot.lane.b32.xlu0 %v3762_v36, %s5886_s4 }
0x4222   :  { %v4070_v48 = vpop.f32.mrf.mxu1 }
0x4223   :  { %v4074_v49 = vadd.f32 %v4070_v48, %v3875_v45 }
0x4224   :  { %v5320_v50 = vpop.f32.mrf.mxu1 }
0x4225   :  { %5627 = vtanh.f32 %v4074_v49  ;;  %v4645_v59 = vmul.f32 -1.442695, %v4074_v49 }
0x4227   :  { %5629 = vpow2.f32 %v4645_v59 }
0x4232   :  { %v5628_v53 = vpop.eup %5627 }
0x4233   :  { %4084 = vrot.lane.b32.xlu1 %v5628_v53, %s5885_s3 }
0x4234   :  { %v5630_v63 = vpop.eup %5629 }
0x4235   :  { %v4078_v44 = vadd.f32 1.0, %v5630_v63 }
0x4237   :  { %5631 = vrcp.f32 %v4078_v44 }
0x4244   :  { %v5632_v11 = vpop.eup %5631 }
0x4245   :  { %v4082_v12 = vmul.f32 %v5632_v11, %v3989_v1  ;;  %v4418_v1 = vld [vmem:[%s7055_s20] sm:$0xff] }
0x425d   :  { %v3765_v52 = vpop.permute.xlu0 %3764 }
0x425e   :  { %3767 = vst.msk [vmem:[#allocation3 + $0x20] sm:$0xff] %vm330_vm2, %v3765_v52 }
0x4265   :  { %v3781_v57 = vld [vmem:[#allocation3 + $0x20] sm:$0xff] }
0x4266   :  { %5297 = vmatmul.mubr.msk.f32.gmra.mxu0 %vm330_vm2, %v3781_v57 }
0x4267   :  { %5329 = vmatprep.mubr.msk.f32.mxu0 %vm5884_vm0, %v5883_v0 }
0x42a5   :  { %v4085_v60 = vpop.permute.xlu1 %4084 }
0x42a6   :  { %v4087_v58 = vmul.f32 %v5632_v11, %v4085_v60 }
0x42a8   :  { %4089 = vrot.lane.b32.xlu1 %v4087_v58, %s5886_s4 }
0x431a   :  { %v4090_v61 = vpop.permute.xlu1 %4089 }
0x431b   :  { %v4092_v13 = vadd.f32 %v4090_v61, %v4082_v12 }
0x431d   :  { %5633 = vtanh.f32 %v4092_v13 }
0x4326   :  { %v6942_v9 = vpop.f32.mrf.mxu0 }
0x4327   :  { %v3890_v61 = vadd.f32 %v6906_v19, %v6942_v9 }
0x4328   :  { %v5298_v35 = vpop.f32.mrf.mxu0 }
0x432a   :  { %v5634_v16 = vpop.eup %5633 }
0x432b   :  { %4095 = vrot.lane.b32.xlu1 %v5634_v16, %s5885_s3 }
0x439d   :  { %v4096_v24 = vpop.permute.xlu1 %4095 }
0x439e   :  { %v4098_v5 = vmul.f32 %v5632_v11, %v4096_v24 }
0x43a0   :  { %4100 = vrot.lane.b32.xlu1 %v4098_v5, %s5886_s4 }
0x4412   :  { %v4101_v34 = vpop.permute.xlu1 %4100 }
0x4413   :  { %4103 = vst.msk [vmem:[#allocation2 + $0x8] sm:$0xff] %vm330_vm2, %v4101_v34  ;;  %5330 = vmatmul.mubr.msk.f32.vlgmr.msra.gmra.mxu0 %vm330_vm2, %v4101_v34 }
0x4414   :  { %5344 = vmatpush3.msra.mxu0 %v6852_v46  ;;  %5351 = vmatprep.mubr.msk.f32.mxu0 %vm5884_vm0, %v5883_v0 }
0x4415   :  { %5345 = vmatprep.subr.mxu0 %v5883_v0 }
0x4416   :  { %5346 = vmatpush3.msra.mxu0 %v6858_v62 }
0x4417   :  { %5347 = vmatprep.subr.mxu0 %v5883_v0 }
0x4418   :  { %5348 = vmatpush3.msra.mxu0 %v6865_v14 }
0x4419   :  { %5349 = vmatprep.subr.mxu0 %v5883_v0 }
0x441a   :  { %5350 = vmatpush3.msra.mxu0 %v6872_v42  ;;  %v4414_v18 = vld [vmem:[#allocation2 + $0x8] sm:$0xff] }
0x44d3   :  { %v4173_v20 = vpop.f32.mrf.mxu0 }
0x44d4   :  { %v4177_v46 = vadd.f32 %v4173_v20, %v3880_v17 }
0x44d5   :  { %v5331_v23 = vpop.f32.mrf.mxu0 }
0x44d6   :  { %5635 = vtanh.f32 %v4177_v46  ;;  %v4647_v6 = vmul.f32 -1.442695, %v4177_v46 }
0x44d8   :  { %5637 = vpow2.f32 %v4647_v6 }
0x44e3   :  { %v5636_v8 = vpop.eup %5635 }
0x44e4   :  { %4187 = vrot.lane.b32.xlu0 %v5636_v8, %s5885_s3 }
0x44e5   :  { %v5638_v62 = vpop.eup %5637 }
0x44e6   :  { %v4181_v7 = vadd.f32 1.0, %v5638_v62 }
0x44e8   :  { %5639 = vrcp.f32 %v4181_v7 }
0x44f5   :  { %v5640_v14 = vpop.eup %5639 }
0x44f6   :  { %v4185_v42 = vmul.f32 %v5640_v14, %v4092_v13 }
0x4556   :  { %v4188_v22 = vpop.permute.xlu0 %4187 }
0x4557   :  { %v4190_v54 = vmul.f32 %v5640_v14, %v4188_v22 }
0x4559   :  { %4192 = vrot.lane.b32.xlu1 %v4190_v54, %s5886_s4 }
0x45cb   :  { %v4193_v55 = vpop.permute.xlu1 %4192 }
0x45cc   :  { %v4195_v47 = vadd.f32 %v4193_v55, %v4185_v42 }
0x45ce   :  { %5641 = vtanh.f32 %v4195_v47 }
0x45db   :  { %v5642_v15 = vpop.eup %5641 }
0x45dc   :  { %4198 = vrot.lane.b32.xlu0 %v5642_v15, %s5885_s3 }
0x464e   :  { %v4199_v2 = vpop.permute.xlu0 %4198 }
0x464f   :  { %v4201_v25 = vmul.f32 %v5640_v14, %v4199_v2 }
0x4651   :  { %4203 = vrot.lane.b32.xlu1 %v4201_v25, %s5886_s4 }
0x46c3   :  { %v4204_v56 = vpop.permute.xlu1 %4203 }
0x46c4   :  { %4206 = vst.msk [vmem:[#allocation2 + $0x10] sm:$0xff] %vm330_vm2, %v4204_v56  ;;  %5341 = vmatmul.mubr.msk.f32.vlgmr.msra.gmra.mxu1 %vm330_vm2, %v4204_v56 }
0x46c5   :  { %5355 = vmatpush3.msra.mxu1 %v4421_v26  ;;  %5362 = vmatprep.mubr.msk.f32.mxu1 %vm5884_vm0, %v5883_v0 }
0x46c6   :  { %5356 = vmatprep.subr.mxu1 %v5883_v0 }
0x46c7   :  { %5357 = vmatpush3.msra.mxu1 %v4420_v27 }
0x46c8   :  { %5358 = vmatprep.subr.mxu1 %v5883_v0 }
0x46c9   :  { %5359 = vmatpush3.msra.mxu1 %v4419_v31 }
0x46ca   :  { %5360 = vmatprep.subr.mxu1 %v5883_v0 }
0x46cb   :  { %5361 = vmatpush3.msra.mxu1 %v4418_v1  ;;  %v4415_v51 = vld [vmem:[#allocation2 + $0x10] sm:$0xff] }
0x46cc   :  { %5363 = vmatmul.mubr.msk.f32.vlgmr.msra.gmra.mxu1 %vm330_vm2, %v4413_v21 }
0x46cd   :  { %5365 = vmatprep.mubr.msk.f32.mxu1 %vm5884_vm0, %v5883_v0 }
0x46d0   :  { %5366 = vmatmul.mubr.msk.f32.gmra.mxu1 %vm330_vm2, %v4414_v18 }
0x46d1   :  { %5368 = vmatprep.mubr.msk.f32.mxu1 %vm5884_vm0, %v5883_v0 }
0x46d4   :  { %5369 = vmatmul.mubr.msk.f32.gmra.mxu1 %vm330_vm2, %v4415_v51 }
0x46d5   :  { %5371 = vmatprep.mubr.msk.f32.mxu1 %vm5884_vm0, %v5883_v0 }
0x4784   :  { %v4276_v29 = vpop.f32.mrf.mxu1 }
0x4785   :  { %v4280_v30 = vadd.f32 %v4276_v29, %v3885_v28 }
0x4786   :  { %v5342_v32 = vpop.f32.mrf.mxu1 }
0x4787   :  { %5643 = vtanh.f32 %v4280_v30  ;;  %v4649_v45 = vmul.f32 -1.442695, %v4280_v30 }
0x4789   :  { %5645 = vpow2.f32 %v4649_v45 }
0x478c   :  { %v4510_v33 = vpop.f32.mrf.mxu1 }
0x478d   :  { %v4511_v4 = vadd.f32 %v6996_v3, %v4510_v33 }
0x478e   :  { %v5364_v37 = vpop.f32.mrf.mxu1 }
0x478f   :  { %4534 = vst [vmem:[%s7057_s22] sm:$0xff] %v4511_v4 }
0x4790   :  { %v4515_v38 = vpop.f32.mrf.mxu1 }
0x4791   :  { %v4516_v41 = vadd.f32 %v6996_v3, %v4515_v38 }
0x4792   :  { %v5367_v10 = vpop.f32.mrf.mxu1 }
0x4793   :  { %4535 = vst [vmem:[%s7057_s22 + $0x8] sm:$0xff] %v4516_v41 }
0x4794   :  { %v5644_v39 = vpop.eup %5643  ;;  %v4520_v40 = vpop.f32.mrf.mxu1 }
0x4795   :  { %v4521_v43 = vadd.f32 %v6996_v3, %v4520_v40  ;;  %4290 = vrot.lane.b32.xlu0 %v5644_v39, %s5885_s3 }
0x4796   :  { %v5370_v36 = vpop.f32.mrf.mxu1  ;;  %v5646_v48 = vpop.eup %5645 }
0x4797   :  { %4536 = vst [vmem:[%s7057_s22 + $0x10] sm:$0xff] %v4521_v43  ;;  %v4284_v49 = vadd.f32 1.0, %v5646_v48 }
0x4799   :  { %5647 = vrcp.f32 %v4284_v49 }
0x47a6   :  { %v5648_v50 = vpop.eup %5647 }
0x47a7   :  { %v4288_v57 = vmul.f32 %v5648_v50, %v4195_v47 }
0x4807   :  { %v4291_v53 = vpop.permute.xlu0 %4290 }
0x4808   :  { %v4293_v52 = vmul.f32 %v5648_v50, %v4291_v53 }
0x480a   :  { %4295 = vrot.lane.b32.xlu1 %v4293_v52, %s5886_s4 }
0x487c   :  { %v4296_v59 = vpop.permute.xlu1 %4295 }
0x487d   :  { %v4298_v63 = vadd.f32 %v4296_v59, %v4288_v57 }
0x487f   :  { %5649 = vtanh.f32 %v4298_v63 }
0x488c   :  { %v5650_v44 = vpop.eup %5649 }
0x488d   :  { %4301 = vrot.lane.b32.xlu0 %v5650_v44, %s5885_s3 }
0x48ff   :  { %v4302_v11 = vpop.permute.xlu0 %4301 }
0x4900   :  { %v4304_v60 = vmul.f32 %v5648_v50, %v4302_v11 }
0x4902   :  { %4306 = vrot.lane.b32.xlu1 %v4304_v60, %s5886_s4 }
0x4974   :  { %v4307_v58 = vpop.permute.xlu1 %4306 }
0x4975   :  { %4309 = vst.msk [vmem:[#allocation2 + $0x18] sm:$0xff] %vm330_vm2, %v4307_v58  ;;  %5352 = vmatmul.mubr.msk.f32.vlgmr.msra.gmra.mxu0 %vm330_vm2, %v4307_v58 }
0x497c   :  { %v4416_v12 = vld [vmem:[#allocation2 + $0x18] sm:$0xff] }
0x497d   :  { %5372 = vmatmul.mubr.msk.f32.gmra.mxu1 %vm330_vm2, %v4416_v12 }
0x497e   :  { %5374 = vmatprep.mubr.msk.f32.mxu1 %vm5884_vm0, %v5883_v0 }
0x4a35   :  { %v4379_v13 = vpop.f32.mrf.mxu0 }
0x4a36   :  { %v4383_v35 = vadd.f32 %v4379_v13, %v3890_v61 }
0x4a37   :  { %v5353_v16 = vpop.f32.mrf.mxu0 }
0x4a38   :  { %5651 = vtanh.f32 %v4383_v35  ;;  %v4651_v20 = vmul.f32 -1.442695, %v4383_v35 }
0x4a3a   :  { %5653 = vpow2.f32 %v4651_v20 }
0x4a3d   :  { %v4525_v24 = vpop.f32.mrf.mxu1 }
0x4a3e   :  { %v4526_v5 = vadd.f32 %v6996_v3, %v4525_v24 }
0x4a3f   :  { %v5373_v34 = vpop.f32.mrf.mxu1 }
0x4a40   :  { %4537 = vst [vmem:[%s7057_s22 + $0x18] sm:$0xff] %v4526_v5 }
0x4a45   :  { %v5652_v17 = vpop.eup %5651 }
0x4a46   :  { %4393 = vrot.lane.b32.xlu0 %v5652_v17, %s5885_s3 }
0x4a47   :  { %v5654_v0 = vpop.eup %5653 }
0x4a48   :  { %v4387_v46 = vadd.f32 1.0, %v5654_v0 }
0x4a4a   :  { %5655 = vrcp.f32 %v4387_v46 }
0x4a57   :  { %v5656_v19 = vpop.eup %5655 }
0x4a58   :  { %v4391_v8 = vmul.f32 %v5656_v19, %v4298_v63 }
0x4ab8   :  { %v4394_v9 = vpop.permute.xlu0 %4393 }
0x4ab9   :  { %v4396_v23 = vmul.f32 %v5656_v19, %v4394_v9 }
0x4abb   :  { %4398 = vrot.lane.b32.xlu1 %v4396_v23, %s5886_s4 }
0x4b2d   :  { %v4399_v6 = vpop.permute.xlu1 %4398 }
0x4b2e   :  { %v4401_v62 = vadd.f32 %v4399_v6, %v4391_v8 }
0x4b30   :  { %5657 = vtanh.f32 %v4401_v62 }
0x4b3d   :  { %v5658_v7 = vpop.eup %5657 }
0x4b3e   :  { %4404 = vrot.lane.b32.xlu0 %v5658_v7, %s5885_s3 }
0x4bb0   :  { %v4405_v14 = vpop.permute.xlu0 %4404 }
0x4bb1   :  { %v4407_v22 = vmul.f32 %v5656_v19, %v4405_v14 }
0x4bb3   :  { %4409 = vrot.lane.b32.xlu1 %v4407_v22, %s5886_s4 }
0x4c25   :  { %v4410_v54 = vpop.permute.xlu1 %4409 }
0x4c26   :  { %4412 = vst.msk [vmem:[#allocation2 + $0x20] sm:$0xff] %vm330_vm2, %v4410_v54 }
0x4c2d   :  { %v4417_v42 = vld [vmem:[#allocation2 + $0x20] sm:$0xff] }
0x4c2e   :  { %5375 = vmatmul.mubr.msk.f32.gmra.mxu1 %vm330_vm2, %v4417_v42 }
0x4cee   :  { %v4530_v55 = vpop.f32.mrf.mxu1 }
0x4cef   :  { %v4531_v47 = vadd.f32 %v6996_v3, %v4530_v55 }
0x4cf0   :  { %v5376_v15 = vpop.f32.mrf.mxu1 }
0x4cf1   :  { %4538 = vst [vmem:[%s7057_s22 + $0x20] sm:$0xff] %v4531_v47 }
0x4cf2   :  { %4543 = vsyncpa [#allocation6], 1 }
0x4cf3   :  { %4544 = vsyncpa [#allocation8], 1 }
0x4cf4   :  { %4545 = vsyncpa [#allocation11], 1 }
0x4cf5   :  { %4546 = vsyncpa [#allocation14], 1 }
0x4cf6   :  { %4547 = vsyncpa [#allocation17], 1 }
0x4cf7   :  { %4548 = vsyncpa [#allocation20], 1 }

</bundles_post_ra>
